<compile_context>
chip_gen: v7x
topology: tpu7x:2x2x1
jax: 0.10.0
libtpu: 0.0.40
codegen_flags: <defaults>
</compile_context>

<pallas_src>
import functools
import math

import numpy as np

import jax
import jax.numpy as jnp
from jax.experimental import pallas as pl
from jax.experimental.pallas import tpu as pltpu


def _softplus(v):
    # numerically stable softplus (matches torch.F.softplus within tolerance)
    return jnp.maximum(v, 0.0) + jnp.log(1.0 + jnp.exp(-jnp.abs(v)))


def _silu(v):
    return v * jax.nn.sigmoid(v)          # logistic lowers to the EUP


def minlstm_kernel(
    x_ref,        # (BT, S, D)
    tri_ref,      # (S, S)        lower- (fwd) / upper- (flipped) triangular mask
    cmask_ref,    # (BT*S, 9)     per-position conv edge masks (0/1)
    wup_x_ref,    # (D, inner)    proj_up, xm half
    wup_z_ref,    # (D, inner)    proj_up, z half
    bup_x_ref,    # (1, inner)
    bup_z_ref,    # (1, inner)
    wconv_ref,    # (9, inner)    depthwise 3x3 taps, row-major (dh+1)*3+(dw+1)
    bconv_ref,    # (1, inner)
    wf_ref,       # (1, inner)    grouped 1x1 conv == per-channel scale
    wi_ref,       # (1, inner)
    wh_ref,       # (1, inner)
    skip_ref,     # (1, inner)
    wdown_ref,    # (inner, D)
    bdown_ref,    # (1, D)
    out_ref,      # (BT, S, D)
    *,
    H: int,
    W: int,
    BT: int,
    last_row: int,
):
    S = H * W
    TOT = BT * S
    D = x_ref.shape[-1]
    eps = 1e-8

    x_flat = x_ref[...].reshape(TOT, D)                     # (BT*S, D)

    # ---- proj_up (xm half only; z is computed later to bound its live range)
    xm = jnp.dot(x_flat, wup_x_ref[...],
                 preferred_element_type=jnp.float32) + bup_x_ref[...]

    # ---- depthwise 3x3 "same" conv on the (H, W) grid ----------------------
    # Done on the flat (BT*S, inner) slab with sublane rolls (XLU) + 0/1 edge
    # masks.  Rolls that cross a row / image boundary land only on positions
    # whose mask is 0, so batching all BT images in one slab is exact.
    taps = [(dh, dw) for dh in (-1, 0, 1) for dw in (-1, 0, 1)]
    acc = xm * wconv_ref[4:5, :] + bconv_ref[...]           # center tap
    for k, (dh, dw) in enumerate(taps):
        if dh == 0 and dw == 0:
            continue
        delta = dh * W + dw
        rolled = pltpu.roll(xm, shift=(-delta) % TOT, axis=0)
        acc = acc + rolled * (cmask_ref[:, k:k + 1] * wconv_ref[k:k + 1, :])
    act = _silu(acc)                                        # (BT*S, inner)

    # ---- minLSTM gates (grouped 1x1 conv == per-channel scale) -------------
    f_gate = act * wf_ref[...]
    i_gate = act * wi_ref[...]
    hidden = act * wh_ref[...]

    diff = _softplus(-f_gate) - _softplus(-i_gate)
    log_f = -_softplus(diff)
    log_i = log_f + diff                   # softplus(-d) == softplus(d) - d
    log_th = jnp.where(hidden >= 0.0,
                       jnp.log(jnp.maximum(hidden, 0.0) + 0.5 + eps),
                       -_softplus(-hidden) + eps)
    log_vals = log_i + log_th
    lf_eps = log_f + eps

    skip_act = act * skip_ref[...]

    # ---- last-step of the log-space parallel scan, per image ---------------
    tri = tri_ref[...]                                      # (S, S)
    pieces = []
    for b in range(BT):
        lf_b = lf_eps[b * S:(b + 1) * S, :]                 # aligned slices
        lv_b = log_vals[b * S:(b + 1) * S, :]
        cums = jnp.dot(tri, lf_b, preferred_element_type=jnp.float32)
        v = lv_b - cums
        vm = jnp.max(v, axis=0, keepdims=True)
        lse = vm + jnp.log(jnp.sum(jnp.exp(v - vm), axis=0, keepdims=True))
        a_last = cums[last_row:last_row + 1, :]             # total cum-coeff
        h_last = jnp.exp(a_last + lse)                      # (1, inner)
        pieces.append(h_last + skip_act[b * S:(b + 1) * S, :])
    h = pieces[0] if BT == 1 else jnp.concatenate(pieces, axis=0)

    # ---- z gate (computed late), proj_down ----------------------------------
    z = jnp.dot(x_ref[...].reshape(TOT, D), wup_z_ref[...],
                preferred_element_type=jnp.float32) + bup_z_ref[...]
    h = h * _silu(z)
    out = jnp.dot(h, wdown_ref[...],
                  preferred_element_type=jnp.float32) + bdown_ref[...]
    out_ref[...] = out.reshape(BT, S, D)


def _conv_edge_masks(H, W, BT):
    """(BT*S, 9) 0/1 masks: tap k valid at position (h, w) iff neighbor in-grid."""
    S = H * W
    hh = np.arange(S) // W
    ww = np.arange(S) % W
    m = np.zeros((S, 9), np.float32)
    k = 0
    for dh in (-1, 0, 1):
        for dw in (-1, 0, 1):
            ok = (hh + dh >= 0) & (hh + dh < H) & (ww + dw >= 0) & (ww + dw < W)
            m[:, k] = ok.astype(np.float32)
            k += 1
    return jnp.asarray(np.tile(m, (BT, 1)))


def _tri_mask(S, flip):
    r = np.arange(S)[:, None]
    c = np.arange(S)[None, :]
    m = (c >= r) if flip else (c <= r)      # suffix- vs prefix-inclusive cumsum
    return jnp.asarray(m.astype(np.float32))


def minlstm_forward(x, params, *, direction, H, W, batch_tile=None):
    """Forward of the PyTorch minLSTM module (conv_kind='2d', kernel 3)."""
    B, S, D = x.shape
    assert S == H * W
    flip = direction == "rowwise_from_bot_right"
    BT = batch_tile or B
    assert B % BT == 0, "batch must be divisible by the batch tile"

    wconv = params["wconv"]
    if flip:
        wconv = wconv[::-1]                 # 180deg rotation of the 3x3 taps

    plist = [params["wup_x"], params["wup_z"], params["bup_x"], params["bup_z"],
             wconv, params["bconv"], params["wf"], params["wi"], params["wh"],
             params["skip"], params["wdown"], params["bdown"]]

    tri = _tri_mask(S, flip)
    cmask = _conv_edge_masks(H, W, BT)

    in_specs = [pl.BlockSpec((BT, S, D), lambda i: (i, 0, 0)),
                pl.BlockSpec((S, S), lambda i: (0, 0)),
                pl.BlockSpec((BT * S, 9), lambda i: (0, 0))]
    in_specs += [pl.BlockSpec(p.shape, lambda i: (0, 0)) for p in plist]

    kernel = functools.partial(minlstm_kernel, H=H, W=W, BT=BT,
                               last_row=(0 if flip else S - 1))
    return pl.pallas_call(
        kernel,
        out_shape=jax.ShapeDtypeStruct((B, S, D), jnp.float32),
        grid=(B // BT,),
        in_specs=in_specs,
        out_specs=pl.BlockSpec((BT, S, D), lambda i: (i, 0, 0)),
        compiler_params=pltpu.CompilerParams(
            dimension_semantics=("parallel",)),
    )(x, tri, cmask, *plist)


def init_params(key, dim, inner):
    ks = jax.random.split(key, 8)
    std_up = math.sqrt(2.0 / (5.0 * dim))          # small_init_
    std_cell = math.sqrt(2.0 / (5.0 * inner))      # small_init_ (cell gates)
    std_down = 2.0 / 1.0 / math.sqrt(dim)          # wang_init_ (num_blocks=1)
    wup = (jax.random.normal(ks[0], (dim, 2 * inner)) * std_up).astype(jnp.float32)
    return dict(
        wup_x=wup[:, :inner],                       # torch.chunk: first half
        wup_z=wup[:, inner:],                       # second half
        bup_x=jnp.zeros((1, inner), jnp.float32),
        bup_z=jnp.zeros((1, inner), jnp.float32),
        # SequenceConv2d keeps PyTorch default init; deterministic synthetic init
        wconv=(jax.random.normal(ks[1], (9, inner)) / 3.0).astype(jnp.float32),
        bconv=(jax.random.normal(ks[2], (1, inner)) * 0.1).astype(jnp.float32),
        wf=(jax.random.normal(ks[3], (1, inner)) * std_cell).astype(jnp.float32),
        wi=(jax.random.normal(ks[4], (1, inner)) * std_cell).astype(jnp.float32),
        wh=(jax.random.normal(ks[5], (1, inner)) * std_cell).astype(jnp.float32),
        skip=jnp.ones((1, inner), jnp.float32),
        wdown=(jax.random.normal(ks[6], (inner, dim)) * std_down).astype(jnp.float32),
        bdown=jnp.zeros((1, dim), jnp.float32),
    )


if __name__ == "__main__":
    B, dim, H, W = 4, 32, 8, 8
    S = H * W
    inner = 2 * dim                        # expansion = 2

    key = jax.random.PRNGKey(0)
    kx, kp = jax.random.split(key)
    x = jax.random.normal(kx, (B, S, dim), dtype=jnp.float32)
    params = init_params(kp, dim, inner)

    out_tl = minlstm_forward(x, params, direction="rowwise_from_top_left",
                             H=H, W=W, batch_tile=2)
    out_br = minlstm_forward(x, params, direction="rowwise_from_bot_right",
                             H=H, W=W, batch_tile=2)
    out_tl, out_br = jax.block_until_ready((out_tl, out_br))

    assert out_tl.shape == (B, S, dim) and out_tl.dtype == jnp.float32
    assert out_br.shape == (B, S, dim) and out_br.dtype == jnp.float32
    assert bool(jnp.all(jnp.isfinite(out_tl)))
    assert bool(jnp.all(jnp.isfinite(out_br)))
    print("KERNEL_OK")
</pallas_src>

<mosaic_0001>
module attributes {stable_mosaic.version = 11 : i64} {
  func.func @minlstm_kernel(%arg0: i32, %arg1: memref<2x64x32xf32, #tpu.memory_space<vmem>>, %arg2: memref<64x64xf32, #tpu.memory_space<vmem>>, %arg3: memref<128x9xf32, #tpu.memory_space<vmem>>, %arg4: memref<32x64xf32, #tpu.memory_space<vmem>>, %arg5: memref<32x64xf32, #tpu.memory_space<vmem>>, %arg6: memref<1x64xf32, #tpu.memory_space<vmem>>, %arg7: memref<1x64xf32, #tpu.memory_space<vmem>>, %arg8: memref<9x64xf32, #tpu.memory_space<vmem>>, %arg9: memref<1x64xf32, #tpu.memory_space<vmem>>, %arg10: memref<1x64xf32, #tpu.memory_space<vmem>>, %arg11: memref<1x64xf32, #tpu.memory_space<vmem>>, %arg12: memref<1x64xf32, #tpu.memory_space<vmem>>, %arg13: memref<1x64xf32, #tpu.memory_space<vmem>>, %arg14: memref<64x32xf32, #tpu.memory_space<vmem>>, %arg15: memref<1x32xf32, #tpu.memory_space<vmem>>, %arg16: memref<2x64x32xf32, #tpu.memory_space<vmem>>) attributes {dimension_semantics = [#tpu.dimension_semantics<parallel>], iteration_bounds = array<i64: 2>, scalar_prefetch = 0 : i64, scratch_operands = 0 : i64, tpu.core_type = #tpu.core_type<tc>, window_params = [{transform_indices = @transform_0, window_bounds = array<i64: 2, 64, 32>}, {pipeline_mode = #tpu.pipeline_mode<synchronous>, transform_indices = @transform_1, window_bounds = array<i64: 64, 64>}, {pipeline_mode = #tpu.pipeline_mode<synchronous>, transform_indices = @transform_2, window_bounds = array<i64: 128, 9>}, {pipeline_mode = #tpu.pipeline_mode<synchronous>, transform_indices = @transform_3, window_bounds = array<i64: 32, 64>}, {pipeline_mode = #tpu.pipeline_mode<synchronous>, transform_indices = @transform_4, window_bounds = array<i64: 32, 64>}, {pipeline_mode = #tpu.pipeline_mode<synchronous>, transform_indices = @transform_5, window_bounds = array<i64: 1, 64>}, {pipeline_mode = #tpu.pipeline_mode<synchronous>, transform_indices = @transform_6, window_bounds = array<i64: 1, 64>}, {pipeline_mode = #tpu.pipeline_mode<synchronous>, transform_indices = @transform_7, window_bounds = array<i64: 9, 64>}, {pipeline_mode = #tpu.pipeline_mode<synchronous>, transform_indices = @transform_8, window_bounds = array<i64: 1, 64>}, {pipeline_mode = #tpu.pipeline_mode<synchronous>, transform_indices = @transform_9, window_bounds = array<i64: 1, 64>}, {pipeline_mode = #tpu.pipeline_mode<synchronous>, transform_indices = @transform_10, window_bounds = array<i64: 1, 64>}, {pipeline_mode = #tpu.pipeline_mode<synchronous>, transform_indices = @transform_11, window_bounds = array<i64: 1, 64>}, {pipeline_mode = #tpu.pipeline_mode<synchronous>, transform_indices = @transform_12, window_bounds = array<i64: 1, 64>}, {pipeline_mode = #tpu.pipeline_mode<synchronous>, transform_indices = @transform_13, window_bounds = array<i64: 64, 32>}, {pipeline_mode = #tpu.pipeline_mode<synchronous>, transform_indices = @transform_14, window_bounds = array<i64: 1, 32>}, {transform_indices = @transform_15, window_bounds = array<i64: 2, 64, 32>}]} {
    %c0 = arith.constant 0 : index
    %c0_0 = arith.constant 0 : index
    %c0_1 = arith.constant 0 : index
    %0 = vector.load %arg1[%c0, %c0_0, %c0_1] : memref<2x64x32xf32, #tpu.memory_space<vmem>>, vector<2x64x32xf32>
    %1 = vector.shape_cast %0 : vector<2x64x32xf32> to vector<128x32xf32>
    %c0_2 = arith.constant 0 : index
    %c0_3 = arith.constant 0 : index
    %2 = vector.load %arg4[%c0_2, %c0_3] : memref<32x64xf32, #tpu.memory_space<vmem>>, vector<32x64xf32>
    %cst = arith.constant dense<0.000000e+00> : vector<128x64xf32>
    %3 = tpu.matmul %1, %2, %cst {dimension_numbers = #tpu.dot_dimension_numbers<[1], [0], [0], [1], [0, 0, 1, 1], [], []>} : vector<128x32xf32>, vector<32x64xf32>, vector<128x64xf32> -> vector<128x64xf32>
    %c0_4 = arith.constant 0 : index
    %c0_5 = arith.constant 0 : index
    %4 = vector.load %arg6[%c0_4, %c0_5] : memref<1x64xf32, #tpu.memory_space<vmem>>, vector<1x64xf32>
    %5 = vector.broadcast %4 : vector<1x64xf32> to vector<128x64xf32>
    %6 = arith.addf %3, %5 : vector<128x64xf32>
    %c4 = arith.constant 4 : index
    %c0_6 = arith.constant 0 : index
    %7 = vector.load %arg8[%c4, %c0_6] : memref<9x64xf32, #tpu.memory_space<vmem>>, vector<1x64xf32>
    %8 = vector.broadcast %7 : vector<1x64xf32> to vector<128x64xf32>
    %9 = arith.mulf %6, %8 : vector<128x64xf32>
    %c0_7 = arith.constant 0 : index
    %c0_8 = arith.constant 0 : index
    %10 = vector.load %arg9[%c0_7, %c0_8] : memref<1x64xf32, #tpu.memory_space<vmem>>, vector<1x64xf32>
    %11 = vector.broadcast %10 : vector<1x64xf32> to vector<128x64xf32>
    %12 = arith.addf %9, %11 : vector<128x64xf32>
    %c9_i32 = arith.constant 9 : i32
    %13 = tpu.dynamic_rotate %6 by %c9_i32 dim 0 : vector<128x64xf32>, i32 -> vector<128x64xf32>
    %c0_9 = arith.constant 0 : index
    %c0_10 = arith.constant 0 : index
    %14 = vector.load %arg3[%c0_9, %c0_10] : memref<128x9xf32, #tpu.memory_space<vmem>>, vector<128x1xf32>
    %c0_11 = arith.constant 0 : index
    %c0_12 = arith.constant 0 : index
    %15 = vector.load %arg8[%c0_11, %c0_12] : memref<9x64xf32, #tpu.memory_space<vmem>>, vector<1x64xf32>
    %16 = vector.broadcast %14 : vector<128x1xf32> to vector<128x64xf32>
    %17 = vector.broadcast %15 : vector<1x64xf32> to vector<128x64xf32>
    %18 = arith.mulf %16, %17 : vector<128x64xf32>
    %19 = arith.mulf %13, %18 : vector<128x64xf32>
    %20 = arith.addf %12, %19 : vector<128x64xf32>
    %c8_i32 = arith.constant 8 : i32
    %21 = tpu.dynamic_rotate %6 by %c8_i32 dim 0 : vector<128x64xf32>, i32 -> vector<128x64xf32>
    %c0_13 = arith.constant 0 : index
    %c1 = arith.constant 1 : index
    %22 = vector.load %arg3[%c0_13, %c1] : memref<128x9xf32, #tpu.memory_space<vmem>>, vector<128x1xf32>
    %c1_14 = arith.constant 1 : index
    %c0_15 = arith.constant 0 : index
    %23 = vector.load %arg8[%c1_14, %c0_15] : memref<9x64xf32, #tpu.memory_space<vmem>>, vector<1x64xf32>
    %24 = vector.broadcast %22 : vector<128x1xf32> to vector<128x64xf32>
    %25 = vector.broadcast %23 : vector<1x64xf32> to vector<128x64xf32>
    %26 = arith.mulf %24, %25 : vector<128x64xf32>
    %27 = arith.mulf %21, %26 : vector<128x64xf32>
    %28 = arith.addf %20, %27 : vector<128x64xf32>
    %c7_i32 = arith.constant 7 : i32
    %29 = tpu.dynamic_rotate %6 by %c7_i32 dim 0 : vector<128x64xf32>, i32 -> vector<128x64xf32>
    %c0_16 = arith.constant 0 : index
    %c2 = arith.constant 2 : index
    %30 = vector.load %arg3[%c0_16, %c2] : memref<128x9xf32, #tpu.memory_space<vmem>>, vector<128x1xf32>
    %c2_17 = arith.constant 2 : index
    %c0_18 = arith.constant 0 : index
    %31 = vector.load %arg8[%c2_17, %c0_18] : memref<9x64xf32, #tpu.memory_space<vmem>>, vector<1x64xf32>
    %32 = vector.broadcast %30 : vector<128x1xf32> to vector<128x64xf32>
    %33 = vector.broadcast %31 : vector<1x64xf32> to vector<128x64xf32>
    %34 = arith.mulf %32, %33 : vector<128x64xf32>
    %35 = arith.mulf %29, %34 : vector<128x64xf32>
    %36 = arith.addf %28, %35 : vector<128x64xf32>
    %c1_i32 = arith.constant 1 : i32
    %37 = tpu.dynamic_rotate %6 by %c1_i32 dim 0 : vector<128x64xf32>, i32 -> vector<128x64xf32>
    %c0_19 = arith.constant 0 : index
    %c3 = arith.constant 3 : index
    %38 = vector.load %arg3[%c0_19, %c3] : memref<128x9xf32, #tpu.memory_space<vmem>>, vector<128x1xf32>
    %c3_20 = arith.constant 3 : index
    %c0_21 = arith.constant 0 : index
    %39 = vector.load %arg8[%c3_20, %c0_21] : memref<9x64xf32, #tpu.memory_space<vmem>>, vector<1x64xf32>
    %40 = vector.broadcast %38 : vector<128x1xf32> to vector<128x64xf32>
    %41 = vector.broadcast %39 : vector<1x64xf32> to vector<128x64xf32>
    %42 = arith.mulf %40, %41 : vector<128x64xf32>
    %43 = arith.mulf %37, %42 : vector<128x64xf32>
    %44 = arith.addf %36, %43 : vector<128x64xf32>
    %c127_i32 = arith.constant 127 : i32
    %45 = tpu.dynamic_rotate %6 by %c127_i32 dim 0 : vector<128x64xf32>, i32 -> vector<128x64xf32>
    %c0_22 = arith.constant 0 : index
    %c5 = arith.constant 5 : index
    %46 = vector.load %arg3[%c0_22, %c5] : memref<128x9xf32, #tpu.memory_space<vmem>>, vector<128x1xf32>
    %c5_23 = arith.constant 5 : index
    %c0_24 = arith.constant 0 : index
    %47 = vector.load %arg8[%c5_23, %c0_24] : memref<9x64xf32, #tpu.memory_space<vmem>>, vector<1x64xf32>
    %48 = vector.broadcast %46 : vector<128x1xf32> to vector<128x64xf32>
    %49 = vector.broadcast %47 : vector<1x64xf32> to vector<128x64xf32>
    %50 = arith.mulf %48, %49 : vector<128x64xf32>
    %51 = arith.mulf %45, %50 : vector<128x64xf32>
    %52 = arith.addf %44, %51 : vector<128x64xf32>
    %c121_i32 = arith.constant 121 : i32
    %53 = tpu.dynamic_rotate %6 by %c121_i32 dim 0 : vector<128x64xf32>, i32 -> vector<128x64xf32>
    %c0_25 = arith.constant 0 : index
    %c6 = arith.constant 6 : index
    %54 = vector.load %arg3[%c0_25, %c6] : memref<128x9xf32, #tpu.memory_space<vmem>>, vector<128x1xf32>
    %c6_26 = arith.constant 6 : index
    %c0_27 = arith.constant 0 : index
    %55 = vector.load %arg8[%c6_26, %c0_27] : memref<9x64xf32, #tpu.memory_space<vmem>>, vector<1x64xf32>
    %56 = vector.broadcast %54 : vector<128x1xf32> to vector<128x64xf32>
    %57 = vector.broadcast %55 : vector<1x64xf32> to vector<128x64xf32>
    %58 = arith.mulf %56, %57 : vector<128x64xf32>
    %59 = arith.mulf %53, %58 : vector<128x64xf32>
    %60 = arith.addf %52, %59 : vector<128x64xf32>
    %c120_i32 = arith.constant 120 : i32
    %61 = tpu.dynamic_rotate %6 by %c120_i32 dim 0 : vector<128x64xf32>, i32 -> vector<128x64xf32>
    %c0_28 = arith.constant 0 : index
    %c7 = arith.constant 7 : index
    %62 = vector.load %arg3[%c0_28, %c7] : memref<128x9xf32, #tpu.memory_space<vmem>>, vector<128x1xf32>
    %c7_29 = arith.constant 7 : index
    %c0_30 = arith.constant 0 : index
    %63 = vector.load %arg8[%c7_29, %c0_30] : memref<9x64xf32, #tpu.memory_space<vmem>>, vector<1x64xf32>
    %64 = vector.broadcast %62 : vector<128x1xf32> to vector<128x64xf32>
    %65 = vector.broadcast %63 : vector<1x64xf32> to vector<128x64xf32>
    %66 = arith.mulf %64, %65 : vector<128x64xf32>
    %67 = arith.mulf %61, %66 : vector<128x64xf32>
    %68 = arith.addf %60, %67 : vector<128x64xf32>
    %c119_i32 = arith.constant 119 : i32
    %69 = tpu.dynamic_rotate %6 by %c119_i32 dim 0 : vector<128x64xf32>, i32 -> vector<128x64xf32>
    %c0_31 = arith.constant 0 : index
    %c8 = arith.constant 8 : index
    %70 = vector.load %arg3[%c0_31, %c8] : memref<128x9xf32, #tpu.memory_space<vmem>>, vector<128x1xf32>
    %c8_32 = arith.constant 8 : index
    %c0_33 = arith.constant 0 : index
    %71 = vector.load %arg8[%c8_32, %c0_33] : memref<9x64xf32, #tpu.memory_space<vmem>>, vector<1x64xf32>
    %72 = vector.broadcast %70 : vector<128x1xf32> to vector<128x64xf32>
    %73 = vector.broadcast %71 : vector<1x64xf32> to vector<128x64xf32>
    %74 = arith.mulf %72, %73 : vector<128x64xf32>
    %75 = arith.mulf %69, %74 : vector<128x64xf32>
    %76 = arith.addf %68, %75 : vector<128x64xf32>
    %77 = arith.negf %76 : vector<128x64xf32>
    %78 = math.exp %77 : vector<128x64xf32>
    %cst_34 = arith.constant 1.000000e+00 : f32
    %79 = vector.broadcast %cst_34 : f32 to vector<128x64xf32>
    %80 = arith.addf %79, %78 : vector<128x64xf32>
    %81 = arith.divf %79, %80 : vector<128x64xf32>
    %82 = arith.mulf %76, %81 : vector<128x64xf32>
    %c0_35 = arith.constant 0 : index
    %c0_36 = arith.constant 0 : index
    %83 = vector.load %arg10[%c0_35, %c0_36] : memref<1x64xf32, #tpu.memory_space<vmem>>, vector<1x64xf32>
    %84 = vector.broadcast %83 : vector<1x64xf32> to vector<128x64xf32>
    %85 = arith.mulf %82, %84 : vector<128x64xf32>
    %c0_37 = arith.constant 0 : index
    %c0_38 = arith.constant 0 : index
    %86 = vector.load %arg11[%c0_37, %c0_38] : memref<1x64xf32, #tpu.memory_space<vmem>>, vector<1x64xf32>
    %87 = vector.broadcast %86 : vector<1x64xf32> to vector<128x64xf32>
    %88 = arith.mulf %82, %87 : vector<128x64xf32>
    %c0_39 = arith.constant 0 : index
    %c0_40 = arith.constant 0 : index
    %89 = vector.load %arg12[%c0_39, %c0_40] : memref<1x64xf32, #tpu.memory_space<vmem>>, vector<1x64xf32>
    %90 = vector.broadcast %89 : vector<1x64xf32> to vector<128x64xf32>
    %91 = arith.mulf %82, %90 : vector<128x64xf32>
    %cst_41 = arith.constant 0.000000e+00 : f32
    %92 = vector.broadcast %cst_41 : f32 to vector<128x64xf32>
    %93 = arith.subf %92, %85 : vector<128x64xf32>
    %cst_42 = arith.constant 0.000000e+00 : f32
    %94 = vector.broadcast %cst_42 : f32 to vector<128x64xf32>
    %95 = arith.maximumf %93, %94 : vector<128x64xf32>
    %96 = math.absf %93 : vector<128x64xf32>
    %cst_43 = arith.constant 0.000000e+00 : f32
    %97 = vector.broadcast %cst_43 : f32 to vector<128x64xf32>
    %98 = arith.subf %97, %96 : vector<128x64xf32>
    %99 = math.exp %98 : vector<128x64xf32>
    %cst_44 = arith.constant 1.000000e+00 : f32
    %100 = vector.broadcast %cst_44 : f32 to vector<128x64xf32>
    %101 = arith.addf %100, %99 : vector<128x64xf32>
    %102 = math.log %101 : vector<128x64xf32>
    %103 = arith.addf %95, %102 : vector<128x64xf32>
    %cst_45 = arith.constant 0.000000e+00 : f32
    %104 = vector.broadcast %cst_45 : f32 to vector<128x64xf32>
    %105 = arith.subf %104, %88 : vector<128x64xf32>
    %cst_46 = arith.constant 0.000000e+00 : f32
    %106 = vector.broadcast %cst_46 : f32 to vector<128x64xf32>
    %107 = arith.maximumf %105, %106 : vector<128x64xf32>
    %108 = math.absf %105 : vector<128x64xf32>
    %cst_47 = arith.constant 0.000000e+00 : f32
    %109 = vector.broadcast %cst_47 : f32 to vector<128x64xf32>
    %110 = arith.subf %109, %108 : vector<128x64xf32>
    %111 = math.exp %110 : vector<128x64xf32>
    %cst_48 = arith.constant 1.000000e+00 : f32
    %112 = vector.broadcast %cst_48 : f32 to vector<128x64xf32>
    %113 = arith.addf %112, %111 : vector<128x64xf32>
    %114 = math.log %113 : vector<128x64xf32>
    %115 = arith.addf %107, %114 : vector<128x64xf32>
    %116 = arith.subf %103, %115 : vector<128x64xf32>
    %cst_49 = arith.constant 0.000000e+00 : f32
    %117 = vector.broadcast %cst_49 : f32 to vector<128x64xf32>
    %118 = arith.maximumf %116, %117 : vector<128x64xf32>
    %119 = math.absf %116 : vector<128x64xf32>
    %cst_50 = arith.constant 0.000000e+00 : f32
    %120 = vector.broadcast %cst_50 : f32 to vector<128x64xf32>
    %121 = arith.subf %120, %119 : vector<128x64xf32>
    %122 = math.exp %121 : vector<128x64xf32>
    %cst_51 = arith.constant 1.000000e+00 : f32
    %123 = vector.broadcast %cst_51 : f32 to vector<128x64xf32>
    %124 = arith.addf %123, %122 : vector<128x64xf32>
    %125 = math.log %124 : vector<128x64xf32>
    %126 = arith.addf %118, %125 : vector<128x64xf32>
    %cst_52 = arith.constant 0.000000e+00 : f32
    %127 = vector.broadcast %cst_52 : f32 to vector<128x64xf32>
    %128 = arith.subf %127, %126 : vector<128x64xf32>
    %129 = arith.addf %128, %116 : vector<128x64xf32>
    %cst_53 = arith.constant 0.000000e+00 : f32
    %130 = vector.broadcast %cst_53 : f32 to vector<128x64xf32>
    %131 = arith.cmpf oge, %91, %130 : vector<128x64xf32>
    %cst_54 = arith.constant 0.000000e+00 : f32
    %132 = vector.broadcast %cst_54 : f32 to vector<128x64xf32>
    %133 = arith.maximumf %91, %132 : vector<128x64xf32>
    %cst_55 = arith.constant 5.000000e-01 : f32
    %134 = vector.broadcast %cst_55 : f32 to vector<128x64xf32>
    %135 = arith.addf %133, %134 : vector<128x64xf32>
    %cst_56 = arith.constant 9.99999993E-9 : f32
    %136 = vector.broadcast %cst_56 : f32 to vector<128x64xf32>
    %137 = arith.addf %135, %136 : vector<128x64xf32>
    %138 = math.log %137 : vector<128x64xf32>
    %cst_57 = arith.constant 0.000000e+00 : f32
    %139 = vector.broadcast %cst_57 : f32 to vector<128x64xf32>
    %140 = arith.subf %139, %91 : vector<128x64xf32>
    %cst_58 = arith.constant 0.000000e+00 : f32
    %141 = vector.broadcast %cst_58 : f32 to vector<128x64xf32>
    %142 = arith.maximumf %140, %141 : vector<128x64xf32>
    %143 = math.absf %140 : vector<128x64xf32>
    %cst_59 = arith.constant 0.000000e+00 : f32
    %144 = vector.broadcast %cst_59 : f32 to vector<128x64xf32>
    %145 = arith.subf %144, %143 : vector<128x64xf32>
    %146 = math.exp %145 : vector<128x64xf32>
    %cst_60 = arith.constant 1.000000e+00 : f32
    %147 = vector.broadcast %cst_60 : f32 to vector<128x64xf32>
    %148 = arith.addf %147, %146 : vector<128x64xf32>
    %149 = math.log %148 : vector<128x64xf32>
    %150 = arith.addf %142, %149 : vector<128x64xf32>
    %cst_61 = arith.constant 0.000000e+00 : f32
    %151 = vector.broadcast %cst_61 : f32 to vector<128x64xf32>
    %152 = arith.subf %151, %150 : vector<128x64xf32>
    %cst_62 = arith.constant 9.99999993E-9 : f32
    %153 = vector.broadcast %cst_62 : f32 to vector<128x64xf32>
    %154 = arith.addf %152, %153 : vector<128x64xf32>
    %155 = arith.select %131, %138, %154 : vector<128x64xi1>, vector<128x64xf32>
    %156 = arith.addf %129, %155 : vector<128x64xf32>
    %cst_63 = arith.constant 9.99999993E-9 : f32
    %157 = vector.broadcast %cst_63 : f32 to vector<128x64xf32>
    %158 = arith.addf %128, %157 : vector<128x64xf32>
    %c0_64 = arith.constant 0 : index
    %c0_65 = arith.constant 0 : index
    %159 = vector.load %arg13[%c0_64, %c0_65] : memref<1x64xf32, #tpu.memory_space<vmem>>, vector<1x64xf32>
    %160 = vector.broadcast %159 : vector<1x64xf32> to vector<128x64xf32>
    %161 = arith.mulf %82, %160 : vector<128x64xf32>
    %c0_66 = arith.constant 0 : index
    %c0_67 = arith.constant 0 : index
    %162 = vector.load %arg2[%c0_66, %c0_67] : memref<64x64xf32, #tpu.memory_space<vmem>>, vector<64x64xf32>
    %163 = vector.extract_strided_slice %158 {offsets = [0, 0], sizes = [64, 64], strides = [1, 1]} : vector<128x64xf32> to vector<64x64xf32>
    %164 = vector.extract_strided_slice %156 {offsets = [0, 0], sizes = [64, 64], strides = [1, 1]} : vector<128x64xf32> to vector<64x64xf32>
    %cst_68 = arith.constant dense<0.000000e+00> : vector<64x64xf32>
    %165 = tpu.matmul %162, %163, %cst_68 {dimension_numbers = #tpu.dot_dimension_numbers<[1], [0], [0], [1], [0, 0, 1, 1], [], []>} : vector<64x64xf32>, vector<64x64xf32>, vector<64x64xf32> -> vector<64x64xf32>
    %166 = arith.subf %164, %165 : vector<64x64xf32>
    %cst_69 = arith.constant dense<0xFF800000> : vector<64xf32>
    %167 = vector.multi_reduction <maximumf>, %166, %cst_69 [0] : vector<64x64xf32> to vector<64xf32>
    %168 = vector.shape_cast %167 : vector<64xf32> to vector<1x64xf32>
    %169 = vector.broadcast %168 : vector<1x64xf32> to vector<64x64xf32>
    %170 = arith.subf %166, %169 : vector<64x64xf32>
    %171 = math.exp %170 : vector<64x64xf32>
    %cst_70 = arith.constant dense<0.000000e+00> : vector<64xf32>
    %172 = vector.multi_reduction <add>, %171, %cst_70 [0] : vector<64x64xf32> to vector<64xf32>
    %173 = vector.shape_cast %172 : vector<64xf32> to vector<1x64xf32>
    %174 = math.log %173 : vector<1x64xf32>
    %175 = arith.addf %168, %174 : vector<1x64xf32>
    %176 = vector.extract_strided_slice %165 {offsets = [63, 0], sizes = [1, 64], strides = [1, 1]} : vector<64x64xf32> to vector<1x64xf32>
    %177 = arith.addf %176, %175 : vector<1x64xf32>
    %178 = math.exp %177 : vector<1x64xf32>
    %179 = vector.extract_strided_slice %161 {offsets = [0, 0], sizes = [64, 64], strides = [1, 1]} : vector<128x64xf32> to vector<64x64xf32>
    %180 = vector.broadcast %178 : vector<1x64xf32> to vector<64x64xf32>
    %181 = arith.addf %180, %179 : vector<64x64xf32>
    %182 = vector.extract_strided_slice %158 {offsets = [64, 0], sizes = [64, 64], strides = [1, 1]} : vector<128x64xf32> to vector<64x64xf32>
    %183 = vector.extract_strided_slice %156 {offsets = [64, 0], sizes = [64, 64], strides = [1, 1]} : vector<128x64xf32> to vector<64x64xf32>
    %cst_71 = arith.constant dense<0.000000e+00> : vector<64x64xf32>
    %184 = tpu.matmul %162, %182, %cst_71 {dimension_numbers = #tpu.dot_dimension_numbers<[1], [0], [0], [1], [0, 0, 1, 1], [], []>} : vector<64x64xf32>, vector<64x64xf32>, vector<64x64xf32> -> vector<64x64xf32>
    %185 = arith.subf %183, %184 : vector<64x64xf32>
    %cst_72 = arith.constant dense<0xFF800000> : vector<64xf32>
    %186 = vector.multi_reduction <maximumf>, %185, %cst_72 [0] : vector<64x64xf32> to vector<64xf32>
    %187 = vector.shape_cast %186 : vector<64xf32> to vector<1x64xf32>
    %188 = vector.broadcast %187 : vector<1x64xf32> to vector<64x64xf32>
    %189 = arith.subf %185, %188 : vector<64x64xf32>
    %190 = math.exp %189 : vector<64x64xf32>
    %cst_73 = arith.constant dense<0.000000e+00> : vector<64xf32>
    %191 = vector.multi_reduction <add>, %190, %cst_73 [0] : vector<64x64xf32> to vector<64xf32>
    %192 = vector.shape_cast %191 : vector<64xf32> to vector<1x64xf32>
    %193 = math.log %192 : vector<1x64xf32>
    %194 = arith.addf %187, %193 : vector<1x64xf32>
    %195 = vector.extract_strided_slice %184 {offsets = [63, 0], sizes = [1, 64], strides = [1, 1]} : vector<64x64xf32> to vector<1x64xf32>
    %196 = arith.addf %195, %194 : vector<1x64xf32>
    %197 = math.exp %196 : vector<1x64xf32>
    %198 = vector.extract_strided_slice %161 {offsets = [64, 0], sizes = [64, 64], strides = [1, 1]} : vector<128x64xf32> to vector<64x64xf32>
    %199 = vector.broadcast %197 : vector<1x64xf32> to vector<64x64xf32>
    %200 = arith.addf %199, %198 : vector<64x64xf32>
    %201 = tpu.concatenate %181, %200 in 0 : vector<64x64xf32>, vector<64x64xf32> -> vector<128x64xf32>
    %c0_74 = arith.constant 0 : index
    %c0_75 = arith.constant 0 : index
    %c0_76 = arith.constant 0 : index
    %202 = vector.load %arg1[%c0_74, %c0_75, %c0_76] : memref<2x64x32xf32, #tpu.memory_space<vmem>>, vector<2x64x32xf32>
    %203 = vector.shape_cast %202 : vector<2x64x32xf32> to vector<128x32xf32>
    %c0_77 = arith.constant 0 : index
    %c0_78 = arith.constant 0 : index
    %204 = vector.load %arg5[%c0_77, %c0_78] : memref<32x64xf32, #tpu.memory_space<vmem>>, vector<32x64xf32>
    %cst_79 = arith.constant dense<0.000000e+00> : vector<128x64xf32>
    %205 = tpu.matmul %203, %204, %cst_79 {dimension_numbers = #tpu.dot_dimension_numbers<[1], [0], [0], [1], [0, 0, 1, 1], [], []>} : vector<128x32xf32>, vector<32x64xf32>, vector<128x64xf32> -> vector<128x64xf32>
    %c0_80 = arith.constant 0 : index
    %c0_81 = arith.constant 0 : index
    %206 = vector.load %arg7[%c0_80, %c0_81] : memref<1x64xf32, #tpu.memory_space<vmem>>, vector<1x64xf32>
    %207 = vector.broadcast %206 : vector<1x64xf32> to vector<128x64xf32>
    %208 = arith.addf %205, %207 : vector<128x64xf32>
    %209 = arith.negf %208 : vector<128x64xf32>
    %210 = math.exp %209 : vector<128x64xf32>
    %cst_82 = arith.constant 1.000000e+00 : f32
    %211 = vector.broadcast %cst_82 : f32 to vector<128x64xf32>
    %212 = arith.addf %211, %210 : vector<128x64xf32>
    %213 = arith.divf %211, %212 : vector<128x64xf32>
    %214 = arith.mulf %208, %213 : vector<128x64xf32>
    %215 = arith.mulf %201, %214 : vector<128x64xf32>
    %c0_83 = arith.constant 0 : index
    %c0_84 = arith.constant 0 : index
    %216 = vector.load %arg14[%c0_83, %c0_84] : memref<64x32xf32, #tpu.memory_space<vmem>>, vector<64x32xf32>
    %cst_85 = arith.constant dense<0.000000e+00> : vector<128x32xf32>
    %217 = tpu.matmul %215, %216, %cst_85 {dimension_numbers = #tpu.dot_dimension_numbers<[1], [0], [0], [1], [0, 0, 1, 1], [], []>} : vector<128x64xf32>, vector<64x32xf32>, vector<128x32xf32> -> vector<128x32xf32>
    %c0_86 = arith.constant 0 : index
    %c0_87 = arith.constant 0 : index
    %218 = vector.load %arg15[%c0_86, %c0_87] : memref<1x32xf32, #tpu.memory_space<vmem>>, vector<1x32xf32>
    %219 = vector.broadcast %218 : vector<1x32xf32> to vector<128x32xf32>
    %220 = arith.addf %217, %219 : vector<128x32xf32>
    %221 = vector.shape_cast %220 : vector<128x32xf32> to vector<2x64x32xf32>
    %c0_88 = arith.constant 0 : index
    %c0_89 = arith.constant 0 : index
    %c0_90 = arith.constant 0 : index
    %222 = vector.load %arg16[%c0_88, %c0_89, %c0_90] : memref<2x64x32xf32, #tpu.memory_space<vmem>>, vector<2x64x32xf32>
    tpu.vector_store %arg16[%c0_88, %c0_89, %c0_90], %221 {strides = array<i32>} : memref<2x64x32xf32, #tpu.memory_space<vmem>>, vector<2x64x32xf32>,
    return
  }
  func.func @transform_0(%arg0: i32) -> (i32, i32, i32) {
    %c0_i32 = arith.constant 0 : i32
    %c0_i32_0 = arith.constant 0 : i32
    %c0_i32_1 = arith.constant 0 : i32
    return %arg0, %c0_i32, %c0_i32_0 : i32, i32, i32
  }
  func.func @transform_1(%arg0: i32) -> (i32, i32) {
    %c0_i32 = arith.constant 0 : i32
    %c0_i32_0 = arith.constant 0 : i32
    %c0_i32_1 = arith.constant 0 : i32
    return %c0_i32, %c0_i32_0 : i32, i32
  }
  func.func @transform_2(%arg0: i32) -> (i32, i32) {
    %c0_i32 = arith.constant 0 : i32
    %c0_i32_0 = arith.constant 0 : i32
    %c0_i32_1 = arith.constant 0 : i32
    return %c0_i32, %c0_i32_0 : i32, i32
  }
  func.func @transform_3(%arg0: i32) -> (i32, i32) {
    %c0_i32 = arith.constant 0 : i32
    %c0_i32_0 = arith.constant 0 : i32
    %c0_i32_1 = arith.constant 0 : i32
    return %c0_i32, %c0_i32_0 : i32, i32
  }
  func.func @transform_4(%arg0: i32) -> (i32, i32) {
    %c0_i32 = arith.constant 0 : i32
    %c0_i32_0 = arith.constant 0 : i32
    %c0_i32_1 = arith.constant 0 : i32
    return %c0_i32, %c0_i32_0 : i32, i32
  }
  func.func @transform_5(%arg0: i32) -> (i32, i32) {
    %c0_i32 = arith.constant 0 : i32
    %c0_i32_0 = arith.constant 0 : i32
    %c0_i32_1 = arith.constant 0 : i32
    return %c0_i32, %c0_i32_0 : i32, i32
  }
  func.func @transform_6(%arg0: i32) -> (i32, i32) {
    %c0_i32 = arith.constant 0 : i32
    %c0_i32_0 = arith.constant 0 : i32
    %c0_i32_1 = arith.constant 0 : i32
    return %c0_i32, %c0_i32_0 : i32, i32
  }
  func.func @transform_7(%arg0: i32) -> (i32, i32) {
    %c0_i32 = arith.constant 0 : i32
    %c0_i32_0 = arith.constant 0 : i32
    %c0_i32_1 = arith.constant 0 : i32
    return %c0_i32, %c0_i32_0 : i32, i32
  }
  func.func @transform_8(%arg0: i32) -> (i32, i32) {
    %c0_i32 = arith.constant 0 : i32
    %c0_i32_0 = arith.constant 0 : i32
    %c0_i32_1 = arith.constant 0 : i32
    return %c0_i32, %c0_i32_0 : i32, i32
  }
  func.func @transform_9(%arg0: i32) -> (i32, i32) {
    %c0_i32 = arith.constant 0 : i32
    %c0_i32_0 = arith.constant 0 : i32
    %c0_i32_1 = arith.constant 0 : i32
    return %c0_i32, %c0_i32_0 : i32, i32
  }
  func.func @transform_10(%arg0: i32) -> (i32, i32) {
    %c0_i32 = arith.constant 0 : i32
    %c0_i32_0 = arith.constant 0 : i32
    %c0_i32_1 = arith.constant 0 : i32
    return %c0_i32, %c0_i32_0 : i32, i32
  }
  func.func @transform_11(%arg0: i32) -> (i32, i32) {
    %c0_i32 = arith.constant 0 : i32
    %c0_i32_0 = arith.constant 0 : i32
    %c0_i32_1 = arith.constant 0 : i32
    return %c0_i32, %c0_i32_0 : i32, i32
  }
  func.func @transform_12(%arg0: i32) -> (i32, i32) {
    %c0_i32 = arith.constant 0 : i32
    %c0_i32_0 = arith.constant 0 : i32
    %c0_i32_1 = arith.constant 0 : i32
    return %c0_i32, %c0_i32_0 : i32, i32
  }
  func.func @transform_13(%arg0: i32) -> (i32, i32) {
    %c0_i32 = arith.constant 0 : i32
    %c0_i32_0 = arith.constant 0 : i32
    %c0_i32_1 = arith.constant 0 : i32
    return %c0_i32, %c0_i32_0 : i32, i32
  }
  func.func @transform_14(%arg0: i32) -> (i32, i32) {
    %c0_i32 = arith.constant 0 : i32
    %c0_i32_0 = arith.constant 0 : i32
    %c0_i32_1 = arith.constant 0 : i32
    return %c0_i32, %c0_i32_0 : i32, i32
  }
  func.func @transform_15(%arg0: i32) -> (i32, i32, i32) {
    %c0_i32 = arith.constant 0 : i32
    %c0_i32_0 = arith.constant 0 : i32
    %c0_i32_1 = arith.constant 0 : i32
    return %arg0, %c0_i32, %c0_i32_0 : i32, i32, i32
  }
}

</mosaic_0001>

<bundles_post_ra>
// kernel: tpu_custom_call.1
= control target key start
LH: loop header
LB: loop body
LE: loop exit
PB: predicated region body
PF: predicated region fallthrough
CT: control target
= control target key end

     0   :  { %s4990_s18 = smov 0   ;;  %s7855_s0 = inlined_call_operand.vmem [shape: f32[4,64,32], index: 0, kind: input, shape index: {}]   ;;  %s7856_s1 = inlined_call_operand.vmem [shape: f32[64,64], index: 1, kind: input, shape index: {}]   ;;  %s7857_s2 = inlined_call_operand.vmem [shape: f32[128,9], index: 2, kind: input, shape index: {}]   ;;  %s7858_s3 = inlined_call_operand.vmem [shape: f32[32,64], index: 3, kind: input, shape index: {}]   ;;  %s7859_s4 = inlined_call_operand.vmem [shape: f32[32,64], index: 4, kind: input, shape index: {}]   ;;  %s7860_s5 = inlined_call_operand.vmem [shape: f32[1,64], index: 5, kind: input, shape index: {}]   ;;  %s7861_s6 = inlined_call_operand.vmem [shape: f32[1,64], index: 6, kind: input, shape index: {}]   ;;  %s7862_s7 = inlined_call_operand.vmem [shape: f32[9,64], index: 7, kind: input, shape index: {}]   ;;  %s7863_s8 = inlined_call_operand.vmem [shape: f32[1,64], index: 8, kind: input, shape index: {}]   ;;  %s7864_s9 = inlined_call_operand.vmem [shape: f32[1,64], index: 9, kind: input, shape index: {}]   ;;  %s7865_s10 = inlined_call_operand.vmem [shape: f32[1,64], index: 10, kind: input, shape index: {}]   ;;  %s7866_s11 = inlined_call_operand.vmem [shape: f32[1,64], index: 11, kind: input, shape index: {}]   ;;  %s7867_s12 = inlined_call_operand.vmem [shape: f32[1,64], index: 12, kind: input, shape index: {}]   ;;  %s7868_s13 = inlined_call_operand.vmem [shape: f32[64,32], index: 13, kind: input, shape index: {}]   ;;  %s7869_s14 = inlined_call_operand.vmem [shape: f32[1,32], index: 14, kind: input, shape index: {}]   ;;  %s7870_s15 = inlined_call_operand.vmem [shape: f32[4,64,32], index: 15, kind: output, shape index: {}]  }
   0x1 LB: > { %s3849_s19 = sadd.s32 4294967295, %s4900_s18   ;;  %p3853_p0 = scmp.ge.s32.totalorder %s4900_s18, 1  ;;  %s4900_s18 = sphi %s4990_s18, %s25_s18  }
   0x2   : > { %p439_p1 = scmp.lt.s32.totalorder %s4900_s18, 3 }
   0x4   : > { %p440_p2 = pnand %p3853_p0, %p439_p1 }
   0x6   : > { %443 = sbr.rel (%p440_p2) target bundleno = 1223 (0x4c7), region = 80 }
   0xd   : > { %v5001_v0 = vld [vmem:[%s7857_s2 + $0x8] sm:$0xff]  ;;  %v5006_v1 = vld [vmem:[%s7857_s2] sm:$0xff]  ;;  %v7877_v3 = vmov 8   ;;  %v7875_v4 = vmov 1   ;;  %v521_v6 = vld [vmem:[%s7858_s3 + $0x10] sm:$0xff]  ;;  %s3854_s30 = sshll.u32 %s3849_s19, 1 }
   0xe   : > { %v519_v2 = vld [vmem:[%s7858_s3] sm:$0xff]  ;;  %4340 = vset.pattern.permute.xlu0 %v7877_v3  ;;  %4321 = vset.pattern.permute.xlu1 %v7875_v4  ;;  %v520_v5 = vld [vmem:[%s7858_s3 + $0x8] sm:$0xff]  ;;  %v522_v8 = vld [vmem:[%s7858_s3 + $0x18] sm:$0xff]  ;;  %p490_p3 = scmp.lt.s32.totalorder %s3854_s30, 3  ;;  %vm530_vm0 = vcmask 261120   ;;  %v7885_v14 = vmov 0  }
   0xf   : > { %1693 = vperm.xlu0 %4340, %v5001_v0   ;;  %954 = vperm.xlu1 %4321, %v5006_v1   ;;  %v4233_v7 = vpack.c.bf16 %v520_v5, %v519_v2  ;;  %v5027_v9 = vld [vmem:[%s7857_s2 + $0x10] sm:$0xff]  ;;  %v4237_v10 = vpack.c.bf16 %v522_v8, %v521_v6  ;;  %v5047_v12 = vld [vmem:[%s7857_s2 + $0x18] sm:$0xff]  ;;  %v7883_v18 = vmov 2   ;;  %v5074_v21 = vld [vmem:[%s7857_s2 + $0x20] sm:$0xff]  ;;  %v7873_v25 = vmov 3  }
  0x10   : > { %s8341_s30 = smov (!%p490_p3, %s3854_s30), 3  ;;  %v5085_v24 = vld [vmem:[%s7857_s2 + $0x30] sm:$0xff]  ;;  %v5097_v28 = vld [vmem:[%s7857_s2 + $0x58] sm:$0xff]  ;;  %v5108_v31 = vld [vmem:[%s7857_s2 + $0x60] sm:$0xff]  ;;  %v7881_v36 = vmov 5   ;;  %v7871_v41 = vmov 6  }
  0x11   : > { %4234 = vmatprep.subr.bf16.mxu0 %v4233_v7  ;;  %s3975_s19 = sshll.u32 %s8341_s30, 6  ;;  %8020 = vst [vmem:[#allocation2_spill] sm:$0xff] %v5085_v24  ;;  %8021 = vst [vmem:[#allocation3_spill] sm:$0xff] %v5097_v28  ;;  %v5113_v32 = vld [vmem:[%s7857_s2 + $0x28] sm:$0xff]  ;;  %v5136_v37 = vld [vmem:[%s7857_s2 + $0x38] sm:$0xff]  ;;  %v7879_v43 = vmov 7  }
  0x12   : > { %4236 = vmatpush3.bf16.msra.mxu0 %v4233_v7  ;;  %s5039_s24 = scalar_lea.vmem %s7855_s0, %s3975_s19  ;;  %v5143_v38 = vld [vmem:[%s7857_s2 + $0x40] sm:$0xff]  ;;  %v5150_v39 = vld [vmem:[%s7857_s2 + $0x68] sm:$0xff]  ;;  %v5158_v40 = vld [vmem:[%s7857_s2 + $0x70] sm:$0xff]  ;;  %vm2864_vm7 = vcmask 523264   ;;  %s7818_s29 = scalar_lea.vmem %s7870_s15, %s3975_s19 }
  0x13   : > { %1697 = vperm.xlu0 %4340, %v5027_v9   ;;  %958 = vperm.xlu1 %4321, %v5001_v0   ;;  %v5042_v11 = vld [vmem:[%s5039_s24] sm:$0xff]  ;;  %v504_v13 = vld [vmem:[%s5039_s24 + $0x8] sm:$0xff]  ;;  %v505_v15 = vld [vmem:[%s5039_s24 + $0x10] sm:$0xff]  ;;  %8022 = vst [vmem:[#allocation4_spill] sm:$0xff] %v5150_v39 }
  0x14   : > { %4238 = vmatprep.subr.bf16.mxu0 %v4237_v10  ;;  %4081 = vmatprep.mubr.msk.f32.mxu0 %vm530_vm0, %v5042_v11  ;;  %v506_v16 = vld [vmem:[%s5039_s24 + $0x18] sm:$0xff]  ;;  %v507_v17 = vld [vmem:[%s5039_s24 + $0x20] sm:$0xff]  ;;  %v508_v19 = vld [vmem:[%s5039_s24 + $0x28] sm:$0xff]  ;;  %8023 = vst [vmem:[#allocation5_spill] sm:$0xff] %v5158_v40 }
  0x15   : > { %v509_v20 = vld [vmem:[%s5039_s24 + $0x30] sm:$0xff]  ;;  %v510_v22 = vld [vmem:[%s5039_s24 + $0x38] sm:$0xff]  ;;  %v511_v23 = vld [vmem:[%s5039_s24 + $0x40] sm:$0xff] }
  0x16   : > { %4240 = vmatpush3.bf16.msra.mxu0 %v4237_v10  ;;  %v512_v26 = vld [vmem:[%s5039_s24 + $0x48] sm:$0xff]  ;;  %v513_v27 = vld [vmem:[%s5039_s24 + $0x50] sm:$0xff]  ;;  %v514_v29 = vld [vmem:[%s5039_s24 + $0x58] sm:$0xff] }
  0x17   : > { %4348 = vset.pattern.permute.xlu0 %v7885_v14  ;;  %4322 = vset.pattern.permute.xlu1 %v7885_v14  ;;  %v515_v30 = vld [vmem:[%s5039_s24 + $0x60] sm:$0xff]  ;;  %v516_v33 = vld [vmem:[%s5039_s24 + $0x68] sm:$0xff]  ;;  %v517_v34 = vld [vmem:[%s5039_s24 + $0x70] sm:$0xff] }
  0x18   : > { %822 = vperm.xlu0 %4348, %v5006_v1   ;;  %837 = vperm.xlu1 %4322, %v5047_v12   ;;  %v518_v35 = vld [vmem:[%s5039_s24 + $0x78] sm:$0xff]  ;;  %v5199_v44 = vld [vmem:[%s7857_s2 + $0x50] sm:$0xff]  ;;  %v5217_v45 = vld [vmem:[%s7857_s2 + $0x48] sm:$0xff] }
  0x19   : > { %4082 = vmatmul.mubr.msk.f32.vlgmr.msra.gmra.mrb[0].mxu0 %vm530_vm0, %v504_v13  ;;  %v5182_v42 = vld [vmem:[%s7857_s2 + $0x78] sm:$0xff]  ;;  %8025 = vst [vmem:[#allocation7_spill] sm:$0xff] %v5199_v44  ;;  %8026 = vst [vmem:[#allocation8_spill] sm:$0xff] %v5217_v45 }
  0x1a   : > { %4084 = vmatprep.mubr.msk.f32.mxu0 %vm530_vm0, %v505_v15  ;;  %8024 = vst [vmem:[#allocation6_spill] sm:$0xff] %v5182_v42 }
  0x1c   : > { %827 = vperm.xlu0 %4348, %v5001_v0   ;;  %4323 = vset.pattern.permute.xlu1 %v7883_v18 }
  0x1d   : > { %4085 = vmatmul.mubr.msk.f32.gmra.mrb[2].mxu0 %vm530_vm0, %v506_v16  ;;  %1108 = vperm.xlu1 %4323, %v5001_v0  }
  0x1e   : > { %4087 = vmatprep.mubr.msk.f32.mxu0 %vm530_vm0, %v507_v17 }
  0x20   : > { %832 = vperm.xlu0 %4348, %v5027_v9  }
  0x21   : > { %4088 = vmatmul.mubr.msk.f32.gmra.mrb[4].mxu0 %vm530_vm0, %v508_v19  ;;  %4324 = vset.pattern.permute.xlu1 %v7875_v4 }
  0x22   : > { %962 = vperm.xlu1 %4324, %v5027_v9   ;;  %4090 = vmatprep.mubr.msk.f32.mxu0 %vm530_vm0, %v509_v20 }
  0x24   : > { %842 = vperm.xlu0 %4348, %v5074_v21  }
  0x25   : > { %4091 = vmatmul.mubr.msk.f32.gmra.mrb[6].mxu0 %vm530_vm0, %v510_v22 }
  0x26   : > { %4325 = vset.pattern.permute.xlu1 %v7873_v25  ;;  %4093 = vmatprep.mubr.msk.f32.mxu0 %vm530_vm0, %v511_v23 }
  0x27   : > { %1221 = vperm.xlu1 %4325, %v5006_v1  }
  0x28   : > { %852 = vperm.xlu0 %4348, %v5085_v24  }
  0x29   : > { %4094 = vmatmul.mubr.msk.f32.gmra.mrb[8].mxu0 %vm530_vm0, %v512_v26 }
  0x2a   : > { %4096 = vmatprep.mubr.msk.f32.mxu0 %vm530_vm0, %v513_v27 }
  0x2b   : > { %1225 = vperm.xlu1 %4325, %v5001_v0  }
  0x2c   : > { %877 = vperm.xlu0 %4348, %v5097_v28  }
  0x2d   : > { %4097 = vmatmul.mubr.msk.f32.gmra.mrb[10].mxu0 %vm530_vm0, %v514_v29  ;;  %v784_v29 = vlaneseq }
  0x2e   : > { %4099 = vmatprep.mubr.msk.f32.mxu0 %vm530_vm0, %v515_v30  ;;  %v5350_v30 = vld [vmem:[%s7862_s7 + $0x1] ss:$0 sm:$0xff] }
  0x2f   : > { %4326 = vset.pattern.permute.xlu1 %v7885_v14  ;;  %8031 = vst [vmem:[#allocation13_spill] sm:$0xff] %v5350_v30 }
  0x30   : > { %882 = vperm.xlu0 %4348, %v5108_v31   ;;  %847 = vperm.xlu1 %4326, %v5113_v32  }
  0x31   : > { %4100 = vmatmul.mubr.msk.f32.gmra.mrb[12].mxu0 %vm530_vm0, %v516_v33 }
  0x32   : > { %4102 = vmatprep.mubr.msk.f32.mxu0 %vm530_vm0, %v517_v34  ;;  %v5357_v34 = vld [vmem:[%s7862_s7] ss:$0 sm:$0xff] }
  0x34   : > { %4358 = vset.pattern.permute.xlu0 %v7875_v4  ;;  %4327 = vset.pattern.permute.xlu1 %v7883_v18 }
  0x35   : > { %4103 = vmatmul.mubr.msk.f32.gmra.mrb[14].mxu0 %vm530_vm0, %v518_v35  ;;  %966 = vperm.xlu0 %4358, %v5047_v12  }
  0x36   : > { %1112 = vperm.xlu1 %4327, %v5027_v9   ;;  %4169 = vmatprep.mubr.msk.f32.mxu0 %vm530_vm0, %v5042_v11 }
  0x39   : > { %970 = vperm.xlu0 %4358, %v5074_v21  }
  0x3a   : > { %4328 = vset.pattern.permute.xlu1 %v7881_v36 }
  0x3b   : > { %1338 = vperm.xlu1 %4328, %v5006_v1  }
  0x3d   : > { %982 = vperm.xlu0 %4358, %v5136_v37  }
  0x3f   : > { %1342 = vperm.xlu1 %4328, %v5001_v0  }
  0x41   : > { %986 = vperm.xlu0 %4358, %v5143_v38  }
  0x43   : > { %4329 = vset.pattern.permute.xlu1 %v7875_v4 }
  0x44   : > { %974 = vperm.xlu1 %4329, %v5113_v32  }
  0x45   : > { %1006 = vperm.xlu0 %4358, %v5150_v39  }
  0x48   : > { %4330 = vset.pattern.permute.xlu1 %v7873_v25 }
  0x49   : > { %1229 = vperm.xlu1 %4330, %v5027_v9   ;;  %1010 = vperm.xlu0 %4358, %v5158_v40  }
  0x4d   : > { %4331 = vset.pattern.permute.xlu1 %v7871_v41  ;;  %4371 = vset.pattern.permute.xlu0 %v7883_v18 }
  0x4e   : > { %1455 = vperm.xlu1 %4331, %v5006_v1   ;;  %1104 = vperm.xlu0 %4371, %v5006_v1  }
  0x52   : > { %1459 = vperm.xlu1 %4331, %v5001_v0   ;;  %1116 = vperm.xlu0 %4371, %v5047_v12  }
  0x56   : > { %4332 = vset.pattern.permute.xlu1 %v7885_v14  ;;  %1124 = vperm.xlu0 %4371, %v5113_v32  }
  0x57   : > { %857 = vperm.xlu1 %4332, %v5136_v37  }
  0x5a   : > { %1128 = vperm.xlu0 %4371, %v5085_v24  }
  0x5b   : > { %4333 = vset.pattern.permute.xlu1 %v7883_v18 }
  0x5c   : > { %1120 = vperm.xlu1 %4333, %v5074_v21  }
  0x5e   : > { %1148 = vperm.xlu0 %4371, %v5097_v28  }
  0x60   : > { %4334 = vset.pattern.permute.xlu1 %v7881_v36 }
  0x61   : > { %1346 = vperm.xlu1 %4334, %v5027_v9  }
  0x62   : > { %1152 = vperm.xlu0 %4371, %v5108_v31  }
  0x65   : > { %1350 = vperm.xlu1 %4334, %v5047_v12  }
  0x66   : > { %1164 = vperm.xlu0 %4371, %v5182_v42  }
  0x69   : > { %4335 = vset.pattern.permute.xlu1 %v7879_v43 }
  0x6a   : > { %1576 = vperm.xlu1 %4335, %v5001_v0   ;;  %4377 = vset.pattern.permute.xlu0 %v7879_v43 }
  0x6b   : > { %1572 = vperm.xlu0 %4377, %v5006_v1  }
  0x6e   : > { %4336 = vset.pattern.permute.xlu1 %v7875_v4 }
  0x6f   : > { %978 = vperm.xlu1 %4336, %v5085_v24   ;;  %1592 = vperm.xlu0 %4377, %v5113_v32  }
  0x73   : > { %4337 = vset.pattern.permute.xlu1 %v7873_v25  ;;  %1596 = vperm.xlu0 %4377, %v5085_v24  }
  0x74   : > { %1237 = vperm.xlu1 %4337, %v5074_v21  }
  0x77   : > { %1612 = vperm.xlu0 %4377, %v5199_v44  }
  0x78   : > { %1241 = vperm.xlu1 %4337, %v5113_v32  }
  0x7b   : > { %4379 = vset.pattern.permute.xlu0 %v7873_v25 }
  0x7c   : > { %4338 = vset.pattern.permute.xlu1 %v7871_v41  ;;  %1233 = vperm.xlu0 %4379, %v5047_v12  }
  0x7d   : > { %1467 = vperm.xlu1 %4338, %v5047_v12  }
  0x80   : > { %1249 = vperm.xlu0 %4379, %v5136_v37  }
  0x81   : > { %4339 = vset.pattern.permute.xlu1 %v7877_v3 }
  0x82   : > { %1689 = vperm.xlu1 %4339, %v5006_v1  }
  0x84   : > { %1253 = vperm.xlu0 %4379, %v5143_v38  }
  0x86   : > { %4341 = vset.pattern.permute.xlu1 %v7885_v14 }
  0x87   : > { %862 = vperm.xlu1 %4341, %v5143_v38  }
  0x88   : > { %1273 = vperm.xlu0 %4379, %v5150_v39  }
  0x8b   : > { %867 = vperm.xlu1 %4341, %v5217_v45  }
  0x8c   : > { %1281 = vperm.xlu0 %4379, %v5182_v42  }
  0x8e   : > { %v5221_v46 = vpop.permute.xlu1 %954  ;;  %v5223_v47 = vpop.permute.xlu0 %1693 }
  0x8f   : > { %4342 = vset.pattern.permute.xlu1 %v7883_v18 }
  0x90   : > { %1132 = vperm.xlu1 %4342, %v5136_v37   ;;  %4382 = vset.pattern.permute.xlu0 %v7881_v36 }
  0x91   : > { %1358 = vperm.xlu0 %4382, %v5113_v32  }
  0x92   : > { %v5229_v48 = vpop.permute.xlu1 %958  ;;  %v5231_v49 = vpop.permute.xlu0 %1697 }
  0x94   : > { %4343 = vset.pattern.permute.xlu1 %v7881_v36 }
  0x95   : > { %1354 = vperm.xlu1 %4343, %v5074_v21   ;;  %1362 = vperm.xlu0 %4382, %v5085_v24  }
  0x97   : > { %v5236_v50 = vpop.permute.xlu1 %837  ;;  %v5238_v51 = vpop.permute.xlu0 %822 }
  0x99   : > { %4344 = vset.pattern.permute.xlu1 %v7879_v43  ;;  %1382 = vperm.xlu0 %4382, %v5097_v28  }
  0x9a   : > { %1580 = vperm.xlu1 %4344, %v5027_v9  }
  0x9b   : > { %v5243_v52 = vpop.permute.xlu0 %827 }
  0x9c   : > { %v5245_v53 = vpop.permute.xlu1 %1108 }
  0x9d   : > { %1398 = vperm.xlu0 %4382, %v5182_v42  }
  0x9e   : > { %1584 = vperm.xlu1 %4344, %v5047_v12  }
  0x9f   : > { %v5249_v54 = vpop.permute.xlu0 %832 }
  0xa1   : > { %4386 = vset.pattern.permute.xlu0 %v7871_v41  ;;  %v5252_v55 = vpop.permute.xlu1 %962 }
  0xa2   : > { %4345 = vset.pattern.permute.xlu1 %v7875_v4  ;;  %1463 = vperm.xlu0 %4386, %v5027_v9  }
  0xa3   : > { %990 = vperm.xlu1 %4345, %v5217_v45   ;;  %v5257_v56 = vpop.permute.xlu0 %842 }
  0xa6   : > { %v5259_v57 = vpop.permute.xlu1 %1221  ;;  %1483 = vperm.xlu0 %4386, %v5136_v37  }
  0xa7   : > { %4346 = vset.pattern.permute.xlu1 %v7873_v25  ;;  %v5263_v58 = vpop.permute.xlu0 %852 }
  0xa8   : > { %1245 = vperm.xlu1 %4346, %v5085_v24  }
  0xaa   : > { %v5266_v59 = vpop.permute.xlu1 %1225  ;;  %1487 = vperm.xlu0 %4386, %v5143_v38  }
  0xab   : > { %v5269_v60 = vpop.permute.xlu0 %877 }
  0xac   : > { %4347 = vset.pattern.permute.xlu1 %v7871_v41 }
  0xad   : > { %1471 = vperm.xlu1 %4347, %v5074_v21  }
  0xae   : > { %1511 = vperm.xlu0 %4386, %v5158_v40  }
  0xaf   : > { %v5274_v61 = vpop.permute.xlu1 %847  ;;  %v5276_v62 = vpop.permute.xlu0 %882 }
  0xb0   : > { %8027 = vst [vmem:[#allocation9_spill] sm:$0xff] %v5276_v62 }
  0xb1   : > { %1475 = vperm.xlu1 %4347, %v5113_v32  }
  0xb2   : > { %4388 = vset.pattern.permute.xlu0 %v7877_v3 }
  0xb3   : > { %1717 = vperm.xlu0 %4388, %v5136_v37  }
  0xb4   : > { %v5281_v63 = vpop.permute.xlu0 %966 }
  0xb5   : > { %4349 = vset.pattern.permute.xlu1 %v7877_v3  ;;  %v5284_v0 = vpop.permute.xlu1 %1112 }
  0xb6   : > { %1701 = vperm.xlu1 %4349, %v5047_v12  }
  0xb7   : > { %1721 = vperm.xlu0 %4388, %v5143_v38  }
  0xb8   : > { %v5288_v1 = vpop.permute.xlu0 %970 }
  0xba   : > { %4350 = vset.pattern.permute.xlu1 %v7885_v14  ;;  %v5291_v2 = vpop.permute.xlu1 %1338  ;;  %v5416_v14 = vmul.f32 %v5357_v34, %v5249_v54  ;;  %v5437_v54 = vmul.f32 %v5357_v34, %v5263_v58 }
  0xbb   : > { %872 = vperm.xlu1 %4350, %v5199_v44   ;;  %1729 = vperm.xlu0 %4388, %v5199_v44  }
  0xbc   : > { %v5295_v5 = vpop.permute.xlu0 %982 }
  0xbe   : > { %v5297_v6 = vpop.permute.xlu1 %1342 }
  0xbf   : > { %4351 = vset.pattern.permute.xlu1 %v7883_v18  ;;  %1741 = vperm.xlu0 %4388, %v5150_v39   ;;  %v5390_v18 = vmul.f32 %v5350_v30, %v5229_v48  ;;  %v5410_v48 = vmul.f32 %v5357_v34, %v5243_v52  ;;  %v5429_v52 = vmul.f32 %v5357_v34, %v5257_v56 }
  0xc0   : > { %1136 = vperm.xlu1 %4351, %v5143_v38   ;;  %v5302_v7 = vpop.permute.xlu0 %986  ;;  %v5447_v56 = vmul.f32 %v5357_v34, %v5269_v60 }
  0xc2   : > { %8041 = vst [vmem:[#allocation23_spill] sm:$0xff] %v5447_v56 }
  0xc3   : > { %v5304_v8 = vpop.permute.xlu1 %974  ;;  %1745 = vperm.xlu0 %4388, %v5158_v40  }
  0xc4   : > { %1140 = vperm.xlu1 %4351, %v5217_v45   ;;  %v5308_v9 = vpop.permute.xlu0 %1006 }
  0xc5   : > { %8028 = vst [vmem:[#allocation10_spill] sm:$0xff] %v5308_v9  ;;  %v5483_v9 = vmul.f32 %v5350_v30, %v5304_v8 }
  0xc8   : > { %4352 = vset.pattern.permute.xlu1 %v7881_v36  ;;  %v5311_v10 = vpop.permute.xlu1 %1229  ;;  %v5313_v11 = vpop.permute.xlu0 %1010  ;;  %v5386_v36 = vshrl.u32 %v784_v29, 7 }
  0xc9   : > { %8029 = vst [vmem:[#allocation11_spill] sm:$0xff] %v5313_v11  ;;  %1366 = vperm.xlu1 %4352, %v5136_v37   ;;  %v5459_v11 = vmul.f32 %v5350_v30, %v5281_v63  ;;  %v5478_v63 = vmul.f32 %v5350_v30, %v5295_v5  ;;  %v5500_v5 = vld [vmem:[%s7862_s7 + $0x7] ss:$0 sm:$0xff] }
  0xca   : > { %8036 = vst [vmem:[#allocation18_spill] sm:$0xff] %v5386_v36  ;;  %vm786_vm1 = vcmp.lt.s32.totalorder %v5386_v36, 1  ;;  %8046 = vst [vmem:[#allocation28_spill] sm:$0xff] %v5500_v5  ;;  %vm1085_vm2 = vcmp.lt.s32.totalorder %v5386_v36, 7 }
  0xcd   : > { %4353 = vset.pattern.permute.xlu1 %v7879_v43  ;;  %v5317_v12 = vpop.permute.xlu1 %1455  ;;  %v5319_v13 = vpop.permute.xlu0 %1104  ;;  %v5384_v43 = vld [vmem:[%s7862_s7 + $0x3] ss:$0 sm:$0xff] }
  0xce   : > { %1588 = vperm.xlu1 %4353, %v5074_v21  }
  0xd1   : > { %v5322_v15 = vpop.permute.xlu1 %1459  ;;  %v5324_v16 = vpop.permute.xlu0 %1116 }
  0xd2   : > { %4354 = vset.pattern.permute.xlu1 %v7875_v4  ;;  %v5375_v4 = vmul.f32 %v5350_v30, %v5221_v46  ;;  %v5398_v46 = vmul.f32 %v5357_v34, %v5236_v50  ;;  %v5421_v50 = vld [vmem:[%s7862_s7 + $0x5] ss:$0 sm:$0xff] }
  0xd3   : > { %994 = vperm.xlu1 %4354, %v5199_v44   ;;  %8039 = vst [vmem:[#allocation21_spill] sm:$0xff] %v5421_v50  ;;  %v5468_v60 = vmul.f32 %v5421_v50, %v5291_v2  ;;  %v5487_v2 = vmul.f32 %v5350_v30, %v5302_v7 }
  0xd4   : > { %8035 = vst [vmem:[#allocation17_spill] sm:$0xff] %v5375_v4 }
  0xd5   : > { %v5328_v17 = vpop.permute.xlu0 %1124  ;;  %8042 = vst [vmem:[#allocation24_spill] sm:$0xff] %v5468_v60  ;;  %8043 = vst [vmem:[#allocation25_spill] sm:$0xff] %v5487_v2 }
  0xd6   : > { %v5330_v19 = vpop.permute.xlu1 %857 }
  0xd7   : > { %998 = vperm.xlu1 %4354, %v5097_v28  }
  0xd9   : > { %v5333_v20 = vpop.permute.xlu0 %1128 }
  0xdb   : > { %4355 = vset.pattern.permute.xlu1 %v7873_v25  ;;  %v5336_v22 = vpop.permute.xlu1 %1120  ;;  %v5370_v25 = vld [vmem:[%s7862_s7 + $0x2] ss:$0 sm:$0xff] }
  0xdc   : > { %1257 = vperm.xlu1 %4355, %v5217_v45   ;;  %8034 = vst [vmem:[#allocation16_spill] sm:$0xff] %v5370_v25  ;;  %v5406_v29 = vmul.f32 %v5370_v25, %v5245_v53  ;;  %v5425_v53 = vmul.f32 %v5384_v43, %v5259_v57  ;;  %v5455_v58 = vmul.f32 %v5370_v25, %v5284_v0 }
  0xdd   : > { %v5339_v23 = vpop.permute.xlu0 %1148  ;;  %v5474_v0 = vmul.f32 %v5421_v50, %v5297_v6  ;;  %v5504_v8 = vmul.f32 %v5370_v25, %v5319_v13  ;;  %v5517_v40 = vmul.f32 %v5370_v25, %v5324_v16  ;;  %v5521_v13 = vmul.f32 %v5357_v34, %v5330_v19 }
  0xde   : > { %8030 = vst [vmem:[#allocation12_spill] sm:$0xff] %v5339_v23  ;;  %8038 = vst [vmem:[#allocation20_spill] sm:$0xff] %v5406_v29  ;;  %v5538_v16 = vmul.f32 %v5370_v25, %v5336_v22  ;;  %v5542_v19 = vmul.f32 %v5370_v25, %v5333_v20 }
  0xdf   : > { %8040 = vst [vmem:[#allocation22_spill] sm:$0xff] %v5425_v53  ;;  %8047 = vst [vmem:[#allocation29_spill] sm:$0xff] %v5504_v8 }
  0xe0   : > { %4356 = vset.pattern.permute.xlu1 %v7871_v41  ;;  %v5342_v26 = vpop.permute.xlu1 %1346  ;;  %v5365_v41 = vld [vmem:[%s7862_s7 + $0x8] ss:$0 sm:$0xff]  ;;  %8051 = vst [vmem:[#allocation32_spill] sm:$0xff] %v5538_v16  ;;  %8052 = vst [vmem:[#allocation33_spill] sm:$0xff] %v5542_v19 }
  0xe1   : > { %1479 = vperm.xlu1 %4356, %v5085_v24   ;;  %v5345_v27 = vpop.permute.xlu0 %1152  ;;  %8033 = vst [vmem:[#allocation15_spill] sm:$0xff] %v5365_v41 }
  0xe4   : > { %v5352_v33 = vpop.permute.xlu1 %1350 }
  0xe5   : > { %4357 = vset.pattern.permute.xlu1 %v7877_v3  ;;  %v5360_v35 = vpop.permute.xlu0 %1164  ;;  %v5379_v3 = vmul.f32 %v5365_v41, %v5223_v47  ;;  %v5402_v47 = vmul.f32 %v5357_v34, %v5238_v51  ;;  %v5557_v22 = vmul.f32 %v5421_v50, %v5352_v33 }
  0xe6   : > { %8032 = vst [vmem:[#allocation14_spill] sm:$0xff] %v5360_v35  ;;  %1705 = vperm.xlu1 %4357, %v5074_v21   ;;  %v5394_v21 = vmul.f32 %v5365_v41, %v5231_v49  ;;  %v1023_v49 = vmul.f32 %v5350_v30, %v5252_v55  ;;  %v5433_v55 = vmul.f32 %v5384_v43, %v5266_v59  ;;  %v5442_v35 = vld [vmem:[%s7862_s7 + $0x6] ss:$0 sm:$0xff] }
  0xe7   : > { %v5451_v59 = vmul.f32 %v5357_v34, %v5274_v61  ;;  %v1025_v61 = vmul.f32 %v5350_v30, %v5288_v1  ;;  %v5491_v1 = vmul.f32 %v5384_v43, %v5311_v10  ;;  %v5495_v6 = vmul.f32 %v5442_v35, %v5317_v12 }
  0xe8   : > { %8037 = vst [vmem:[#allocation19_spill] sm:$0xff] %v5394_v21  ;;  %v5508_v7 = vmul.f32 %v5442_v35, %v5322_v15  ;;  %v8048_v12 = vmov 0   ;;  %v5525_v15 = vmul.f32 %v5370_v25, %v5328_v17  ;;  %v5546_v17 = vmul.f32 %v5421_v50, %v5342_v26 }
  0xe9   : > { %v1577_v51 = vpop.permute.xlu1 %1576  ;;  %8044 = vst [vmem:[#allocation26_spill] sm:$0xff] %v5491_v1  ;;  %8045 = vst [vmem:[#allocation27_spill] sm:$0xff] %v5495_v6 }
  0xea   : > { %1709 = vperm.xlu1 %4357, %v5113_v32   ;;  %v1573_v57 = vpop.permute.xlu0 %1572  ;;  %v5464_v32 = vld [vmem:[%s7860_s5] ss:$0 sm:$0xff]  ;;  %8049 = vst [vmem:[#allocation30_spill] sm:$0xff] %v5525_v15  ;;  %8053 = vst [vmem:[#allocation34_spill] sm:$0xff] %v5546_v17  ;;  %v5560_v20 = vmul.f32 %v5500_v5, %v1577_v51 }
  0xeb   : > { %v1639_v10 = vmul.f32 %v5500_v5, %v1573_v57  ;;  %v5580_v51 = vld [vmem:[%s7863_s8] ss:$0 sm:$0xff] }
  0xec   : > { %v4083_v23 = vpop.f32.mrb[0].mxu0 }
  0xed   : > { %v645_v62 = vpop.f32.mrb[1].mxu0  ;;  %v5512_v56 = vadd.f32 %v4083_v23, %v5464_v32  ;;  %v5530_v23 = vld [vmem:[%s7862_s7 + $0x4] ss:$0 sm:$0xff] }
  0xee   : > { %4359 = vset.pattern.permute.xlu1 %v8048_v12  ;;  %v979_v42 = vpop.permute.xlu1 %978  ;;  %v1593_v2 = vpop.permute.xlu0 %1592  ;;  %v5533_v57 = vadd.f32 %v5464_v32, %v645_v62  ;;  %v5553_v62 = vmul.f32 %v5370_v25, %v5345_v27 }
  0xef   : > { %887 = vperm.xlu1 %4359, %v5150_v39   ;;  %v730_v6 = vmul.f32 %v5530_v23, %v5512_v56  ;;  %v769_v17 = vrot.slane %v5512_v56, 7  ;;  %v5567_v60 = vmul.f32 %v1023_v49, %v5512_v56  ;;  %v5570_v21 = vmul.f32 %v1639_v10, %v5512_v56 }
  0xf0   : > { %8050 = vst [vmem:[#allocation31_spill] sm:$0xff] %v5533_v57  ;;  %v4086_v12 = vpop.f32.mrb[2].mxu0  ;;  %8054 = vst [vmem:[#allocation35_spill] sm:$0xff] %v5553_v62  ;;  %v5585_v53 = vmul.f32 %v5390_v18, %v5533_v57  ;;  %v5588_v49 = vmul.f32 %v5350_v30, %v979_v42  ;;  %v5591_v10 = vmul.f32 %v5500_v5, %v1593_v2 }
  0xf1   : > { %v5563_v26 = vadd.f32 %v4086_v12, %v5464_v32  ;;  %v655_v39 = vpop.f32.mrb[3].mxu0  ;;  %8056 = vst [vmem:[#allocation37_spill] sm:$0xff] %v5570_v21  ;;  %v5595_v21 = vadd.f32 %v5580_v51, %v730_v6  ;;  %v5618_v30 = vmul.f32 %v5530_v23, %v5533_v57 }
  0xf2   : > { %v5573_v27 = vadd.f32 %v5464_v32, %v655_v39  ;;  %v5575_v33 = vpop.permute.xlu0 %1596  ;;  %8058 = vst [vmem:[#allocation39_spill] sm:$0xff] %v5585_v53  ;;  %8059 = vst [vmem:[#allocation40_spill] sm:$0xff] %v5588_v49  ;;  %v8061_v39 = vmov 2   ;;  %v8065_v53 = vmov 5  }
  0xf3   : > { %8055 = vst [vmem:[#allocation36_spill] sm:$0xff] %v5563_v26  ;;  %8057 = vst [vmem:[#allocation38_spill] sm:$0xff] %v5575_v33  ;;  %4360 = vset.pattern.permute.xlu1 %v8061_v39  ;;  %v1238_v33 = vpop.permute.xlu1 %1237  ;;  %v732_v1 = vmul.f32 %v5530_v23, %v5563_v26  ;;  %v1072_v12 = vrot.slane %v5563_v26, 1  ;;  %v771_v6 = vrot.slane %v5563_v26, 7  ;;  %v1041_v42 = vmul.f32 %v1025_v61, %v5563_v26 }
  0xf4   : > { %8060 = vst [vmem:[#allocation41_spill] sm:$0xff] %v5591_v10  ;;  %8062 = vst [vmem:[#allocation42_spill] sm:$0xff] %v5595_v21  ;;  %1144 = vperm.xlu1 %4360, %v5199_v44   ;;  %v4089_v18 = vpop.f32.mrb[4].mxu0  ;;  %v770_v39 = vrot.slane %v5573_v27, 7  ;;  %v1040_v8 = vmul.f32 %v5459_v11, %v5573_v27  ;;  %v5690_v25 = vmul.f32 %v5384_v43, %v1238_v33 }
  0xf5   : > { %v5604_v2 = vadd.f32 %v4089_v18, %v5464_v32  ;;  %v665_v10 = vpop.f32.mrb[5].mxu0  ;;  %v8064_v18 = vrot.slane %v5533_v57, 7  ;;  %v755_v62 = vadd.f32 %v5580_v51, %v732_v1 }
  0xf6   : > { %v5609_v49 = vadd.f32 %v5464_v32, %v665_v10  ;;  %v5611_v5 = vpop.permute.xlu0 %1612  ;;  %v5644_v11 = vsel %vm786_vm1, %v769_v17, %v770_v39 }
  0xf7   : > { %8063 = vst [vmem:[#allocation43_spill] sm:$0xff] %v5611_v5  ;;  %v5624_v24 = vsel %vm786_vm1, %v8064_v18, %v769_v17  ;;  %v1242_v29 = vpop.permute.xlu1 %1241  ;;  %v5629_v5 = vsel %vm786_vm1, %v770_v39, %v771_v6  ;;  %v8067_v1 = vrot.slane %v5604_v2, 7  ;;  %v731_v39 = vmul.f32 %v5530_v23, %v5573_v27 }
  0xf8   : > { %v772_v26 = vrot.slane %v5609_v49, 7  ;;  %4361 = vset.pattern.permute.xlu1 %v8065_v53  ;;  %v4092_v4 = vpop.f32.mrb[6].mxu0  ;;  %v733_v18 = vmul.f32 %v5530_v23, %v5609_v49  ;;  %v924_v61 = vmul.f32 %v5429_v52, %v5629_v5  ;;  %v8066_v53 = vrot.slane %v5573_v27, 1 }
  0xf9   : > { %v5639_v10 = vadd.f32 %v4092_v4, %v5464_v32  ;;  %1370 = vperm.xlu1 %4361, %v5143_v38   ;;  %v675_v19 = vpop.f32.mrb[7].mxu0  ;;  %v923_v52 = vmul.f32 %v5398_v46, %v5644_v11  ;;  %v1293_v16 = vmul.f32 %v5384_v43, %v1242_v29  ;;  %v5687_v29 = vmul.f32 %v5560_v20, %v5573_v27 }
  0xfa   : > { %v5652_v15 = vsel %vm1085_vm2, %v8066_v53, %v1072_v12  ;;  %v5658_v4 = vsel %vm786_vm1, %v772_v26, %v8067_v1  ;;  %v5661_v38 = vadd.f32 %v5464_v32, %v675_v19  ;;  %v756_v17 = vadd.f32 %v5580_v51, %v733_v18 }
  0xfb   : > { %8068 = vst [vmem:[#allocation44_spill] sm:$0xff] %v5658_v4  ;;  %v5670_v53 = vmul.f32 %v5437_v54, %v5658_v4  ;;  %v1234_v50 = vpop.permute.xlu0 %1233  ;;  %v8070_v1 = vrot.slane %v5609_v49, 1  ;;  %v5681_v18 = vmul.f32 %v5433_v55, %v5624_v24  ;;  %v939_v46 = vadd.f32 %v923_v52, %v755_v62  ;;  %8071 = vst [vmem:[#allocation46_spill] sm:$0xff] %v5687_v29 }
  0xfc   : > { %v940_v21 = vadd.f32 %v924_v61, %v756_v17  ;;  %v1190_v28 = vmul.f32 %v5517_v40, %v5652_v15  ;;  %v1468_v54 = vpop.permute.xlu1 %1467  ;;  %v5695_v55 = vmul.f32 %v5379_v3, %v5652_v15  ;;  %v734_v40 = vmul.f32 %v5530_v23, %v5604_v2 }
  0xfd   : > { %8069 = vst [vmem:[#allocation45_spill] sm:$0xff] %v5670_v53  ;;  %v5677_v19 = vsel %vm1085_vm2, %v1072_v12, %v8070_v1  ;;  %v4095_v53 = vpop.f32.mrb[8].mxu0  ;;  %v1291_v12 = vmul.f32 %v5384_v43, %v1234_v50  ;;  %1374 = vperm.xlu1 %4361, %v5217_v45   ;;  %v1056_v61 = vadd.f32 %v1040_v8, %v939_v46  ;;  %v775_v8 = vrot.slane %v5639_v10, 7 }
  0xfe   : > { %8072 = vst [vmem:[#allocation47_spill] sm:$0xff] %v5695_v55  ;;  %v685_v62 = vpop.f32.mrb[9].mxu0  ;;  %v5700_v17 = vadd.f32 %v1041_v42, %v940_v21  ;;  %v798_v20 = vsel %vm786_vm1, %v771_v6, %v772_v26  ;;  %v754_v33 = vadd.f32 %v5580_v51, %v731_v39  ;;  %v5706_v50 = vmul.f32 %v1293_v16, %v5658_v4 }
  0xff   : > { %v1307_v3 = vmul.f32 %v1291_v12, %v5629_v5  ;;  %v1525_v52 = vmul.f32 %v5442_v35, %v1468_v54  ;;  %v1250_v1 = vpop.permute.xlu0 %1249  ;;  %v1206_v55 = vadd.f32 %v1190_v28, %v1056_v61  ;;  %v736_v26 = vmul.f32 %v5530_v23, %v5639_v10 }
 0x100   : > { %v1295_v21 = vmul.f32 %v5384_v43, %v1250_v1  ;;  %v4098_v42 = vpop.f32.mrb[10].mxu0  ;;  %v1424_v16 = vmul.f32 %v5557_v22, %v5677_v19  ;;  %v8073_v6 = vmov 7   ;;  %v922_v28 = vmul.f32 %v5416_v14, %v5624_v24 }
 0x101   : > { %4362 = vset.pattern.permute.xlu1 %v8073_v6  ;;  %v5718_v39 = vpop.permute.xlu1 %1689  ;;  %v8074_v46 = vrot.slane %v5573_v27, 1  ;;  %v8075_v54 = vrot.slane %v5512_v56, 1  ;;  %v695_v61 = vpop.f32.mrb[11].mxu0  ;;  %v1323_v1 = vadd.f32 %v1307_v3, %v1206_v55  ;;  %v757_v29 = vadd.f32 %v5580_v51, %v734_v40 }
 0x102   : > { %v925_v22 = vmul.f32 %v5451_v59, %v798_v20  ;;  %v8076_v6 = vrot.slane %v5661_v38, 7  ;;  %1600 = vperm.xlu1 %4362, %v5136_v37   ;;  %v1541_v14 = vmul.f32 %v1525_v52, %v798_v20  ;;  %v5748_v3 = vadd.f32 %v5464_v32, %v685_v62 }
 0x103   : > { %v5728_v12 = vsel %vm1085_vm2, %v8075_v54, %v8074_v46  ;;  %v938_v46 = vadd.f32 %v922_v28, %v754_v33  ;;  %v5743_v54 = vadd.f32 %v4095_v53, %v5464_v32  ;;  %v1254_v55 = vpop.permute.xlu0 %1253  ;;  %v1440_v40 = vadd.f32 %v1424_v16, %v1323_v1 }
 0x104   : > { %v5736_v4 = vsel %vm786_vm1, %v8076_v6, %v775_v8  ;;  %v1189_v59 = vmul.f32 %v5455_v58, %v5728_v12  ;;  %8080 = vst [vmem:[#allocation51_spill] sm:$0xff] %v5748_v3  ;;  %v5751_v6 = vadd.f32 %v4098_v42, %v5464_v32  ;;  %v4101_v37 = vpop.f32.mrb[12].mxu0  ;;  %v5756_v33 = vadd.f32 %v5464_v32, %v695_v61 }
 0x105   : > { %8077 = vst [vmem:[#allocation48_spill] sm:$0xff] %v5736_v4  ;;  %v5740_v27 = vmul.f32 %v1295_v21, %v5736_v4  ;;  %8079 = vst [vmem:[#allocation50_spill] sm:$0xff] %v5743_v54  ;;  %v1055_v52 = vadd.f32 %v5567_v60, %v938_v46  ;;  %v1296_v21 = vmul.f32 %v5384_v43, %v1254_v55  ;;  %v705_v16 = vpop.f32.mrb[13].mxu0  ;;  %v7902_v58 = vrot.slane %v5748_v3, 7 }
 0x106   : > { %8081 = vst [vmem:[#allocation52_spill] sm:$0xff] %v5756_v33  ;;  %v5759_v53 = vadd.f32 %v4101_v37, %v5464_v32  ;;  %v5761_v28 = vadd.f32 %v1541_v14, %v1440_v40  ;;  %v8083_v62 = vmov 1   ;;  %v863_v42 = vpop.permute.xlu1 %862  ;;  %v737_v1 = vmul.f32 %v5530_v23, %v5748_v3 }
 0x107   : > { %8078 = vst [vmem:[#allocation49_spill] sm:$0xff] %v5740_v27  ;;  %4363 = vset.pattern.permute.xlu1 %v8083_v62  ;;  %v5768_v60 = vadd.f32 %v5464_v32, %v705_v16  ;;  %v5772_v61 = vmul.f32 %v5530_v23, %v5661_v38  ;;  %v5774_v46 = vadd.f32 %v1189_v59, %v1055_v52  ;;  %v1274_v55 = vpop.permute.xlu0 %1273 }
 0x108   : > { %8082 = vst [vmem:[#allocation53_spill] sm:$0xff] %v5759_v53  ;;  %v912_v14 = vmul.f32 %v5357_v34, %v863_v42  ;;  %1002 = vperm.xlu1 %4363, %v5108_v31   ;;  %v5783_v37 = vsel %vm786_vm1, %v775_v8, %v7902_v58  ;;  %v760_v16 = vadd.f32 %v5580_v51, %v737_v1  ;;  %v4104_v62 = vpop.f32.mrb[14].mxu0  ;;  %v8087_v27 = vrot.slane %v5759_v53, 7  ;;  %v8103_v53 = vld [vmem:[#allocation42_spill] sm:$0xff] }
 0x109   : > { %8084 = vst [vmem:[#allocation54_spill] sm:$0xff] %v5768_v60  ;;  %v1301_v59 = vmul.f32 %v5384_v43, %v1274_v55  ;;  %v5790_v52 = vmul.f32 %v5508_v7, %v5644_v11  ;;  %v5793_v31 = vmul.f32 %v1296_v21, %v5783_v37  ;;  %v5797_v40 = vadd.f32 %v4104_v62, %v5464_v32  ;;  %v715_v8 = vpop.f32.mrb[15].mxu0 }
 0x10a   : > { %v928_v42 = vmul.f32 %v912_v14, %v5736_v4  ;;  %v941_v58 = vadd.f32 %v925_v22, %v757_v29  ;;  %v1308_v1 = vmul.f32 %v5690_v25, %v798_v20  ;;  %v8088_v55 = vrot.slane %v5768_v60, 7 }
 0x10b   : > { %8085 = vst [vmem:[#allocation55_spill] sm:$0xff] %v5793_v31  ;;  %8086 = vst [vmem:[#allocation56_spill] sm:$0xff] %v5797_v40  ;;  %v5809_v21 = vadd.f32 %v5464_v32, %v715_v8  ;;  %v5811_v31 = vpop.permute.xlu1 %867  ;;  %v5815_v62 = vmul.f32 %v5474_v0, %v5728_v12  ;;  %v8092_v20 = vmov 3   ;;  %v1282_v22 = vpop.permute.xlu0 %1281  ;;  %v783_v14 = vrot.slane %v5797_v40, 7 }
 0x10c   : > { %v5806_v7 = vsel %vm786_vm1, %v8088_v55, %v8087_v27  ;;  %v5817_v29 = vadd.f32 %v928_v42, %v760_v16  ;;  %4364 = vset.pattern.permute.xlu1 %v8092_v20  ;;  %v759_v27 = vadd.f32 %v5580_v51, %v736_v26  ;;  %v1303_v8 = vmul.f32 %v5384_v43, %v1282_v22 }
 0x10d   : > { %8089 = vst [vmem:[#allocation57_spill] sm:$0xff] %v5806_v7  ;;  %8090 = vst [vmem:[#allocation58_spill] sm:$0xff] %v5809_v21  ;;  %v5820_v25 = vmul.f32 %v1301_v59, %v5806_v7  ;;  %1261 = vperm.xlu1 %4364, %v5199_v44   ;;  %v8093_v0 = vrot.slane %v5661_v38, 7  ;;  %v8094_v16 = vrot.slane %v5604_v2, 7  ;;  %v752_v42 = vadd.f32 %v5580_v51, %v5618_v30 }
 0x10e   : > { %v1044_v55 = vmul.f32 %v5478_v63, %v5661_v38  ;;  %v1075_v32 = vrot.slane %v5661_v38, 1  ;;  %v8096_v22 = vrot.slane %v5809_v21, 7  ;;  %v7913_v30 = vrot.slane %v5639_v10, 1 }
 0x10f   : > { %8091 = vst [vmem:[#allocation59_spill] sm:$0xff] %v5820_v25  ;;  %v5834_v59 = vsel %vm786_vm1, %v8094_v16, %v8093_v0  ;;  %v8098_v0 = vrot.slane %v5533_v57, 7  ;;  %v1756_v63 = vmul.f32 %v5365_v41, %v5718_v39  ;;  %v1133_v21 = vpop.permute.xlu1 %1132  ;;  %v8102_v39 = vld [vmem:[#allocation3_spill] sm:$0xff] }
 0x110   : > { %8095 = vst [vmem:[#allocation60_spill] sm:$0xff] %v5834_v59  ;;  %v927_v26 = vmul.f32 %v5521_v13, %v5834_v59  ;;  %v5847_v25 = vsel %vm786_vm1, %v8096_v22, %v783_v14  ;;  %v1042_v13 = vmul.f32 %v5483_v9, %v5609_v49  ;;  %v8101_v9 = vld [vmem:[#allocation16_spill] sm:$0xff]  ;;  %v1359_v41 = vpop.permute.xlu0 %1358 }
 0x111   : > { %8097 = vst [vmem:[#allocation61_spill] sm:$0xff] %v5847_v25  ;;  %v5853_v16 = vsel %vm786_vm1, %v783_v14, %v8098_v0  ;;  %v920_v7 = vmul.f32 %v5402_v47, %v5847_v25  ;;  %v5865_v4 = vmul.f32 %v1303_v8, %v5847_v25  ;;  %v5871_v0 = vsel %vm1085_vm2, %v1075_v32, %v7913_v30  ;;  %v8105_v59 = vld [vmem:[#allocation32_spill] sm:$0xff] }
 0x112   : > { %8099 = vst [vmem:[#allocation62_spill] sm:$0xff] %v5853_v16  ;;  %v921_v22 = vmul.f32 %v5410_v48, %v5853_v16  ;;  %v943_v14 = vadd.f32 %v927_v26, %v759_v27  ;;  %v1178_v20 = vmul.f32 %v8101_v9, %v1133_v21  ;;  %1265 = vperm.xlu1 %4364, %v8102_v39   ;;  %v8104_v27 = vld [vmem:[#allocation21_spill] sm:$0xff]  ;;  %v7921_v9 = vrot.slane %v5797_v40, 1 }
 0x113   : > { %8100 = vst [vmem:[#allocation63_spill] sm:$0xff] %v5865_v4  ;;  %v1058_v47 = vadd.f32 %v1042_v13, %v941_v58  ;;  %v738_v48 = vmul.f32 %v5530_v23, %v5743_v54  ;;  %v1074_v4 = vrot.slane %v5604_v2, 1  ;;  %v1410_v26 = vmul.f32 %v8104_v27, %v1359_v41 }
 0x114   : > { %v937_v8 = vadd.f32 %v921_v22, %v8103_v53  ;;  %v936_v25 = vadd.f32 %v920_v7, %v752_v42  ;;  %v1060_v44 = vadd.f32 %v1044_v55, %v943_v14  ;;  %v1194_v30 = vmul.f32 %v1178_v20, %v5871_v0  ;;  %v8108_v20 = vld [vmem:[#allocation30_spill] sm:$0xff]  ;;  %v1355_v14 = vpop.permute.xlu1 %1354 }
 0x115   : > { %v1191_v21 = vmul.f32 %v8105_v59, %v5677_v19  ;;  %v5885_v39 = vsel %vm1085_vm2, %v1074_v4, %v1075_v32  ;;  %v8107_v58 = vrot.slane %v5609_v49, 1  ;;  %v7920_v41 = vrot.slane %v5768_v60, 1  ;;  %v8109_v59 = vld [vmem:[#allocation33_spill] sm:$0xff] }
 0x116   : > { %8106 = vst [vmem:[#allocation3_spill] sm:$0xff] %v5885_v39  ;;  %v5895_v7 = vadd.f32 %v1194_v30, %v1060_v44  ;;  %v5901_v55 = vmul.f32 %v8109_v59, %v5885_v39  ;;  %v1426_v32 = vmul.f32 %v1410_v26, %v5885_v39  ;;  %v8110_v22 = vmov 6   ;;  %v8113_v59 = vld [vmem:[#allocation35_spill] sm:$0xff] }
 0x117   : > { %v5891_v53 = vsel %vm1085_vm2, %v8107_v58, %v1074_v4  ;;  %4365 = vset.pattern.permute.xlu1 %v8110_v22  ;;  %v1363_v4 = vpop.permute.xlu0 %1362  ;;  %v1207_v58 = vadd.f32 %v1191_v21, %v5700_v17  ;;  %v1409_v13 = vmul.f32 %v8104_v27, %v1355_v14  ;;  %v8111_v30 = vrot.slane %v5751_v6, 1  ;;  %v8115_v17 = vld [vmem:[#allocation17_spill] sm:$0xff]  ;;  %v8116_v14 = vld [vmem:[#allocation39_spill] sm:$0xff] }
 0x118   : > { %v1192_v42 = vmul.f32 %v8108_v20, %v5891_v53  ;;  %1491 = vperm.xlu1 %4365, %v5217_v45   ;;  %v1411_v44 = vmul.f32 %v8104_v27, %v1363_v4  ;;  %v1037_v21 = vmul.f32 %v8115_v17, %v5797_v40  ;;  %v1054_v22 = vadd.f32 %v8116_v14, %v937_v8 }
 0x119   : > { %v5915_v20 = vsel %vm1085_vm2, %v8111_v30, %v7920_v41  ;;  %v1324_v45 = vadd.f32 %v1308_v1, %v1207_v58  ;;  %v1425_v4 = vmul.f32 %v1409_v13, %v5891_v53  ;;  %v5930_v30 = vmul.f32 %v1756_v63, %v5728_v12  ;;  %v1581_v58 = vpop.permute.xlu1 %1580 }
 0x11a   : > { %8112 = vst [vmem:[#allocation42_spill] sm:$0xff] %v5915_v20  ;;  %v1208_v26 = vadd.f32 %v1192_v42, %v1058_v47  ;;  %v5919_v39 = vmul.f32 %v8113_v59, %v5915_v20  ;;  %v5926_v60 = vmul.f32 %v1411_v44, %v5871_v0  ;;  %v1053_v59 = vadd.f32 %v1037_v21, %v936_v25  ;;  %v8125_v21 = vld [vmem:[#allocation29_spill] sm:$0xff] }
 0x11b   : > { %v1383_v42 = vpop.permute.xlu0 %1382  ;;  %v8117_v41 = vrot.slane %v5512_v56, 1  ;;  %v8118_v17 = vrot.slane %v5533_v57, 1  ;;  %v5941_v8 = vadd.f32 %v1425_v4, %v1324_v45  ;;  %v8120_v13 = vmov 8  }
 0x11c   : > { %8114 = vst [vmem:[#allocation21_spill] sm:$0xff] %v5919_v39  ;;  %v1325_v47 = vadd.f32 %v5706_v50, %v1208_v26  ;;  %4366 = vset.pattern.permute.xlu1 %v8120_v13  ;;  %v1416_v12 = vmul.f32 %v8104_v27, %v1383_v42  ;;  %v8123_v50 = vld [vmem:[#allocation20_spill] sm:$0xff]  ;;  %v761_v45 = vadd.f32 %v5580_v51, %v738_v48  ;;  %v8124_v26 = vld [vmem:[#allocation2_spill] sm:$0xff] }
 0x11d   : > { %v5939_v1 = vsel %vm1085_vm2, %v8118_v17, %v8117_v41  ;;  %v8121_v63 = vmov %v8118_v17  ;;  %1713 = vperm.xlu1 %4366, %v8124_v26   ;;  %v913_v4 = vmul.f32 %v5357_v34, %v5811_v31  ;;  %v8130_v26 = vld [vmem:[#allocation19_spill] sm:$0xff]  ;;  %v758_v31 = vadd.f32 %v5580_v51, %v5772_v61  ;;  %v8136_v61 = vld [vmem:[#allocation40_spill] sm:$0xff] }
 0x11e   : > { %8119 = vst [vmem:[#allocation32_spill] sm:$0xff] %v5939_v1  ;;  %v5951_v56 = vsel %vm1085_vm2, %v7921_v9, %v8121_v63  ;;  %v1188_v25 = vmul.f32 %v8123_v50, %v5939_v1  ;;  %v5957_v44 = vadd.f32 %v1426_v32, %v1325_v47  ;;  %v5965_v42 = vmul.f32 %v1416_v12, %v5915_v20  ;;  %v8127_v63 = vld [vmem:[#allocation26_spill] sm:$0xff] }
 0x11f   : > { %8122 = vst [vmem:[#allocation30_spill] sm:$0xff] %v5951_v56  ;;  %v1187_v14 = vmul.f32 %v8125_v21, %v5951_v56  ;;  %v1306_v50 = vmul.f32 %v8127_v63, %v5644_v11  ;;  %v5969_v9 = vpop.permute.xlu0 %1398  ;;  %v8129_v32 = vld [vmem:[#allocation22_spill] sm:$0xff]  ;;  %v5975_v41 = vmul.f32 %v8130_v26, %v5677_v19  ;;  %v1585_v21 = vpop.permute.xlu1 %1584  ;;  %v8133_v63 = vld [vmem:[#allocation28_spill] sm:$0xff]  ;;  %v8135_v19 = vld [vmem:[#allocation45_spill] sm:$0xff]  ;;  %v1043_v20 = vmul.f32 %v8136_v61, %v5604_v2 }
 0x120   : > { %8126 = vst [vmem:[#allocation33_spill] sm:$0xff] %v5965_v42  ;;  %v1204_v17 = vadd.f32 %v1188_v25, %v1054_v22  ;;  %8128 = vst [vmem:[#allocation35_spill] sm:$0xff] %v5969_v9  ;;  %v1304_v47 = vmul.f32 %v8129_v32, %v5853_v16  ;;  %v8131_v22 = vld [vmem:[#allocation24_spill] sm:$0xff]  ;;  %v1642_v32 = vmul.f32 %v8133_v63, %v1585_v21  ;;  %v8134_v16 = vmov 0  }
 0x121   : > { %v1203_v48 = vadd.f32 %v1187_v14, %v1053_v59  ;;  %v1421_v25 = vmul.f32 %v8131_v22, %v5939_v1  ;;  %v1322_v11 = vadd.f32 %v1306_v50, %v5774_v46  ;;  %v8132_v59 = vld [vmem:[#allocation34_spill] sm:$0xff]  ;;  %4367 = vset.pattern.permute.xlu1 %v8134_v16  ;;  %v942_v26 = vadd.f32 %v8135_v19, %v758_v31  ;;  %v8137_v22 = vld [vmem:[#allocation27_spill] sm:$0xff]  ;;  %v8138_v50 = vld [vmem:[#allocation5_spill] sm:$0xff] }
 0x122   : > { %v1321_v12 = vadd.f32 %v5681_v18, %v1204_v17  ;;  %v1423_v14 = vmul.f32 %v8132_v59, %v5652_v15  ;;  %v929_v18 = vmul.f32 %v913_v4, %v5783_v37  ;;  %v1538_v46 = vmul.f32 %v8137_v22, %v5624_v24  ;;  %892 = vperm.xlu1 %4367, %v8138_v50   ;;  %v8139_v4 = vld [vmem:[#allocation25_spill] sm:$0xff]  ;;  %v8168_v1 = vld [vmem:[#allocation44_spill] sm:$0xff] }
 0x123   : > { %v1320_v57 = vadd.f32 %v1304_v47, %v1203_v48  ;;  %v1641_v21 = vmul.f32 %v8133_v63, %v1581_v58  ;;  %v1658_v48 = vmul.f32 %v1642_v32, %v5609_v49  ;;  %v1059_v47 = vadd.f32 %v1043_v20, %v942_v26  ;;  %v1464_v59 = vpop.permute.xlu0 %1463  ;;  %v8140_v49 = vld [vmem:[#allocation46_spill] sm:$0xff]  ;;  %v8145_v22 = vld [vmem:[#allocation37_spill] sm:$0xff]  ;;  %v8181_v9 = vld [vmem:[#allocation8_spill] sm:$0xff] }
 0x124   : > { %v1438_v17 = vadd.f32 %v5815_v62, %v1321_v12  ;;  %v1439_v15 = vadd.f32 %v1423_v14, %v1322_v11  ;;  %v7926_v19 = vrot.slane %v5743_v54, 7  ;;  %v1045_v62 = vmul.f32 %v8139_v4, %v5639_v10  ;;  %v991_v14 = vpop.permute.xlu1 %990  ;;  %v8142_v32 = vld [vmem:[#allocation6_spill] sm:$0xff]  ;;  %v8146_v50 = vld [vmem:[#allocation49_spill] sm:$0xff] }
 0x125   : > { %v1437_v16 = vadd.f32 %v1421_v25, %v1320_v57  ;;  %v7925_v12 = vrot.slane %v5748_v3, 1  ;;  %v6003_v24 = vadd.f32 %v1658_v48, %v5761_v28  ;;  %v1524_v58 = vmul.f32 %v5442_v35, %v1464_v59 }
 0x126   : > { %v1555_v31 = vadd.f32 %v5790_v52, %v1438_v17  ;;  %v1209_v57 = vadd.f32 %v5901_v55, %v1059_v47  ;;  %v8141_v52 = vld [vmem:[#allocation13_spill] sm:$0xff]  ;;  %897 = vperm.xlu1 %4367, %v8142_v32   ;;  %v6011_v26 = vadd.f32 %v1045_v62, %v5817_v29  ;;  %v8143_v28 = vrot.slane %v5639_v10, 1 }
 0x127   : > { %v1554_v11 = vadd.f32 %v1538_v46, %v1437_v16  ;;  %v1030_v25 = vmul.f32 %v8141_v52, %v991_v14  ;;  %v945_v17 = vadd.f32 %v929_v18, %v761_v45  ;;  %v1540_v46 = vmul.f32 %v1524_v58, %v5629_v5  ;;  %v8147_v16 = vld [vmem:[#allocation47_spill] sm:$0xff] }
 0x128   : > { %v1672_v20 = vadd.f32 %v8140_v49, %v1555_v31  ;;  %v6019_v61 = vsel %vm1085_vm2, %v8143_v28, %v7925_v12  ;;  %v6025_v48 = vadd.f32 %v8146_v50, %v5895_v7  ;;  %v6031_v31 = vpop.permute.xlu0 %1483  ;;  %v740_v59 = vmul.f32 %v5530_v23, %v5751_v6  ;;  %v8150_v7 = vld [vmem:[#allocation36_spill] sm:$0xff]  ;;  %v1246_v49 = vpop.permute.xlu1 %1245  ;;  %v8153_v28 = vld [vmem:[#allocation9_spill] sm:$0xff]  ;;  %v8167_v12 = vld [vmem:[#allocation7_spill] sm:$0xff] }
 0x129   : > { %8144 = vst [vmem:[#allocation17_spill] sm:$0xff] %v6019_v61  ;;  %v1671_v55 = vadd.f32 %v8145_v22, %v1554_v11  ;;  %v1046_v47 = vmul.f32 %v1030_v25, %v5748_v3  ;;  %v8148_v45 = vrot.slane %v5756_v33, 7  ;;  %v1657_v18 = vmul.f32 %v1641_v21, %v8150_v7  ;;  %v8152_v25 = vld [vmem:[#allocation23_spill] sm:$0xff]  ;;  %v8157_v7 = vld [vmem:[#allocation60_spill] sm:$0xff] }
 0x12a   : > { %v6028_v29 = vadd.f32 %v8147_v16, %v1672_v20  ;;  %v1556_v62 = vadd.f32 %v1540_v46, %v1439_v15  ;;  %v8151_v14 = vmov 2   ;;  %v763_v20 = vadd.f32 %v5580_v51, %v740_v59  ;;  %v8156_v16 = vld [vmem:[#allocation41_spill] sm:$0xff] }
 0x12b   : > { %v6041_v5 = vsel %vm786_vm1, %v7926_v19, %v8148_v45  ;;  %v6045_v4 = vadd.f32 %v5930_v30, %v1671_v55  ;;  %v6048_v58 = vadd.f32 %v1046_v47, %v945_v17  ;;  %4368 = vset.pattern.permute.xlu1 %v8151_v14  ;;  %v916_v22 = vmul.f32 %v5357_v34, %v8153_v28  ;;  %v8154_v55 = vld [vmem:[#allocation4_spill] sm:$0xff]  ;;  %v8155_v17 = vld [vmem:[#allocation10_spill] sm:$0xff] }
 0x12c   : > { %8149 = vst [vmem:[#allocation39_spill] sm:$0xff] %v6041_v5  ;;  %v3888_v11 = vmul.f32 -1.442695, %v6028_v29  ;;  %v931_v32 = vmul.f32 %v8152_v25, %v6041_v5  ;;  %v1673_v30 = vadd.f32 %v1657_v18, %v1556_v62  ;;  %v1294_v15 = vmul.f32 %v5384_v43, %v1246_v49  ;;  %1156 = vperm.xlu1 %4368, %v8154_v55   ;;  %v6065_v59 = vpop.permute.xlu0 %1487  ;;  %v8158_v62 = vld [vmem:[#allocation12_spill] sm:$0xff]  ;;  %v8160_v28 = vld [vmem:[#allocation38_spill] sm:$0xff] }
 0x12d   : > { %v3887_v21 = vmul.f32 -1.442695, %v6045_v4  ;;  %v1034_v46 = vmul.f32 %v8141_v52, %v8155_v17  ;;  %v1660_v47 = vmul.f32 %v8156_v16, %v5661_v38  ;;  %v779_v43 = vrot.slane %v5751_v6, 7  ;;  %v8159_v49 = vld [vmem:[#allocation16_spill] sm:$0xff] }
 0x12e   : > { %4393 = vpow2.f32 %v3888_v11  ;;  %v6061_v50 = vadd.f32 %v931_v32, %v763_v20  ;;  %v6068_v45 = vadd.f32 %v5975_v41, %v1673_v30  ;;  %v1310_v18 = vmul.f32 %v1294_v15, %v8157_v7  ;;  %v8161_v32 = vld [vmem:[#allocation54_spill] sm:$0xff]  ;;  %v1472_v30 = vpop.permute.xlu1 %1471 }
 0x12f   : > { %4395 = vpow2.f32 %v3887_v21  ;;  %v1182_v25 = vmul.f32 %v8159_v49, %v8158_v62  ;;  %v1645_v11 = vmul.f32 %v8133_v63, %v8160_v28  ;;  %v741_v38 = vmul.f32 %v5530_v23, %v8161_v32 }
 0x130   : > { %v3889_v21 = vmul.f32 -1.442695, %v6068_v45  ;;  %v1326_v55 = vadd.f32 %v1310_v18, %v1209_v57  ;;  %v8162_v41 = vmov 5   ;;  %v8163_v15 = vrot.slane %v8161_v32, 7  ;;  %v1512_v57 = vpop.permute.xlu0 %1511 }
 0x131   : > { %4369 = vset.pattern.permute.xlu1 %v8162_v41  ;;  %v8165_v16 = vrot.slane %v5756_v33, 7  ;;  %v1526_v28 = vmul.f32 %v5442_v35, %v1472_v30  ;;  %v764_v18 = vadd.f32 %v5580_v51, %v741_v38  ;;  %v6111_v38 = vmul.f32 %v1645_v11, %v5639_v10 }
 0x132   : > { %v6085_v17 = vsel %vm786_vm1, %v779_v43, %v8163_v15  ;;  %1378 = vperm.xlu1 %4369, %v8167_v12   ;;  %4397 = vpow2.f32 %v3889_v21  ;;  %v6097_v19 = vadd.f32 %v5926_v60, %v1326_v55  ;;  %v1536_v15 = vmul.f32 %v5442_v35, %v1512_v57  ;;  %v1476_v21 = vpop.permute.xlu1 %1475  ;;  %v8173_v55 = vld [vmem:[#allocation61_spill] sm:$0xff] }
 0x133   : > { %8164 = vst [vmem:[#allocation20_spill] sm:$0xff] %v6085_v17  ;;  %v6091_v62 = vsel %vm786_vm1, %v8165_v16, %v779_v43  ;;  %v1542_v56 = vmul.f32 %v1526_v28, %v8168_v1  ;;  %v8169_v43 = vrot.slane %v5751_v6, 1  ;;  %v8170_v16 = vrot.slane %v5756_v33, 1  ;;  %v8176_v28 = vld [vmem:[#allocation11_spill] sm:$0xff] }
 0x134   : > { %8166 = vst [vmem:[#allocation2_spill] sm:$0xff] %v6091_v62  ;;  %v932_v20 = vmul.f32 %v916_v22, %v6091_v62  ;;  %v6114_v60 = vmul.f32 %v1034_v46, %v8161_v32  ;;  %v6117_v30 = vmul.f32 %v1536_v15, %v8173_v55  ;;  %v1035_v57 = vmul.f32 %v8141_v52, %v8176_v28  ;;  %v4849_v46 = vld [vmem:[%s7857_s2 + $0x40] sm:$0xff]  ;;  %v8196_v62 = vld [vmem:[#allocation55_spill] sm:$0xff] }
 0x135   : > { %v6108_v12 = vsel %vm1085_vm2, %v8170_v16, %v8169_v43  ;;  %v6127_v43 = vadd.f32 %v1542_v56, %v5941_v8  ;;  %v1527_v10 = vmul.f32 %v5442_v35, %v1476_v21  ;;  %v8177_v11 = vmov 7   ;;  %v8178_v8 = vld [vmem:[#allocation53_spill] sm:$0xff]  ;;  %v8180_v21 = vld [vmem:[#allocation15_spill] sm:$0xff] }
 0x136   : > { %8171 = vst [vmem:[#allocation29_spill] sm:$0xff] %v6108_v12  ;;  %8172 = vst [vmem:[#allocation26_spill] sm:$0xff] %v6114_v60  ;;  %v6119_v22 = vadd.f32 %v932_v20, %v764_v18  ;;  %v6122_v1 = vmul.f32 %v1182_v25, %v6108_v12  ;;  %4370 = vset.pattern.permute.xlu1 %v8177_v11  ;;  %v1702_v28 = vpop.permute.xlu1 %1701  ;;  %v6137_v56 = vmul.f32 %v1035_v57, %v8178_v8  ;;  %v8183_v57 = vmov 1  }
 0x137   : > { %8174 = vst [vmem:[#allocation22_spill] sm:$0xff] %v6117_v30  ;;  %1604 = vperm.xlu1 %4370, %v4849_v46   ;;  %v1543_v18 = vmul.f32 %v1527_v10, %v8157_v7  ;;  %v1759_v30 = vmul.f32 %v8180_v21, %v1702_v28  ;;  %v739_v46 = vmul.f32 %v5530_v23, %v5756_v33  ;;  %v8187_v28 = vmov 3  }
 0x138   : > { %8175 = vst [vmem:[#allocation19_spill] sm:$0xff] %v6119_v22  ;;  %v4394_v20 = vpop.eup %4393  ;;  %8179 = vst [vmem:[#allocation24_spill] sm:$0xff] %v6137_v56  ;;  %v4852_v56 = vld [vmem:[%s7857_s2 + $0x50] sm:$0xff] }
 0x139   : > { %v4396_v25 = vpop.eup %4395  ;;  %v1853_v15 = vadd.f32 1.0, %v4394_v20  ;;  %v1559_v55 = vadd.f32 %v1543_v18, %v5957_v44  ;;  %v1775_v10 = vmul.f32 %v1759_v30, %v5891_v53 }
 0x13a   : > { %v1852_v16 = vadd.f32 1.0, %v4396_v25  ;;  %v873_v18 = vpop.permute.xlu1 %872  ;;  %v8184_v25 = vrot.slane %v5743_v54, 7 }
 0x13b   : > { %4399 = vrcp.f32 %v1853_v15  ;;  %1608 = vperm.xlu1 %4370, %v8181_v9   ;;  %v6143_v12 = vadd.f32 %v1660_v47, %v1559_v55  ;;  %v6147_v44 = vadd.f32 %v1775_v10, %v6003_v24  ;;  %v8185_v9 = vrot.slane %v5748_v3, 7  ;;  %v6163_v24 = vld [vmem:[%s7857_s2 + $0x78] sm:$0xff]  ;;  %v6180_v10 = vld [vmem:[%s7865_s10] ss:$0 sm:$0xff] }
 0x13c   : > { %4401 = vrcp.f32 %v1852_v16  ;;  %v4398_v7 = vpop.eup %4397  ;;  %v762_v47 = vadd.f32 %v5580_v51, %v739_v46  ;;  %v914_v53 = vmul.f32 %v5357_v34, %v873_v18  ;;  %8186 = vst [vmem:[#allocation28_spill] sm:$0xff] %v6163_v24  ;;  %v7932_v46 = vrot.slane %v5743_v54, 1  ;;  %8189 = vst [vmem:[#allocation40_spill] sm:$0xff] %v6180_v10 }
 0x13d   : > { %8182 = vst [vmem:[#allocation34_spill] sm:$0xff] %v6143_v12  ;;  %v1854_v20 = vadd.f32 1.0, %v4398_v7  ;;  %v6156_v15 = vsel %vm786_vm1, %v8185_v9, %v8184_v25  ;;  %v3890_v30 = vmul.f32 -1.442695, %v6147_v44  ;;  %v6175_v7 = vld [vmem:[%s7864_s9] ss:$0 sm:$0xff] }
 0x13e   : > { %v930_v16 = vmul.f32 %v914_v53, %v6156_v15  ;;  %8188 = vst [vmem:[#allocation45_spill] sm:$0xff] %v6175_v7 }
 0x13f   : > { %4372 = vset.pattern.permute.xlu1 %v8183_v57  ;;  %4403 = vrcp.f32 %v1854_v20  ;;  %v1137_v21 = vpop.permute.xlu1 %1136  ;;  %v6186_v57 = vld [vmem:[%s7857_s2 + $0x60] sm:$0xff] }
 0x140   : > { %1014 = vperm.xlu1 %4372, %v6163_v24   ;;  %4405 = vpow2.f32 %v3890_v30  ;;  %v6168_v55 = vadd.f32 %v930_v16, %v762_v47  ;;  %v1179_v20 = vmul.f32 %v8159_v49, %v1137_v21  ;;  %v8192_v30 = vrot.slane %v5748_v3, 1 }
 0x142   : > { %v1195_v47 = vmul.f32 %v1179_v20, %v6019_v61  ;;  %v6202_v16 = vsel %vm1085_vm2, %v8192_v30, %v7932_v46  ;;  %v8194_v20 = vmov 6  }
 0x143   : > { %v1141_v53 = vpop.permute.xlu1 %1140  ;;  %8193 = vst [vmem:[#allocation25_spill] sm:$0xff] %v6202_v16 }
 0x144   : > { %4373 = vset.pattern.permute.xlu1 %v8187_v28 }
 0x145   : > { %v4400_v34 = vpop.eup %4399  ;;  %1269 = vperm.xlu1 %4373, %v6186_v57  }
 0x146   : > { %v4402_v18 = vpop.eup %4401  ;;  %v6190_v25 = vmul.f32 %v4400_v34, %v6028_v29  ;;  %v1180_v34 = vmul.f32 %v8159_v49, %v1141_v53 }
 0x147   : > { %v6193_v9 = vmul.f32 %v4402_v18, %v6045_v4  ;;  %v1211_v4 = vadd.f32 %v1195_v47, %v6011_v26  ;;  %v1529_v26 = vmul.f32 %v5442_v35, %v6031_v31 }
 0x148   : > { %8190 = vst [vmem:[#allocation27_spill] sm:$0xff] %v6190_v25  ;;  %v6206_v21 = vmul.f32 %v6175_v7, %v6190_v25  ;;  %v6210_v29 = vmul.f32 %v6180_v10, %v6190_v25  ;;  %v1196_v42 = vmul.f32 %v1180_v34, %v6202_v16 }
 0x149   : > { %8191 = vst [vmem:[#allocation5_spill] sm:$0xff] %v6193_v9  ;;  %4374 = vset.pattern.permute.xlu1 %v8194_v20  ;;  %v6217_v18 = vmul.f32 %v6175_v7, %v6193_v9  ;;  %v6221_v30 = vmul.f32 %v6180_v10, %v6193_v9  ;;  %v4404_v46 = vpop.eup %4403  ;;  %v6234_v5 = vadd.f32 %v8196_v62, %v1211_v4  ;;  %v1367_v62 = vpop.permute.xlu1 %1366 }
 0x14a   : > { %1495 = vperm.xlu1 %4374, %v4852_v56   ;;  %v7939_v47 = vsub.f32 0.0, %v6206_v21  ;;  %v6230_v53 = vmul.f32 %v4404_v46, %v6068_v45  ;;  %v4406_v24 = vpop.eup %4405  ;;  %v6249_v45 = vadd.f32 %v1196_v42, %v6048_v58  ;;  %v1412_v34 = vmul.f32 %v8104_v27, %v1367_v62 }
 0x14b   : > { %8197 = vst [vmem:[#allocation13_spill] sm:$0xff] %v6234_v5  ;;  %v7943_v39 = vsub.f32 0.0, %v6217_v18  ;;  %v1855_v4 = vadd.f32 1.0, %v4406_v24  ;;  %v1545_v46 = vmul.f32 %v1529_v26, %v5783_v37  ;;  %v8198_v24 = vsub.f32 0.0, %v6221_v30 }
 0x14c   : > { %8195 = vst [vmem:[#allocation46_spill] sm:$0xff] %v6230_v53  ;;  %v2018_v22 = vand.u32 2147483647, %v7939_v47  ;;  %v6242_v35 = vmul.f32 %v6175_v7, %v6230_v53  ;;  %v6246_v31 = vmul.f32 %v6180_v10, %v6230_v53  ;;  %v6256_v47 = vld [vmem:[%s7857_s2 + $0x58] sm:$0xff]  ;;  %v1428_v62 = vmul.f32 %v1412_v34, %v6019_v61  ;;  %v4854_v34 = vld [vmem:[%s7857_s2 + $0x48] sm:$0xff] }
 0x14d   : > { %v2017_v56 = vand.u32 2147483647, %v7943_v39  ;;  %v2177_v27 = vand.u32 2147483647, %v8198_v24  ;;  %4407 = vrcp.f32 %v1855_v4  ;;  %v8199_v39 = vsub.f32 0.0, %v6210_v29  ;;  %v6275_v37 = vpop.permute.xlu1 %1588 }
 0x14e   : > { %1499 = vperm.xlu1 %4374, %v6256_v47   ;;  %v2034_v3 = vsub.f32 0.0, %v2018_v22  ;;  %v7948_v42 = vsub.f32 0.0, %v6242_v35  ;;  %v7947_v58 = vsub.f32 0.0, %v6246_v31  ;;  %v1444_v12 = vadd.f32 %v1428_v62, %v6025_v48 }
 0x14f   : > { %v2033_v5 = vsub.f32 0.0, %v2017_v56  ;;  %v2178_v17 = vand.u32 2147483647, %v8199_v39  ;;  %v2193_v4 = vsub.f32 0.0, %v2177_v27  ;;  %v6283_v39 = vld [vmem:[%s7866_s11] ss:$0 sm:$0xff] }
 0x150   : > { %v2051_v16 = vmul.f32 1.442695, %v2034_v3  ;;  %v2019_v60 = vand.u32 2147483647, %v7948_v42  ;;  %v2179_v22 = vand.u32 2147483647, %v7947_v58  ;;  %v6285_v48 = vadd.f32 %v1545_v46, %v1444_v12 }
 0x151   : > { %v2049_v26 = vmul.f32 1.442695, %v2033_v5  ;;  %v2194_v24 = vsub.f32 0.0, %v2178_v17  ;;  %v2209_v62 = vmul.f32 1.442695, %v2193_v4  ;;  %v8202_v4 = vrot.slane %v8161_v32, 1 }
 0x152   : > { %4375 = vset.pattern.permute.xlu1 %v8120_v13  ;;  %4409 = vpow2.f32 %v2051_v16  ;;  %v2035_v56 = vsub.f32 0.0, %v2019_v60  ;;  %v2195_v3 = vsub.f32 0.0, %v2179_v22  ;;  %8200 = vst [vmem:[#allocation6_spill] sm:$0xff] %v6285_v48  ;;  %v7945_v60 = vrot.slane %v8178_v8, 1  ;;  %v995_v17 = vpop.permute.xlu1 %994 }
 0x153   : > { %1725 = vperm.xlu1 %4375, %v4854_v34   ;;  %4411 = vpow2.f32 %v2049_v26  ;;  %v2211_v27 = vmul.f32 1.442695, %v2194_v24  ;;  %v6290_v22 = vmul.f32 %v6283_v39, %v6190_v25  ;;  %v8201_v34 = vld [vmem:[#allocation14_spill] sm:$0xff]  ;;  %v1031_v46 = vmul.f32 %v8141_v52, %v995_v17  ;;  %v6299_v26 = vld [vmem:[%s7857_s2 + $0x70] sm:$0xff]  ;;  %v8209_v25 = vld [vmem:[#allocation43_spill] sm:$0xff] }
 0x154   : > { %v2053_v5 = vmul.f32 1.442695, %v2035_v56  ;;  %v2213_v16 = vmul.f32 1.442695, %v2195_v3  ;;  %4413 = vpow2.f32 %v2209_v62  ;;  %v1186_v12 = vmul.f32 %v8159_v49, %v8201_v34  ;;  %v8204_v49 = vld [vmem:[#allocation58_spill] sm:$0xff] }
 0x155   : > { %v7946_v56 = vrot.slane %v8204_v49, 1  ;;  %v1047_v24 = vmul.f32 %v1031_v46, %v5743_v54  ;;  %v7953_v62 = vsub.f32 0.0, %v6290_v22  ;;  %v8206_v17 = vrot.slane %v5797_v40, 1 }
 0x156   : > { %4415 = vpow2.f32 %v2053_v5  ;;  %vm2498_vm3 = vcmp.ge.f32.partialorder %v6290_v22, 0.0 }
 0x157   : > { %4376 = vset.pattern.permute.xlu1 %v8151_v14  ;;  %4417 = vpow2.f32 %v2213_v16  ;;  %v6308_v14 = vsel %vm1085_vm2, %v8202_v4, %v7945_v60  ;;  %v4408_v3 = vpop.eup %4407  ;;  %v999_v16 = vpop.permute.xlu1 %998  ;;  %v6322_v34 = vsel %vm1085_vm2, %v7946_v56, %v8206_v17  ;;  %v6325_v4 = vadd.f32 %v1047_v24, %v6168_v55 }
 0x158   : > { %1160 = vperm.xlu1 %4376, %v6299_v26   ;;  %8203 = vst [vmem:[#allocation37_spill] sm:$0xff] %v6308_v14  ;;  %4419 = vpow2.f32 %v2211_v27  ;;  %v6314_v5 = vmul.f32 %v4408_v3, %v6147_v44  ;;  %8207 = vst [vmem:[#allocation47_spill] sm:$0xff] %v6322_v34  ;;  %v1032_v46 = vmul.f32 %v8141_v52, %v999_v16  ;;  %v2626_v52 = vand.u32 2147483647, %v7953_v62 }
 0x159   : > { %v6330_v44 = vmul.f32 %v1186_v12, %v6322_v34  ;;  %v6346_v12 = vmul.f32 %v6283_v39, %v6193_v9 }
 0x15a   : > { %8205 = vst [vmem:[#allocation49_spill] sm:$0xff] %v6314_v5  ;;  %v6334_v3 = vmul.f32 %v6175_v7, %v6314_v5  ;;  %v6338_v60 = vmul.f32 %v6180_v10, %v6314_v5  ;;  %v1048_v24 = vmul.f32 %v1032_v46, %v5756_v33 }
 0x15b   : > { %8208 = vst [vmem:[#allocation36_spill] sm:$0xff] %v6330_v44  ;;  %v1258_v34 = vpop.permute.xlu1 %1257  ;;  %vm2497_vm4 = vcmp.ge.f32.partialorder %v6346_v12, 0.0 }
 0x15c   : > { %v4410_v27 = vpop.eup %4409  ;;  %4378 = vset.pattern.permute.xlu1 %v8162_v41  ;;  %v7955_v16 = vsub.f32 0.0, %v6334_v3  ;;  %v7956_v56 = vsub.f32 0.0, %v6338_v60  ;;  %v1064_v46 = vadd.f32 %v1048_v24, %v6061_v50  ;;  %v6370_v24 = vld [vmem:[%s7862_s7 + $0x3] ss:$0 sm:$0xff] }
 0x15d   : > { %1386 = vperm.xlu1 %4378, %v6186_v57   ;;  %v2082_v17 = vadd.f32 1.0, %v4410_v27  ;;  %v4412_v55 = vpop.eup %4411  ;;  %v6352_v27 = vmul.f32 %v8133_v63, %v8209_v25  ;;  %v742_v25 = vmul.f32 %v5530_v23, %v8178_v8  ;;  %8210 = vst [vmem:[#allocation23_spill] sm:$0xff] %v6370_v24  ;;  %v7968_v23 = vsub.f32 0.0, %v6346_v12 }
 0x15e   : > { %v2081_v58 = vadd.f32 1.0, %v4412_v55  ;;  %v4414_v42 = vpop.eup %4413  ;;  %v2020_v62 = vand.u32 2147483647, %v7955_v16  ;;  %v2180_v9 = vand.u32 2147483647, %v7956_v56  ;;  %v6362_v55 = vld [vmem:[%s7857_s2 + $0x68] sm:$0xff]  ;;  %v1297_v16 = vmul.f32 %v6370_v24, %v1258_v34 }
 0x15f   : > { %4421 = vlog2.f32 %v2082_v17  ;;  %v2642_v17 = vsub.f32 0.0, %v2626_v52  ;;  %v2241_v56 = vadd.f32 1.0, %v4414_v42  ;;  %v6374_v44 = vadd.f32 %v6122_v1, %v1064_v46 }
 0x160   : > { %v4416_v32 = vpop.eup %4415  ;;  %4423 = vlog2.f32 %v2081_v58  ;;  %v2036_v14 = vsub.f32 0.0, %v2020_v62  ;;  %v2196_v61 = vsub.f32 0.0, %v2180_v9  ;;  %v1643_v52 = vmul.f32 %v8133_v63, %v6275_v37  ;;  %v1480_v42 = vpop.permute.xlu1 %1479 }
 0x161   : > { %1390 = vperm.xlu1 %4378, %v6362_v55   ;;  %v4418_v50 = vpop.eup %4417  ;;  %v2083_v10 = vadd.f32 1.0, %v4416_v32  ;;  %v1313_v8 = vmul.f32 %v1297_v16, %v6156_v15  ;;  %4425 = vlog2.f32 %v2241_v56  ;;  %v6387_v32 = vld [vmem:[%s7862_s7 + $0x6] ss:$0 sm:$0xff]  ;;  %v2514_v56 = vmax.f32 %v6290_v22, 0.0 }
 0x162   : > { %v4420_v40 = vpop.eup %4419  ;;  %v2055_v48 = vmul.f32 1.442695, %v2036_v14  ;;  %v2215_v34 = vmul.f32 1.442695, %v2196_v61  ;;  %v2243_v1 = vadd.f32 1.0, %v4418_v50  ;;  %v1528_v63 = vmul.f32 %v6387_v32, %v1480_v42 }
 0x163   : > { %v2242_v7 = vadd.f32 1.0, %v4420_v40  ;;  %4427 = vlog2.f32 %v2083_v10  ;;  %v6382_v58 = vadd.f32 %v1313_v8, %v6249_v45  ;;  %v2659_v40 = vmul.f32 1.442695, %v2642_v17  ;;  %v8211_v45 = vld [vmem:[#allocation48_spill] sm:$0xff] }
 0x164   : > { %v6392_v61 = vadd.f32 %v5580_v51, %v742_v25  ;;  %v2625_v10 = vand.u32 2147483647, %v7968_v23  ;;  %v6398_v8 = vmul.f32 %v6283_v39, %v6314_v5  ;;  %v1659_v9 = vmul.f32 %v1643_v52, %v5604_v2  ;;  %v8231_v23 = vld [vmem:[#allocation13_spill] sm:$0xff] }
 0x165   : > { %4380 = vset.pattern.permute.xlu1 %v8177_v11  ;;  %4429 = vlog2.f32 %v2242_v7  ;;  %v1544_v37 = vmul.f32 %v1528_v63, %v8211_v45  ;;  %v6404_v7 = vmul.f32 %v6387_v32, %v6065_v59  ;;  %v8212_v51 = vsub.f32 0.0, %v6206_v21  ;;  %v1706_v46 = vpop.permute.xlu1 %1705  ;;  %v6417_v21 = vld [vmem:[%s7862_s7 + $0x8] ss:$0 sm:$0xff] }
 0x166   : > { %1616 = vperm.xlu1 %4380, %v6256_v47   ;;  %4431 = vpow2.f32 %v2055_v48  ;;  %v2641_v62 = vsub.f32 0.0, %v2625_v10  ;;  %v8213_v2 = vsub.f32 0.0, %v6210_v29  ;;  %v7966_v59 = vsub.f32 0.0, %v6398_v8  ;;  %v8216_v10 = vld [vmem:[#allocation3_spill] sm:$0xff] }
 0x167   : > { %4433 = vpow2.f32 %v2215_v34  ;;  %v2002_v14 = vmax.f32 %v8212_v51, 0.0  ;;  %v1560_v16 = vadd.f32 %v1544_v37, %v6097_v19  ;;  %v1760_v17 = vmul.f32 %v6417_v21, %v1706_v46 }
 0x168   : > { %4435 = vlog2.f32 %v2243_v1  ;;  %v2162_v25 = vmax.f32 %v8213_v2, 0.0  ;;  %v8214_v19 = vsub.f32 0.0, %v6217_v18  ;;  %v2657_v52 = vmul.f32 1.442695, %v2641_v62 }
 0x169   : > { %v4422_v48 = vpop.eup %4421  ;;  %4437 = vpow2.f32 %v2659_v40  ;;  %v1675_v29 = vadd.f32 %v1659_v9, %v6127_v43  ;;  %v8215_v42 = vsub.f32 0.0, %v6221_v30  ;;  %v6427_v63 = vadd.f32 %v6111_v38, %v1560_v16  ;;  %v1710_v62 = vpop.permute.xlu1 %1709 }
 0x16a   : > { %4381 = vset.pattern.permute.xlu1 %v8187_v28  ;;  %v2001_v50 = vmax.f32 %v8214_v19, 0.0  ;;  %v2100_v28 = vmul.f32 0.6931472, %v4422_v48  ;;  %v4424_v34 = vpop.eup %4423  ;;  %v2628_v40 = vand.u32 2147483647, %v7966_v59  ;;  %v1776_v45 = vmul.f32 %v1760_v17, %v8216_v10 }
 0x16b   : > { %1277 = vperm.xlu1 %4381, %v6299_v26   ;;  %v2161_v1 = vmax.f32 %v8215_v42, 0.0  ;;  %v2098_v37 = vmul.f32 0.6931472, %v4424_v34  ;;  %v8217_v18 = vsub.f32 0.0, %v6242_v35  ;;  %4439 = vpow2.f32 %v2657_v52  ;;  %v4426_v48 = vpop.eup %4425 }
 0x16c   : > { %v8218_v43 = vsub.f32 0.0, %v6246_v31  ;;  %v2530_v30 = vadd.f32 0.5, %v2514_v56  ;;  %v2644_v46 = vsub.f32 0.0, %v2628_v40  ;;  %v6438_v38 = vmul.f32 %v6283_v39, %v6230_v53 }
 0x16d   : > { %v2003_v51 = vmax.f32 %v8217_v18, 0.0  ;;  %v4428_v16 = vpop.eup %4427  ;;  %v6440_v2 = vadd.f32 %v1776_v45, %v1675_v29  ;;  %v1761_v17 = vmul.f32 %v6417_v21, %v1710_v62  ;;  %v2130_v35 = vadd.f32 %v2100_v28, %v2002_v14 }
 0x16e   : > { %v2163_v9 = vmax.f32 %v8218_v43, 0.0  ;;  %v2258_v19 = vmul.f32 0.6931472, %v4426_v48  ;;  %v2129_v31 = vadd.f32 %v2098_v37, %v2001_v50  ;;  %v2102_v34 = vmul.f32 0.6931472, %v4428_v16  ;;  %v8220_v43 = vld [vmem:[#allocation34_spill] sm:$0xff] }
 0x16f   : > { %4383 = vset.pattern.permute.xlu1 %v8194_v20  ;;  %v4430_v52 = vpop.eup %4429  ;;  %v6447_v56 = vmul.f32 %v6352_v27, %v5751_v6  ;;  %v2663_v42 = vmul.f32 1.442695, %v2644_v46  ;;  %v3891_v29 = vmul.f32 -1.442695, %v6440_v2  ;;  %v1777_v10 = vmul.f32 %v1761_v17, %v5871_v0  ;;  %v888_v46 = vpop.permute.xlu1 %887  ;;  %v6458_v0 = vld [vmem:[%s7862_s7] ss:$0 sm:$0xff] }
 0x170   : > { %1503 = vperm.xlu1 %4383, %v6186_v57   ;;  %v4432_v40 = vpop.eup %4431  ;;  %v2260_v45 = vmul.f32 0.6931472, %v4430_v52  ;;  %v2289_v18 = vadd.f32 %v2258_v19, %v2161_v1  ;;  %v2131_v28 = vadd.f32 %v2102_v34, %v2003_v51  ;;  %v2513_v48 = vmax.f32 %v6346_v12, 0.0 }
 0x171   : > { %8219 = vst [vmem:[#allocation9_spill] sm:$0xff] %v6447_v56  ;;  %v4434_v62 = vpop.eup %4433  ;;  %v2084_v14 = vadd.f32 1.0, %v4432_v40  ;;  %4441 = vpow2.f32 %v2663_v42  ;;  %v6453_v27 = vadd.f32 %v1777_v10, %v8220_v43  ;;  %v917_v1 = vmul.f32 %v6458_v0, %v888_v46  ;;  %v8224_v40 = vld [vmem:[#allocation20_spill] sm:$0xff] }
 0x172   : > { %v4436_v50 = vpop.eup %4435  ;;  %v2244_v37 = vadd.f32 1.0, %v4434_v62  ;;  %4443 = vpow2.f32 %v3891_v29  ;;  %v2290_v16 = vadd.f32 %v2260_v45, %v2162_v25  ;;  %v6462_v51 = vsub.f32 %v2129_v31, %v2289_v18 }
 0x173   : > { %v4438_v59 = vpop.eup %4437  ;;  %4445 = vlog2.f32 %v2084_v14  ;;  %v2262_v17 = vmul.f32 0.6931472, %v4436_v50  ;;  %v3892_v19 = vmul.f32 -1.442695, %v6453_v27  ;;  %v8221_v52 = vrot.slane %v5756_v33, 1  ;;  %v1145_v46 = vpop.permute.xlu1 %1144 }
 0x174   : > { %1507 = vperm.xlu1 %4383, %v6362_v55   ;;  %v8222_v25 = vrot.slane %v5743_v54, 1  ;;  %v6473_v42 = vsub.f32 %v2130_v35, %v2290_v16  ;;  %4447 = vlog2.f32 %v2244_v37  ;;  %v933_v29 = vmul.f32 %v917_v1, %v8224_v40  ;;  %v8225_v1 = vld [vmem:[#allocation26_spill] sm:$0xff] }
 0x175   : > { %v2337_v31 = vand.u32 2147483647, %v6462_v51  ;;  %v2291_v10 = vadd.f32 %v2262_v17, %v2163_v9  ;;  %v2546_v45 = vadd.f32 1e-08, %v2530_v30  ;;  %v4440_v18 = vpop.eup %4439  ;;  %4449 = vpow2.f32 %v3892_v19  ;;  %v6486_v9 = vld [vmem:[%s7862_s7 + $0x2] ss:$0 sm:$0xff] }
 0x176   : > { %v6471_v34 = vsel %vm1085_vm2, %v8222_v25, %v8221_v52  ;;  %v2338_v62 = vand.u32 2147483647, %v6473_v42  ;;  %v2690_v14 = vadd.f32 1.0, %v4438_v59  ;;  %v2529_v50 = vadd.f32 0.5, %v2513_v48 }
 0x177   : > { %8223 = vst [vmem:[#allocation4_spill] sm:$0xff] %v6471_v34  ;;  %v949_v43 = vadd.f32 %v933_v29, %v6392_v61  ;;  %v2353_v35 = vsub.f32 0.0, %v2337_v31  ;;  %v6480_v16 = vsub.f32 %v2131_v28, %v2291_v10  ;;  %v7967_v37 = vsub.f32 0.0, %v6438_v38 }
 0x178   : > { %4384 = vset.pattern.permute.xlu1 %v8120_v13  ;;  %v1181_v30 = vmul.f32 %v6486_v9, %v1145_v46  ;;  %v2354_v59 = vsub.f32 0.0, %v2338_v62  ;;  %4451 = vlog2.f32 %v2690_v14  ;;  %v2689_v61 = vadd.f32 1.0, %v4440_v18 }
 0x179   : > { %1733 = vperm.xlu1 %4384, %v6256_v47   ;;  %v2369_v48 = vmul.f32 1.442695, %v2353_v35  ;;  %v6491_v17 = vadd.f32 %v8225_v1, %v949_v43  ;;  %v2339_v28 = vand.u32 2147483647, %v6480_v16  ;;  %4453 = vlog2.f32 %v2546_v45  ;;  %v1371_v45 = vpop.permute.xlu1 %1370 }
 0x17a   : > { %v1197_v19 = vmul.f32 %v1181_v30, %v6471_v34  ;;  %v2371_v52 = vmul.f32 1.442695, %v2354_v59  ;;  %v2545_v25 = vadd.f32 1e-08, %v2529_v50  ;;  %4455 = vlog2.f32 %v2689_v61 }
 0x17b   : > { %8226 = vst [vmem:[#allocation10_spill] sm:$0xff] %v6491_v17  ;;  %v4442_v29 = vpop.eup %4441  ;;  %v1546_v31 = vmul.f32 %v6404_v7, %v6156_v15  ;;  %4457 = vpow2.f32 %v2369_v48  ;;  %v2355_v47 = vsub.f32 0.0, %v2339_v28  ;;  %v8227_v18 = vsub.f32 0.0, %v6334_v3  ;;  %v6508_v15 = vld [vmem:[%s7862_s7 + $0x5] ss:$0 sm:$0xff]  ;;  %v8230_v28 = vld [vmem:[#allocation25_spill] sm:$0xff] }
 0x17c   : > { %v4444_v10 = vpop.eup %4443  ;;  %v6500_v14 = vadd.f32 %v1197_v19, %v6325_v4  ;;  %4459 = vpow2.f32 %v2371_v52  ;;  %v2627_v50 = vand.u32 2147483647, %v7967_v37  ;;  %8228 = vst [vmem:[#allocation41_spill] sm:$0xff] %v6508_v15  ;;  %v1413_v3 = vmul.f32 %v6508_v15, %v1371_v45  ;;  %v1718_v4 = vpop.permute.xlu0 %1717 }
 0x17d   : > { %v2004_v62 = vmax.f32 %v8227_v18, 0.0  ;;  %4385 = vset.pattern.permute.xlu1 %v8162_v41  ;;  %v4446_v43 = vpop.eup %4445  ;;  %v1856_v46 = vadd.f32 1.0, %v4444_v10  ;;  %v2373_v7 = vmul.f32 1.442695, %v2355_v47  ;;  %v2516_v41 = vmax.f32 %v6398_v8, 0.0  ;;  %v1375_v18 = vpop.permute.xlu1 %1374 }
 0x17e   : > { %1394 = vperm.xlu1 %4385, %v6299_v26   ;;  %v4448_v35 = vpop.eup %4447  ;;  %v2104_v30 = vmul.f32 0.6931472, %v4446_v43  ;;  %4461 = vlog2.f32 %v2545_v25  ;;  %v2692_v59 = vadd.f32 1.0, %v4442_v29  ;;  %v2643_v61 = vsub.f32 0.0, %v2627_v50 }
 0x17f   : > { %v8229_v48 = vsub.f32 0.0, %v6338_v60  ;;  %4463 = vrcp.f32 %v1856_v46  ;;  %v1429_v19 = vmul.f32 %v1413_v3, %v8230_v28  ;;  %v2264_v52 = vmul.f32 0.6931472, %v4448_v35  ;;  %v4450_v10 = vpop.eup %4449 }
 0x180   : > { %v1763_v45 = vmul.f32 %v6417_v21, %v1718_v4  ;;  %v2132_v37 = vadd.f32 %v2104_v30, %v2004_v62  ;;  %4465 = vpow2.f32 %v2373_v7  ;;  %v1857_v47 = vadd.f32 1.0, %v4450_v10  ;;  %v6531_v30 = vld [vmem:[%s7862_s7 + $0x4] ss:$0 sm:$0xff] }
 0x181   : > { %v2164_v1 = vmax.f32 %v8229_v48, 0.0  ;;  %v1445_v53 = vadd.f32 %v1429_v19, %v8231_v23  ;;  %v1414_v25 = vmul.f32 %v6508_v15, %v1375_v18  ;;  %v2532_v50 = vadd.f32 0.5, %v2516_v41  ;;  %8233 = vst [vmem:[#allocation12_spill] sm:$0xff] %v6531_v30 }
 0x182   : > { %4387 = vset.pattern.permute.xlu1 %v8177_v11  ;;  %v4452_v60 = vpop.eup %4451  ;;  %4467 = vlog2.f32 %v2692_v59  ;;  %v2515_v43 = vmax.f32 %v6438_v38, 0.0  ;;  %v2661_v46 = vmul.f32 1.442695, %v2643_v61  ;;  %v1779_v35 = vmul.f32 %v1763_v45, %v8230_v28 }
 0x183   : > { %v2292_v29 = vadd.f32 %v2264_v52, %v2164_v1  ;;  %1620 = vperm.xlu1 %4387, %v6186_v57   ;;  %v4454_v3 = vpop.eup %4453  ;;  %4469 = vrcp.f32 %v1857_v47  ;;  %v6522_v62 = vadd.f32 %v1546_v31, %v1445_v53  ;;  %v1430_v4 = vmul.f32 %v1414_v25, %v6471_v34  ;;  %v1601_v31 = vpop.permute.xlu1 %1600  ;;  %v6546_v52 = vld [vmem:[%s7862_s7 + $0x7] ss:$0 sm:$0xff]  ;;  %v8250_v34 = vld [vmem:[#allocation39_spill] sm:$0xff] }
 0x184   : > { %v4456_v7 = vpop.eup %4455  ;;  %v6535_v41 = vmul.f32 %v6531_v30, %v8204_v49  ;;  %v2708_v59 = vmul.f32 0.6931472, %v4452_v60  ;;  %v8234_v48 = vsub.f32 0.0, %v6290_v22  ;;  %8235 = vst [vmem:[#allocation16_spill] sm:$0xff] %v6546_v52  ;;  %v1646_v10 = vmul.f32 %v6546_v52, %v1601_v31 }
 0x185   : > { %8232 = vst [vmem:[#allocation60_spill] sm:$0xff] %v6522_v62  ;;  %v6525_v23 = vsub.f32 %v2132_v37, %v2292_v29  ;;  %v4458_v61 = vpop.eup %4457  ;;  %v6538_v53 = vadd.f32 %v1430_v4, %v6382_v58  ;;  %v2706_v28 = vmul.f32 0.6931472, %v4456_v7  ;;  %v8236_v58 = vsub.f32 0.0, %v6346_v12  ;;  %v8237_v7 = vld [vmem:[#allocation51_spill] sm:$0xff] }
 0x186   : > { %v2610_v1 = vmax.f32 %v8234_v48, 0.0  ;;  %v4460_v19 = vpop.eup %4459  ;;  %v2401_v18 = vadd.f32 1.0, %v4458_v61  ;;  %v2548_v47 = vadd.f32 1e-08, %v2532_v50  ;;  %v2531_v60 = vadd.f32 0.5, %v2515_v43  ;;  %v8240_v43 = vld [vmem:[#allocation6_spill] sm:$0xff] }
 0x187   : > { %v2340_v37 = vand.u32 2147483647, %v6525_v23  ;;  %1624 = vperm.xlu1 %4387, %v6362_v55   ;;  %v2609_v45 = vmax.f32 %v8236_v58, 0.0  ;;  %v2402_v25 = vadd.f32 1.0, %v4460_v19  ;;  %4471 = vpow2.f32 %v2661_v46  ;;  %v1003_v19 = vpop.permute.xlu1 %1002  ;;  %v8244_v58 = vld [vmem:[#allocation40_spill] sm:$0xff] }
 0x188   : > { %v4462_v4 = vpop.eup %4461  ;;  %v1662_v48 = vmul.f32 %v1646_v10, %v8237_v7  ;;  %4473 = vlog2.f32 %v2401_v18  ;;  %v6553_v5 = vmul.f32 0.6931472, %v4454_v3  ;;  %v2738_v56 = vadd.f32 %v2708_v59, %v2610_v1  ;;  %v6568_v59 = vld [vmem:[%s7862_s7 + $0x1] ss:$0 sm:$0xff]  ;;  %v8243_v18 = vld [vmem:[#allocation45_spill] sm:$0xff] }
 0x189   : > { %v2356_v29 = vsub.f32 0.0, %v2340_v37  ;;  %v4464_v40 = vpop.eup %4463  ;;  %4475 = vlog2.f32 %v2402_v25  ;;  %v2737_v55 = vadd.f32 %v2706_v28, %v2609_v45  ;;  %v8238_v61 = vsub.f32 0.0, %v6398_v8  ;;  %8241 = vst [vmem:[#allocation7_spill] sm:$0xff] %v6568_v59  ;;  %v8242_v28 = vld [vmem:[#allocation28_spill] sm:$0xff] }
 0x18a   : > { %v4466_v50 = vpop.eup %4465  ;;  %v6560_v37 = vmul.f32 %v4464_v40, %v6440_v2  ;;  %v1678_v46 = vadd.f32 %v1662_v48, %v8240_v43  ;;  %4477 = vlog2.f32 %v2548_v47  ;;  %v1033_v1 = vmul.f32 %v6568_v59, %v1003_v19  ;;  %v8246_v43 = vld [vmem:[#allocation19_spill] sm:$0xff] }
 0x18b   : > { %v2375_v31 = vmul.f32 1.442695, %v2356_v29  ;;  %v6557_v33 = vmax.f32 %v8238_v61, 0.0  ;;  %4389 = vset.pattern.permute.xlu1 %v8194_v20  ;;  %v2403_v2 = vadd.f32 1.0, %v4466_v50  ;;  %v2547_v40 = vadd.f32 1e-08, %v2531_v60 }
 0x18c   : > { %8239 = vst [vmem:[#allocation38_spill] sm:$0xff] %v6560_v37  ;;  %1515 = vperm.xlu1 %4389, %v8242_v28   ;;  %v4468_v10 = vpop.eup %4467  ;;  %v6574_v20 = vmul.f32 %v8243_v18, %v6560_v37  ;;  %v6578_v45 = vmul.f32 %v8244_v58, %v6560_v37  ;;  %v6580_v47 = vadd.f32 %v1779_v35, %v1678_v46  ;;  %v2754_v25 = vsub.f32 0.0, %v2738_v56  ;;  %v1262_v56 = vpop.permute.xlu1 %1261 }
 0x18d   : > { %4479 = vpow2.f32 %v2375_v31  ;;  %v4470_v29 = vpop.eup %4469  ;;  %v1049_v7 = vmul.f32 %v1033_v1, %v5751_v6  ;;  %v2322_v48 = vmax.f32 %v6473_v42, 0.0  ;;  %v2753_v60 = vsub.f32 0.0, %v2737_v55 }
 0x18e   : > { %4481 = vlog2.f32 %v2403_v2  ;;  %v7972_v31 = vsub.f32 0.0, %v6574_v20  ;;  %v7973_v61 = vsub.f32 0.0, %v6578_v45  ;;  %v6588_v50 = vmul.f32 %v4470_v29, %v6453_v27 }
 0x18f   : > { %v3894_v35 = vmul.f32 -1.442695, %v6580_v47  ;;  %v1065_v46 = vadd.f32 %v1049_v7, %v8246_v43  ;;  %v2323_v6 = vmax.f32 %v6480_v16, 0.0  ;;  %v6594_v19 = vmul.f32 0.6931472, %v4462_v4 }
 0x190   : > { %8245 = vst [vmem:[#allocation44_spill] sm:$0xff] %v6588_v50  ;;  %4390 = vset.pattern.permute.xlu1 %v8120_v13  ;;  %v6596_v1 = vmul.f32 0.6931472, %v4468_v10  ;;  %v2021_v55 = vand.u32 2147483647, %v7972_v31  ;;  %4483 = vlog2.f32 %v2547_v40  ;;  %v6605_v7 = vmul.f32 %v8243_v18, %v6588_v50 }
 0x191   : > { %v2181_v27 = vand.u32 2147483647, %v7973_v61  ;;  %1737 = vperm.xlu1 %4390, %v6186_v57   ;;  %v2770_v2 = vadd.f32 1e-08, %v2754_v25  ;;  %v4472_v29 = vpop.eup %4471  ;;  %v6609_v4 = vmul.f32 %v8244_v58, %v6588_v50  ;;  %4485 = vpow2.f32 %v3894_v35  ;;  %v8248_v61 = vld [vmem:[#allocation21_spill] sm:$0xff]  ;;  %v1266_v52 = vpop.permute.xlu1 %1265 }
 0x192   : > { %v1298_v10 = vmul.f32 %v6370_v24, %v1262_v56  ;;  %v4474_v43 = vpop.eup %4473  ;;  %v2037_v31 = vsub.f32 0.0, %v2021_v55  ;;  %v6613_v59 = vadd.f32 %v8248_v61, %v1065_v46  ;;  %v2769_v57 = vadd.f32 1e-08, %v2753_v60 }
 0x193   : > { %8247 = vst [vmem:[#allocation61_spill] sm:$0xff] %v6609_v4  ;;  %v2197_v3 = vsub.f32 0.0, %v2181_v27  ;;  %v4476_v40 = vpop.eup %4475  ;;  %v7982_v25 = vsub.f32 0.0, %v6605_v7  ;;  %v7983_v62 = vsub.f32 0.0, %v6609_v4  ;;  %v2418_v30 = vmul.f32 0.6931472, %v4474_v43 }
 0x194   : > { %8249 = vst [vmem:[#allocation11_spill] sm:$0xff] %v6613_v59  ;;  %v1314_v54 = vmul.f32 %v1298_v10, %v8250_v34  ;;  %v6618_v15 = vpop.eup %4477  ;;  %v2057_v35 = vmul.f32 1.442695, %v2037_v31  ;;  %v2420_v17 = vmul.f32 0.6931472, %v4476_v40  ;;  %v1299_v55 = vmul.f32 %v6370_v24, %v1266_v52 }
 0x195   : > { %v2217_v56 = vmul.f32 1.442695, %v2197_v3  ;;  %4391 = vset.pattern.permute.xlu1 %v8177_v11  ;;  %v2022_v61 = vand.u32 2147483647, %v7982_v25  ;;  %v2182_v46 = vand.u32 2147483647, %v7983_v62  ;;  %v2786_v3 = vsel %vm2498_vm3, %v6553_v5, %v2770_v2 }
 0x196   : > { %1628 = vperm.xlu1 %4391, %v6299_v26   ;;  %v2691_v31 = vadd.f32 1.0, %v4472_v29  ;;  %4487 = vpow2.f32 %v2057_v35  ;;  %v6632_v52 = vadd.f32 %v1314_v54, %v6500_v14  ;;  %v8251_v11 = vmax.f32 %v6462_v51, 0.0  ;;  %v8252_v62 = vld [vmem:[#allocation2_spill] sm:$0xff] }
 0x197   : > { %v4480_v60 = vpop.eup %4479  ;;  %v2450_v10 = vadd.f32 %v2420_v17, %v2322_v48  ;;  %4489 = vpow2.f32 %v2217_v56  ;;  %v2038_v40 = vsub.f32 0.0, %v2022_v61  ;;  %v2198_v25 = vsub.f32 0.0, %v2182_v46  ;;  %v1492_v4 = vpop.permute.xlu1 %1491 }
 0x198   : > { %v2449_v27 = vadd.f32 %v2418_v30, %v8251_v11  ;;  %v4482_v43 = vpop.eup %4481  ;;  %v1315_v59 = vmul.f32 %v1299_v55, %v8252_v62  ;;  %v2404_v22 = vadd.f32 1.0, %v4480_v60  ;;  %v1531_v14 = vmul.f32 %v6387_v32, %v1492_v4  ;;  %v8253_v60 = vld [vmem:[#allocation33_spill] sm:$0xff] }
 0x199   : > { %v2466_v24 = vsub.f32 0.0, %v2450_v10  ;;  %v2422_v5 = vmul.f32 0.6931472, %v4482_v43  ;;  %v2059_v2 = vmul.f32 1.442695, %v2038_v40  ;;  %v6673_v12 = vmul.f32 %v6283_v39, %v6588_v50  ;;  %v8256_v40 = vld [vmem:[#allocation53_spill] sm:$0xff] }
 0x19a   : > { %v2465_v26 = vsub.f32 0.0, %v2449_v27  ;;  %v2219_v29 = vmul.f32 1.442695, %v2198_v25  ;;  %v1331_v54 = vadd.f32 %v1315_v59, %v6374_v44  ;;  %1632 = vperm.xlu1 %4391, %v8242_v28   ;;  %v4484_v17 = vpop.eup %4483  ;;  %4491 = vlog2.f32 %v2404_v22  ;;  %v6681_v10 = vld [vmem:[%s7863_s8] ss:$0 sm:$0xff] }
 0x19b   : > { %v2818_v48 = vadd.f32 1e-08, %v2466_v24  ;;  %v6640_v35 = vadd.f32 %v2422_v5, %v2323_v6  ;;  %v4486_v56 = vpop.eup %4485  ;;  %4493 = vpow2.f32 %v2059_v2  ;;  %v1547_v55 = vmul.f32 %v1531_v14, %v8250_v34 }
 0x19c   : > { %v2817_v30 = vadd.f32 1e-08, %v2465_v26  ;;  %v6644_v61 = vadd.f32 %v8253_v60, %v1331_v54  ;;  %v2482_v25 = vadd.f32 %v2466_v24, %v6473_v42  ;;  %4495 = vpow2.f32 %v2219_v29  ;;  %v1714_v6 = vpop.permute.xlu1 %1713 }
 0x19d   : > { %v1859_v44 = vadd.f32 1.0, %v4486_v56  ;;  %v2467_v4 = vsub.f32 0.0, %v6640_v35  ;;  %v6649_v46 = vadd.f32 %v1547_v55, %v6538_v53  ;;  %v2481_v34 = vadd.f32 %v2465_v26, %v6462_v51 }
 0x19e   : > { %v4241_v59 = vpack.c.bf16 %v2818_v48, %v2817_v30  ;;  %4392 = vset.pattern.permute.xlu1 %v8120_v13  ;;  %v6652_v11 = vadd.f32 %v2786_v3, %v2482_v25  ;;  %v2785_v27 = vsel %vm2497_vm4, %v6594_v19, %v2769_v57  ;;  %v1762_v24 = vmul.f32 %v6417_v21, %v1714_v6  ;;  %v8254_v19 = vld [vmem:[#allocation17_spill] sm:$0xff] }
 0x19f   : > { %4497 = vrcp.f32 %v1859_v44  ;;  %1749 = vperm.xlu1 %4392, %v8242_v28   ;;  %v6663_v42 = vadd.f32 %v2467_v4, %v6480_v16  ;;  %v6667_v13 = vmul.f32 %v6283_v39, %v6560_v37  ;;  %v6669_v51 = vadd.f32 %v2785_v27, %v2481_v34 }
 0x1a0   : > { %4242 = vmatprep.subr.bf16.mxu1 %v4241_v59  ;;  %4499 = vlog2.f32 %v2691_v31  ;;  %v4488_v53 = vpop.eup %4487  ;;  %v1778_v28 = vmul.f32 %v1762_v24, %v8254_v19  ;;  %v2740_v57 = vadd.f32 %v6596_v1, %v6557_v33  ;;  %v766_v31 = vadd.f32 %v6681_v10, %v6535_v41 }
 0x1a1   : > { %4244 = vmatpush3.bf16.msra.mxu1 %v4241_v59  ;;  %v4490_v16 = vpop.eup %4489  ;;  %v2085_v3 = vadd.f32 1.0, %v4488_v53  ;;  %v8255_v43 = vrot.slane %v8204_v49, 7  ;;  %v8257_v26 = vrot.slane %v8256_v40, 7  ;;  %v7992_v33 = vsub.f32 0.0, %v6673_v12  ;;  %v893_v2 = vpop.permute.xlu1 %892  ;;  %v8260_v59 = vld [vmem:[#allocation57_spill] sm:$0xff] }
 0x1a2   : > { %v2245_v1 = vadd.f32 1.0, %v4490_v16  ;;  %v6695_v5 = vadd.f32 %v1778_v28, %v6427_v63  ;;  %v2568_v29 = vmul.f32 0.6931472, %v6618_v15  ;;  %v7986_v54 = vsub.f32 0.0, %v6667_v13 }
 0x1a3   : > { %v6691_v22 = vsel %vm786_vm1, %v8257_v26, %v8255_v43  ;;  %v918_v41 = vmul.f32 %v6458_v0, %v893_v2  ;;  %v2324_v14 = vmax.f32 %v6525_v23, 0.0  ;;  %4501 = vlog2.f32 %v2085_v3 }
 0x1a4   : > { %vm2500_vm5 = vcmp.ge.f32.partialorder %v6398_v8, 0.0  ;;  %v8258_v30 = vsub.f32 0.0, %v6438_v38  ;;  %v4492_v56 = vpop.eup %4491  ;;  %v3893_v55 = vmul.f32 -1.442695, %v6695_v5  ;;  %4503 = vlog2.f32 %v2245_v1 }
 0x1a5   : > { %v2756_v63 = vsub.f32 0.0, %v2740_v57  ;;  %v2630_v15 = vand.u32 2147483647, %v7992_v33  ;;  %v4494_v60 = vpop.eup %4493  ;;  %v8259_v25 = vsub.f32 0.0, %v6574_v20  ;;  %v934_v6 = vmul.f32 %v918_v41, %v8260_v59  ;;  %v898_v19 = vpop.permute.xlu1 %897 }
 0x1a6   : > { %v2611_v48 = vmax.f32 %v8258_v30, 0.0  ;;  %v2424_v34 = vmul.f32 0.6931472, %v4492_v56  ;;  %v6710_v27 = vmul.f32 0.6931472, %v4484_v17  ;;  %v4496_v24 = vpop.eup %4495  ;;  %v2086_v53 = vadd.f32 1.0, %v4494_v60 }
 0x1a7   : > { %v2005_v44 = vmax.f32 %v8259_v25, 0.0  ;;  %4505 = vpow2.f32 %v3893_v55  ;;  %v2646_v28 = vsub.f32 0.0, %v2630_v15  ;;  %v2629_v57 = vand.u32 2147483647, %v7986_v54  ;;  %v8263_v60 = vld [vmem:[#allocation24_spill] sm:$0xff] }
 0x1a8   : > { %v2246_v16 = vadd.f32 1.0, %v4496_v24  ;;  %v950_v3 = vadd.f32 %v934_v6, %v766_v31  ;;  %v919_v43 = vmul.f32 %v6458_v0, %v898_v19  ;;  %v2452_v26 = vadd.f32 %v2424_v34, %v2324_v14 }
 0x1a9   : > { %v4498_v20 = vpop.eup %4497  ;;  %v8261_v1 = vsub.f32 0.0, %v6578_v45  ;;  %4507 = vlog2.f32 %v2086_v53  ;;  %v2772_v17 = vadd.f32 1e-08, %v2756_v63  ;;  %v2667_v41 = vmul.f32 1.442695, %v2646_v28 }
 0x1aa   : > { %v4500_v30 = vpop.eup %4499  ;;  %v6718_v56 = vmul.f32 %v4498_v20, %v6580_v47  ;;  %v6721_v55 = vmul.f32 %v919_v43, %v6691_v22  ;;  %v2468_v15 = vsub.f32 0.0, %v2452_v26  ;;  %v6724_v31 = vadd.f32 %v8263_v60, %v950_v3  ;;  %v8265_v43 = vld [vmem:[#allocation37_spill] sm:$0xff] }
 0x1ab   : > { %v2165_v2 = vmax.f32 %v8261_v1, 0.0  ;;  %vm2499_vm6 = vcmp.ge.f32.partialorder %v6438_v38, 0.0  ;;  %v8264_v0 = vsub.f32 0.0, %v6605_v7  ;;  %v2819_v14 = vadd.f32 1e-08, %v2467_v4  ;;  %v1157_v6 = vpop.permute.xlu1 %1156  ;;  %v1722_v7 = vpop.permute.xlu0 %1721 }
 0x1ac   : > { %8262 = vst [vmem:[#allocation15_spill] sm:$0xff] %v6718_v56  ;;  %4509 = vlog2.f32 %v2246_v16  ;;  %v2710_v63 = vmul.f32 0.6931472, %v4500_v30  ;;  %v6733_v47 = vmul.f32 %v8243_v18, %v6718_v56  ;;  %v6737_v25 = vmul.f32 %v8244_v58, %v6718_v56  ;;  %v8266_v30 = vld [vmem:[#allocation10_spill] sm:$0xff] }
 0x1ad   : > { %v2006_v45 = vmax.f32 %v8264_v0, 0.0  ;;  %v2820_v34 = vadd.f32 1e-08, %v2468_v15  ;;  %v2645_v24 = vsub.f32 0.0, %v2629_v57  ;;  %v1184_v53 = vmul.f32 %v6486_v9, %v1157_v6  ;;  %v4502_v28 = vpop.eup %4501 }
 0x1ae   : > { %v2484_v19 = vadd.f32 %v2468_v15, %v6525_v23  ;;  %v2788_v35 = vsel %vm2500_vm5, %v2568_v29, %v2772_v17  ;;  %v2739_v4 = vadd.f32 %v2710_v63, %v2611_v48  ;;  %v7989_v18 = vsub.f32 0.0, %v6733_v47  ;;  %v4504_v58 = vpop.eup %4503 }
 0x1af   : > { %v7987_v16 = vsub.f32 0.0, %v6737_v25  ;;  %v4245_v3 = vpack.c.bf16 %v2820_v34, %v2819_v14  ;;  %4511 = vpow2.f32 %v2667_v41  ;;  %v1200_v26 = vmul.f32 %v1184_v53, %v8265_v43  ;;  %v8267_v53 = vld [vmem:[#allocation41_spill] sm:$0xff] }
 0x1b0   : > { %v2106_v57 = vmul.f32 0.6931472, %v4502_v28  ;;  %v6746_v20 = vadd.f32 %v2788_v35, %v2484_v19  ;;  %v2755_v1 = vsub.f32 0.0, %v2739_v4  ;;  %v2024_v23 = vand.u32 2147483647, %v7989_v18  ;;  %v8268_v4 = vld [vmem:[#allocation61_spill] sm:$0xff] }
 0x1b1   : > { %v2184_v8 = vand.u32 2147483647, %v7987_v16  ;;  %4246 = vmatprep.subr.bf16.mxu1 %v4245_v3  ;;  %v1764_v29 = vmul.f32 %v6417_v21, %v1722_v7  ;;  %v2665_v48 = vmul.f32 1.442695, %v2645_v24  ;;  %v4506_v17 = vpop.eup %4505  ;;  %v1216_v41 = vadd.f32 %v1200_v26, %v8266_v30  ;;  %v1379_v15 = vpop.permute.xlu1 %1378  ;;  %v8270_v16 = vld [vmem:[#allocation59_spill] sm:$0xff]  ;;  %v8271_v26 = vld [vmem:[#allocation29_spill] sm:$0xff] }
 0x1b2   : > { %4248 = vmatpush3.bf16.msra.mxu1 %v4245_v3  ;;  %v2133_v60 = vadd.f32 %v2106_v57, %v2005_v44  ;;  %v2266_v0 = vmul.f32 0.6931472, %v4504_v58  ;;  %v2771_v14 = vadd.f32 1e-08, %v2755_v1  ;;  %v2040_v63 = vsub.f32 0.0, %v2024_v23  ;;  %v8272_v30 = vld [vmem:[#allocation16_spill] sm:$0xff] }
 0x1b3   : > { %v2200_v6 = vsub.f32 0.0, %v2184_v8  ;;  %v1858_v34 = vadd.f32 1.0, %v4506_v17  ;;  %v1415_v19 = vmul.f32 %v8267_v53, %v1379_v15  ;;  %v4508_v35 = vpop.eup %4507  ;;  %v8269_v28 = vsub.f32 0.0, %v8268_v4  ;;  %v8284_v18 = vld [vmem:[#allocation36_spill] sm:$0xff] }
 0x1b4   : > { %v6758_v7 = vadd.f32 %v8270_v16, %v1216_v41  ;;  %v2293_v24 = vadd.f32 %v2266_v0, %v2165_v2  ;;  %v2787_v3 = vsel %vm2499_vm6, %v6710_v27, %v2771_v14  ;;  %v2063_v44 = vmul.f32 1.442695, %v2040_v63  ;;  %v8274_v14 = vld [vmem:[#allocation12_spill] sm:$0xff] }
 0x1b5   : > { %v2166_v54 = vmax.f32 %v8269_v28, 0.0  ;;  %v2223_v58 = vmul.f32 1.442695, %v2200_v6  ;;  %4513 = vrcp.f32 %v1858_v34  ;;  %v1431_v57 = vmul.f32 %v1415_v19, %v8271_v26  ;;  %v8275_v6 = vld [vmem:[#allocation50_spill] sm:$0xff]  ;;  %v8276_v19 = vld [vmem:[#allocation4_spill] sm:$0xff] }
 0x1b6   : > { %v4510_v1 = vpop.eup %4509  ;;  %v2108_v23 = vmul.f32 0.6931472, %v4508_v35  ;;  %v6764_v8 = vsub.f32 %v2133_v60, %v2293_v24  ;;  %v6767_v17 = vadd.f32 %v2787_v3, %v6663_v42  ;;  %4515 = vpow2.f32 %v2665_v48  ;;  %v1605_v16 = vpop.permute.xlu1 %1604  ;;  %v8273_v42 = vld [vmem:[#allocation56_spill] sm:$0xff]  ;;  %v2856_v3 = vld [vmem:[%s7856_s1] sm:$0xff] }
 0x1b7   : > { %4517 = vpow2.f32 %v2063_v44  ;;  %v6770_v2 = vadd.f32 %v1431_v57, %v6632_v52  ;;  %v2268_v38 = vmul.f32 0.6931472, %v4510_v1  ;;  %v6774_v27 = vmul.f32 %v6283_v39, %v6718_v56  ;;  %v8277_v44 = vld [vmem:[#allocation60_spill] sm:$0xff]  ;;  %4121 = vmatprep.mubr.msk.f32.mxu1 %vm2864_vm7, %v2856_v3  ;;  %v8281_v3 = vld [vmem:[#allocation7_spill] sm:$0xff]  ;;  %v8288_v56 = vld [vmem:[#allocation42_spill] sm:$0xff] }
 0x1b8   : > { %4519 = vpow2.f32 %v2223_v58  ;;  %v1647_v41 = vmul.f32 %v8272_v30, %v1605_v16  ;;  %v2134_v15 = vadd.f32 %v2108_v23, %v2006_v45  ;;  %v2518_v60 = vmax.f32 %v6673_v12, 0.0 }
 0x1b9   : > { %v4512_v0 = vpop.eup %4511  ;;  %v744_v48 = vmul.f32 %v8274_v14, %v8273_v42  ;;  %v2294_v63 = vadd.f32 %v2268_v38, %v2166_v54  ;;  %v2341_v52 = vand.u32 2147483647, %v6764_v8  ;;  %v1780_v35 = vmul.f32 %v1764_v29, %v8276_v19 }
 0x1ba   : > { %v1663_v34 = vmul.f32 %v1647_v41, %v8275_v6  ;;  %v2694_v4 = vadd.f32 1.0, %v4512_v0  ;;  %v7988_v39 = vsub.f32 0.0, %v6774_v27  ;;  %v1609_v28 = vpop.permute.xlu1 %1608  ;;  %v2517_v54 = vmax.f32 %v6667_v13, 0.0  ;;  %v8278_v41 = vld [vmem:[#allocation52_spill] sm:$0xff] }
 0x1bb   : > { %v6784_v24 = vsub.f32 %v2134_v15, %v2294_v63  ;;  %v2357_v45 = vsub.f32 0.0, %v2341_v52  ;;  %v1648_v57 = vmul.f32 %v8272_v30, %v1609_v28  ;;  %v2534_v29 = vadd.f32 0.5, %v2518_v60  ;;  %v8279_v63 = vld [vmem:[#allocation35_spill] sm:$0xff] }
 0x1bc   : > { %v1679_v58 = vadd.f32 %v1663_v34, %v8277_v44  ;;  %4521 = vlog2.f32 %v2694_v4  ;;  %v767_v1 = vadd.f32 %v6681_v10, %v744_v48  ;;  %v2632_v0 = vand.u32 2147483647, %v7988_v39 }
 0x1bd   : > { %v2342_v23 = vand.u32 2147483647, %v6784_v24  ;;  %v2377_v16 = vmul.f32 1.442695, %v2357_v45  ;;  %v1664_v15 = vmul.f32 %v1648_v57, %v8278_v41  ;;  %v1420_v52 = vmul.f32 %v8267_v53, %v8279_v63 }
 0x1be   : > { %v6795_v38 = vadd.f32 %v1780_v35, %v1679_v58  ;;  %v2533_v60 = vadd.f32 0.5, %v2517_v54  ;;  %v2550_v4 = vadd.f32 1e-08, %v2534_v29  ;;  %v951_v45 = vadd.f32 %v6721_v55, %v767_v1  ;;  %v6823_v29 = vld [vmem:[%s7865_s10] ss:$0 sm:$0xff] }
 0x1bf   : > { %v4514_v14 = vpop.eup %4513  ;;  %v2358_v6 = vsub.f32 0.0, %v2342_v23  ;;  %4523 = vpow2.f32 %v2377_v16  ;;  %v6807_v19 = vadd.f32 %v1664_v15, %v6649_v46  ;;  %v1015_v35 = vpop.permute.xlu1 %1014  ;;  %v2648_v57 = vsub.f32 0.0, %v2632_v0 }
 0x1c0   : > { %v4516_v34 = vpop.eup %4515  ;;  %v6803_v10 = vmul.f32 %v4514_v14, %v6695_v5  ;;  %v3895_v48 = vmul.f32 -1.442695, %v6795_v38  ;;  %v1036_v44 = vmul.f32 %v8281_v3, %v1015_v35  ;;  %v6814_v5 = vld [vmem:[%s7864_s9] ss:$0 sm:$0xff]  ;;  %v2549_v35 = vadd.f32 1e-08, %v2533_v60 }
 0x1c1   : > { %v4518_v28 = vpop.eup %4517  ;;  %v2379_v58 = vmul.f32 1.442695, %v2358_v6  ;;  %v2693_v41 = vadd.f32 1.0, %v4516_v34  ;;  %v1730_v6 = vpop.permute.xlu0 %1729  ;;  %v8282_v34 = vld [vmem:[#allocation30_spill] sm:$0xff]  ;;  %vm2502_vm8 = vcmp.ge.f32.partialorder %v6673_v12, 0.0  ;;  %vm2501_vm9 = vcmp.ge.f32.partialorder %v6667_v13, 0.0 }
 0x1c2   : > { %8280 = vst [vmem:[#allocation8_spill] sm:$0xff] %v6803_v10  ;;  %v4520_v23 = vpop.eup %4519  ;;  %v2088_v54 = vadd.f32 1.0, %v4518_v28  ;;  %v6818_v46 = vmul.f32 %v6814_v5, %v6803_v10  ;;  %v6827_v55 = vmul.f32 %v6823_v29, %v6803_v10  ;;  %4525 = vpow2.f32 %v3895_v48 }
 0x1c3   : > { %v2248_v1 = vadd.f32 1.0, %v4520_v23  ;;  %v1052_v16 = vmul.f32 %v1036_v44, %v8204_v49  ;;  %4527 = vpow2.f32 %v2379_v58  ;;  %v2671_v44 = vmul.f32 1.442695, %v2648_v57  ;;  %v8283_v23 = vld [vmem:[#allocation23_spill] sm:$0xff] }
 0x1c4   : > { %v7991_v15 = vsub.f32 0.0, %v6818_v46  ;;  %v7990_v0 = vsub.f32 0.0, %v6827_v55  ;;  %4529 = vlog2.f32 %v2088_v54  ;;  %v1270_v63 = vpop.permute.xlu1 %1269  ;;  %v1436_v58 = vmul.f32 %v1420_v52, %v8282_v34  ;;  %v8285_v52 = vld [vmem:[#allocation20_spill] sm:$0xff] }
 0x1c5   : > { %v1068_v14 = vadd.f32 %v1052_v16, %v951_v45  ;;  %4531 = vlog2.f32 %v2248_v1  ;;  %v1300_v39 = vmul.f32 %v8283_v23, %v1270_v63  ;;  %v1766_v60 = vmul.f32 %v6417_v21, %v1730_v6  ;;  %v6843_v1 = vld [vmem:[%s7866_s11] ss:$0 sm:$0xff]  ;;  %v8286_v63 = vld [vmem:[#allocation63_spill] sm:$0xff] }
 0x1c6   : > { %v4522_v28 = vpop.eup %4521  ;;  %v2023_v3 = vand.u32 2147483647, %v7991_v15  ;;  %v2183_v48 = vand.u32 2147483647, %v7990_v0  ;;  %4533 = vlog2.f32 %v2550_v4  ;;  %v6847_v4 = vmul.f32 %v6843_v1, %v6803_v10  ;;  %v8287_v6 = vld [vmem:[#allocation11_spill] sm:$0xff] }
 0x1c7   : > { %v1218_v54 = vadd.f32 %v8284_v18, %v1068_v14  ;;  %4535 = vlog2.f32 %v2693_v41  ;;  %v1316_v0 = vmul.f32 %v1300_v39, %v8285_v52  ;;  %v2716_v18 = vmul.f32 0.6931472, %v4522_v28 }
 0x1c8   : > { %v2039_v45 = vsub.f32 0.0, %v2023_v3  ;;  %v2199_v16 = vsub.f32 0.0, %v2183_v48  ;;  %4537 = vlog2.f32 %v2549_v35  ;;  %v1782_v39 = vmul.f32 %v1766_v60, %v8288_v56 }
 0x1c9   : > { %v4524_v57 = vpop.eup %4523  ;;  %v1335_v23 = vadd.f32 %v8286_v63, %v1218_v54  ;;  %v1496_v3 = vpop.permute.xlu1 %1495  ;;  %4539 = vpow2.f32 %v2671_v44  ;;  %v6852_v48 = vadd.f32 %v1316_v0, %v8287_v6  ;;  %v8289_v54 = vsub.f32 0.0, %v6673_v12 }
 0x1ca   : > { %v2061_v41 = vmul.f32 1.442695, %v2039_v45  ;;  %v2221_v14 = vmul.f32 1.442695, %v2199_v16  ;;  %v2405_v21 = vadd.f32 1.0, %v4524_v57  ;;  %v1532_v15 = vmul.f32 %v6387_v32, %v1496_v3 }
 0x1cb   : > { %v6855_v33 = vadd.f32 %v1436_v58, %v1335_v23  ;;  %v2614_v28 = vmax.f32 %v8289_v54, 0.0  ;;  %v7995_v35 = vsub.f32 0.0, %v6847_v4  ;;  %v2520_v0 = vmax.f32 %v6774_v27, 0.0  ;;  %v8292_v54 = vld [vmem:[#allocation9_spill] sm:$0xff] }
 0x1cc   : > { %v4526_v10 = vpop.eup %4525  ;;  %4541 = vpow2.f32 %v2061_v41  ;;  %v1548_v44 = vmul.f32 %v1532_v15, %v8252_v62  ;;  %v8290_v32 = vsub.f32 0.0, %v6733_v47  ;;  %v8291_v47 = vsub.f32 0.0, %v6737_v25 }
 0x1cd   : > { %v4528_v45 = vpop.eup %4527  ;;  %4543 = vpow2.f32 %v2221_v14  ;;  %v1860_v16 = vadd.f32 1.0, %v4526_v10  ;;  %v1500_v63 = vpop.permute.xlu1 %1499  ;;  %v2742_v56 = vadd.f32 %v2716_v18, %v2614_v28  ;;  %v6869_v10 = vld [vmem:[%s7862_s7 + $0x6] ss:$0 sm:$0xff]  ;;  %v2631_v18 = vand.u32 2147483647, %v7995_v35 }
 0x1ce   : > { %v4530_v57 = vpop.eup %4529  ;;  %v2008_v58 = vmax.f32 %v8290_v32, 0.0  ;;  %v2406_v23 = vadd.f32 1.0, %v4528_v45  ;;  %4545 = vlog2.f32 %v2405_v21  ;;  %v1564_v41 = vadd.f32 %v1548_v44, %v6770_v2 }
 0x1cf   : > { %v4532_v60 = vpop.eup %4531  ;;  %4547 = vrcp.f32 %v1860_v16  ;;  %v1533_v62 = vmul.f32 %v6869_v10, %v1500_v63  ;;  %v2112_v15 = vmul.f32 0.6931472, %v4530_v57  ;;  %v2168_v3 = vmax.f32 %v8291_v47, 0.0 }
 0x1d0   : > { %v4534_v14 = vpop.eup %4533  ;;  %4549 = vlog2.f32 %v2406_v23  ;;  %v2272_v6 = vmul.f32 0.6931472, %v4532_v60  ;;  %v1681_v2 = vadd.f32 %v8292_v54, %v1564_v41  ;;  %v2536_v16 = vadd.f32 0.5, %v2520_v0 }
 0x1d1   : > { %v4536_v21 = vpop.eup %4535  ;;  %v1549_v28 = vmul.f32 %v1533_v62, %v8285_v52  ;;  %v2136_v45 = vadd.f32 %v2112_v15, %v2008_v58  ;;  %v8293_v44 = vrot.slane %v8204_v49, 1  ;;  %v8294_v57 = vrot.slane %v8256_v40, 1  ;;  %v6898_v15 = vld [vmem:[%s7862_s7 + $0x8] ss:$0 sm:$0xff] }
 0x1d2   : > { %v2296_v32 = vadd.f32 %v2272_v6, %v2168_v3  ;;  %v8295_v63 = vsub.f32 0.0, %v6667_v13  ;;  %v2714_v60 = vmul.f32 0.6931472, %v4536_v21  ;;  %v4538_v47 = vpop.eup %4537  ;;  %v6888_v35 = vadd.f32 %v1782_v39, %v1681_v2  ;;  %v1726_v0 = vpop.permute.xlu1 %1725 }
 0x1d3   : > { %v6884_v25 = vsel %vm1085_vm2, %v8294_v57, %v8293_v44  ;;  %v6891_v52 = vadd.f32 %v1549_v28, %v6644_v61  ;;  %v6893_v58 = vmul.f32 0.6931472, %v4534_v14  ;;  %v2758_v41 = vsub.f32 0.0, %v2742_v56  ;;  %v4540_v62 = vpop.eup %4539 }
 0x1d4   : > { %v2613_v23 = vmax.f32 %v8295_v63, 0.0  ;;  %v1765_v3 = vmul.f32 %v6898_v15, %v1726_v0  ;;  %v6901_v6 = vsub.f32 %v2136_v45, %v2296_v32  ;;  %v2647_v39 = vsub.f32 0.0, %v2631_v18 }
 0x1d5   : > { %v3897_v54 = vmul.f32 -1.442695, %v6888_v35  ;;  %v2325_v61 = vmax.f32 %v6764_v8, 0.0  ;;  %v2326_v14 = vmax.f32 %v6784_v24, 0.0  ;;  %v6906_v2 = vadd.f32 1e-08, %v2536_v16 }
 0x1d6   : > { %v2741_v21 = vadd.f32 %v2714_v60, %v2613_v23  ;;  %v4542_v56 = vpop.eup %4541  ;;  %v1781_v28 = vmul.f32 %v1765_v3, %v8271_v26  ;;  %v2344_v44 = vand.u32 2147483647, %v6901_v6  ;;  %v2570_v57 = vmul.f32 0.6931472, %v4538_v47 }
 0x1d7   : > { %v4544_v32 = vpop.eup %4543  ;;  %v2087_v63 = vadd.f32 1.0, %v4542_v56  ;;  %4551 = vpow2.f32 %v3897_v54  ;;  %v2774_v18 = vadd.f32 1e-08, %v2758_v41  ;;  %v2696_v23 = vadd.f32 1.0, %v4540_v62  ;;  %v1161_v37 = vpop.permute.xlu1 %1160 }
 0x1d8   : > { %v2757_v45 = vsub.f32 0.0, %v2741_v21  ;;  %v4546_v60 = vpop.eup %4545  ;;  %v2247_v0 = vadd.f32 1.0, %v4544_v32  ;;  %v6913_v16 = vadd.f32 %v1781_v28, %v6807_v19  ;;  %v2360_v26 = vsub.f32 0.0, %v2344_v44 }
 0x1d9   : > { %v2669_v3 = vmul.f32 1.442695, %v2647_v39  ;;  %v4548_v50 = vpop.eup %4547  ;;  %v1185_v36 = vmul.f32 %v6486_v9, %v1161_v37  ;;  %v2426_v47 = vmul.f32 0.6931472, %v4546_v60  ;;  %4553 = vlog2.f32 %v2087_v63  ;;  %v3283_v39 = vld [vmem:[%s7859_s4] sm:$0xff]  ;;  %v3284_v9 = vld [vmem:[%s7859_s4 + $0x8] sm:$0xff] }
 0x1da   : > { %v2773_v21 = vadd.f32 1e-08, %v2757_v45  ;;  %v4550_v56 = vpop.eup %4549  ;;  %v6917_v41 = vmul.f32 %v4548_v50, %v6795_v38  ;;  %v3896_v62 = vmul.f32 -1.442695, %v6913_v16  ;;  %4555 = vlog2.f32 %v2247_v0  ;;  %v3285_v37 = vld [vmem:[%s7859_s4 + $0x10] sm:$0xff] }
 0x1db   : > { %v2383_v54 = vmul.f32 1.442695, %v2360_v26  ;;  %v1201_v19 = vmul.f32 %v1185_v36, %v6884_v25  ;;  %v2428_v28 = vmul.f32 0.6931472, %v4550_v56  ;;  %v2453_v32 = vadd.f32 %v2426_v47, %v2325_v61  ;;  %v3286_v61 = vld [vmem:[%s7859_s4 + $0x18] sm:$0xff] }
 0x1dc   : > { %8296 = vst [vmem:[#allocation55_spill] sm:$0xff] %v6917_v41  ;;  %4557 = vlog2.f32 %v2696_v23  ;;  %v6932_v50 = vmul.f32 %v6814_v5, %v6917_v41  ;;  %v6936_v36 = vmul.f32 %v6823_v29, %v6917_v41  ;;  %v4273_v38 = vpack.c.bf16 %v3284_v9, %v3283_v39  ;;  %v1387_v45 = vpop.permute.xlu1 %1386 }
 0x1dd   : > { %4559 = vpow2.f32 %v3896_v62  ;;  %v6942_v44 = vadd.f32 %v1201_v19, %v6724_v31  ;;  %v2454_v63 = vadd.f32 %v2428_v28, %v2326_v14  ;;  %v2469_v23 = vsub.f32 0.0, %v2453_v32 }
 0x1de   : > { %4561 = vpow2.f32 %v2383_v54  ;;  %v1993_v60 = vsub.f32 0.0, %v6932_v50  ;;  %v2153_v0 = vsub.f32 0.0, %v6936_v36  ;;  %v1417_v26 = vmul.f32 %v8267_v53, %v1387_v45  ;;  %4274 = vmatprep.subr.bf16.mxu0 %v4273_v38 }
 0x1df   : > { %v4277_v47 = vpack.c.bf16 %v3286_v61, %v3285_v37  ;;  %v2470_v56 = vsub.f32 0.0, %v2454_v63  ;;  %4276 = vmatpush3.bf16.msra.mxu0 %v4273_v38  ;;  %v2790_v62 = vsel %vm2502_vm8, %v6893_v58, %v2774_v18  ;;  %v2485_v31 = vadd.f32 %v2469_v23, %v6764_v8 }
 0x1e0   : > { %4563 = vpow2.f32 %v2669_v3  ;;  %v2025_v14 = vand.u32 2147483647, %v1993_v60  ;;  %v2185_v54 = vand.u32 2147483647, %v2153_v0  ;;  %v2821_v19 = vadd.f32 1e-08, %v2469_v23  ;;  %v1391_v9 = vpop.permute.xlu1 %1390 }
 0x1e1   : > { %4278 = vmatprep.subr.bf16.mxu0 %v4277_v47  ;;  %v2789_v28 = vsel %vm2501_vm9, %v2570_v57, %v2773_v21  ;;  %v4552_v32 = vpop.eup %4551  ;;  %v1433_v39 = vmul.f32 %v1417_v26, %v8265_v43  ;;  %v2822_v12 = vadd.f32 1e-08, %v2470_v56  ;;  %v2486_v58 = vadd.f32 %v2470_v56, %v6784_v24 }
 0x1e2   : > { %v6959_v8 = vadd.f32 %v2789_v28, %v2485_v31  ;;  %v2041_v18 = vsub.f32 0.0, %v2025_v14  ;;  %v2201_v3 = vsub.f32 0.0, %v2185_v54  ;;  %v1862_v37 = vadd.f32 1.0, %v4552_v32  ;;  %v4872_v28 = vld [vmem:[%s5039_s24 + $0x8] sm:$0xff] }
 0x1e3   : > { %v1418_v38 = vmul.f32 %v8267_v53, %v1391_v9  ;;  %v4554_v61 = vpop.eup %4553  ;;  %v6963_v45 = vadd.f32 %v1433_v39, %v6852_v48  ;;  %v4249_v13 = vpack.c.bf16 %v2822_v12, %v2821_v19  ;;  %4280 = vmatpush3.bf16.msra.mxu0 %v4277_v47  ;;  %v6965_v57 = vadd.f32 %v2790_v62, %v2486_v58  ;;  %v4873_v9 = vld [vmem:[%s5039_s24 + $0x10] sm:$0xff] }
 0x1e4   : > { %v4556_v21 = vpop.eup %4555  ;;  %v2065_v63 = vmul.f32 1.442695, %v2041_v18  ;;  %v2225_v23 = vmul.f32 1.442695, %v2201_v3  ;;  %4565 = vrcp.f32 %v1862_v37  ;;  %v8297_v56 = vsub.f32 0.0, %v6818_v46  ;;  %v8299_v18 = vld [vmem:[#allocation54_spill] sm:$0xff] }
 0x1e5   : > { %v1434_v24 = vmul.f32 %v1418_v38, %v6884_v25  ;;  %4250 = vmatprep.subr.bf16.mxu1 %v4249_v13  ;;  %v2110_v53 = vmul.f32 0.6931472, %v4554_v61  ;;  %v2270_v14 = vmul.f32 0.6931472, %v4556_v21  ;;  %4567 = vlog2.f32 %v6906_v2  ;;  %v1617_v19 = vpop.permute.xlu1 %1616  ;;  %v4874_v38 = vld [vmem:[%s5039_s24 + $0x18] sm:$0xff] }
 0x1e6   : > { %v4558_v26 = vpop.eup %4557  ;;  %v2007_v31 = vmax.f32 %v8297_v56, 0.0  ;;  %v8298_v47 = vsub.f32 0.0, %v6827_v55  ;;  %4569 = vpow2.f32 %v2065_v63  ;;  %4252 = vmatpush3.bf16.msra.mxu1 %v4249_v13  ;;  %4170 = vmatmul.mubr.msk.f32.vlgmr.msra.gmra.mrb[16].mxu0 %vm530_vm0, %v4872_v28  ;;  %v2519_v46 = vmax.f32 %v6847_v4, 0.0  ;;  %v4875_v13 = vld [vmem:[%s5039_s24 + $0x20] sm:$0xff] }
 0x1e7   : > { %v4560_v48 = vpop.eup %4559  ;;  %v6974_v54 = vadd.f32 %v1434_v24, %v6758_v7  ;;  %4571 = vpow2.f32 %v2225_v23  ;;  %v1650_v2 = vmul.f32 %v8272_v30, %v1617_v19  ;;  %4172 = vmatprep.mubr.msk.f32.mxu0 %vm530_vm0, %v4873_v9  ;;  %v2720_v21 = vmul.f32 0.6931472, %v4558_v26  ;;  %v4876_v23 = vld [vmem:[%s7862_s7 + $0x3] ss:$0 sm:$0xff] }
 0x1e8   : > { %v2167_v62 = vmax.f32 %v8298_v47, 0.0  ;;  %v4562_v32 = vpop.eup %4561  ;;  %v1861_v39 = vadd.f32 1.0, %v4560_v48  ;;  %v2135_v55 = vadd.f32 %v2110_v53, %v2007_v31  ;;  %v2535_v63 = vadd.f32 0.5, %v2519_v46  ;;  %v4878_v46 = vld [vmem:[%s5039_s24 + $0x30] sm:$0xff] }
 0x1e9   : > { %v2408_v12 = vadd.f32 1.0, %v4562_v32  ;;  %v1666_v3 = vmul.f32 %v1650_v2, %v8299_v18  ;;  %v6998_v53 = vmul.f32 %v6843_v1, %v6917_v41  ;;  %vm2504_vm10 = vcmp.ge.f32.partialorder %v6774_v27, 0.0 }
 0x1ea   : > { %v2295_v7 = vadd.f32 %v2270_v14, %v2167_v62  ;;  %v4564_v58 = vpop.eup %4563  ;;  %4573 = vrcp.f32 %v1861_v39  ;;  %4173 = vmatmul.mubr.msk.f32.gmra.mrb[18].mxu0 %vm530_vm0, %v4874_v38  ;;  %v1278_v30 = vpop.permute.xlu1 %1277  ;;  %v4877_v62 = vld [vmem:[%s5039_s24 + $0x28] sm:$0xff]  ;;  %v2551_v39 = vadd.f32 1e-08, %v2535_v63  ;;  %vm2503_vm11 = vcmp.ge.f32.partialorder %v6847_v4, 0.0 }
 0x1eb   : > { %4575 = vlog2.f32 %v2408_v12  ;;  %v6988_v61 = vadd.f32 %v1666_v3, %v6891_v52  ;;  %4175 = vmatprep.mubr.msk.f32.mxu0 %vm530_vm0, %v4875_v13  ;;  %v1302_v24 = vmul.f32 %v4876_v23, %v1278_v30  ;;  %v2695_v31 = vadd.f32 1.0, %v4564_v58  ;;  %v4879_v30 = vld [vmem:[%s5039_s24 + $0x38] sm:$0xff] }
 0x1ec   : > { %v6983_v37 = vsub.f32 %v2135_v55, %v2295_v7  ;;  %v8300_v52 = vsub.f32 0.0, %v6774_v27  ;;  %v8003_v12 = vsub.f32 0.0, %v6998_v53  ;;  %vm2505_vm12 = vcmp.ge.f32.partialorder %v6998_v53, 0.0 }
 0x1ed   : > { %v1318_v47 = vmul.f32 %v1302_v24, %v6691_v22  ;;  %4577 = vlog2.f32 %v2695_v31  ;;  %v4880_v24 = vld [vmem:[%s5039_s24 + $0x40] sm:$0xff] }
 0x1ee   : > { %v2343_v56 = vand.u32 2147483647, %v6983_v37  ;;  %v2616_v14 = vmax.f32 %v8300_v52, 0.0  ;;  %v4566_v48 = vpop.eup %4565  ;;  %4176 = vmatmul.mubr.msk.f32.gmra.mrb[20].mxu0 %vm530_vm0, %v4877_v62 }
 0x1ef   : > { %v4568_v19 = vpop.eup %4567  ;;  %v7006_v28 = vmul.f32 %v4566_v48, %v6888_v35  ;;  %4178 = vmatprep.mubr.msk.f32.mxu0 %vm530_vm0, %v4878_v46  ;;  %v7011_v55 = vadd.f32 %v1318_v47, %v6942_v44  ;;  %v1504_v9 = vpop.permute.xlu1 %1503 }
 0x1f0   : > { %v2359_v26 = vsub.f32 0.0, %v2343_v56  ;;  %v2744_v32 = vadd.f32 %v2720_v21, %v2616_v14  ;;  %v4570_v2 = vpop.eup %4569  ;;  %v1534_v38 = vmul.f32 %v6869_v10, %v1504_v9  ;;  %v2576_v14 = vmul.f32 0.6931472, %v4568_v19 }
 0x1f1   : > { %8301 = vst [vmem:[#allocation14_spill] sm:$0xff] %v7006_v28  ;;  %v4572_v58 = vpop.eup %4571  ;;  %v2089_v18 = vadd.f32 1.0, %v4570_v2  ;;  %v7016_v35 = vmul.f32 %v6814_v5, %v7006_v28  ;;  %v7020_v3 = vmul.f32 %v6823_v29, %v7006_v28  ;;  %v2328_v9 = vmax.f32 %v6901_v6, 0.0 }
 0x1f2   : > { %v2381_v7 = vmul.f32 1.442695, %v2359_v26  ;;  %v2249_v44 = vadd.f32 1.0, %v4572_v58  ;;  %4179 = vmatmul.mubr.msk.f32.gmra.mrb[22].mxu0 %vm530_vm0, %v4879_v30  ;;  %v1550_v23 = vmul.f32 %v1534_v38, %v8260_v59  ;;  %v2760_v48 = vsub.f32 0.0, %v2744_v32  ;;  %v4881_v32 = vld [vmem:[%s5039_s24 + $0x48] sm:$0xff]  ;;  %v4882_v58 = vld [vmem:[%s5039_s24 + $0x50] sm:$0xff] }
 0x1f3   : > { %v1995_v21 = vsub.f32 0.0, %v7016_v35  ;;  %v8004_v63 = vsub.f32 0.0, %v7020_v3  ;;  %4181 = vmatprep.mubr.msk.f32.mxu0 %vm530_vm0, %v4880_v24  ;;  %v1508_v52 = vpop.permute.xlu1 %1507  ;;  %v2633_v26 = vand.u32 2147483647, %v8003_v12 }
 0x1f4   : > { %4579 = vpow2.f32 %v2381_v7  ;;  %v4574_v13 = vpop.eup %4573  ;;  %v7049_v19 = vadd.f32 %v1550_v23, %v6963_v45  ;;  %v1535_v46 = vmul.f32 %v6869_v10, %v1508_v52 }
 0x1f5   : > { %4581 = vlog2.f32 %v2089_v18  ;;  %v4576_v56 = vpop.eup %4575  ;;  %v7032_v31 = vmul.f32 %v4574_v13, %v6913_v16  ;;  %v2027_v47 = vand.u32 2147483647, %v1995_v21  ;;  %v2187_v59 = vand.u32 2147483647, %v8004_v63 }
 0x1f6   : > { %4583 = vlog2.f32 %v2249_v44  ;;  %4182 = vmatmul.mubr.msk.f32.gmra.mrb[24].mxu0 %vm530_vm0, %v4881_v32  ;;  %v2432_v7 = vmul.f32 0.6931472, %v4576_v56  ;;  %v1551_v45 = vmul.f32 %v1535_v46, %v6691_v22  ;;  %v2776_v44 = vadd.f32 1e-08, %v2760_v48  ;;  %v4883_v48 = vld [vmem:[%s5039_s24 + $0x58] sm:$0xff] }
 0x1f7   : > { %8302 = vst [vmem:[#allocation58_spill] sm:$0xff] %v7032_v31  ;;  %4585 = vlog2.f32 %v2551_v39  ;;  %v7042_v62 = vmul.f32 %v6814_v5, %v7032_v31  ;;  %v7046_v16 = vmul.f32 %v6823_v29, %v7032_v31  ;;  %v2043_v39 = vsub.f32 0.0, %v2027_v47  ;;  %4184 = vmatprep.mubr.msk.f32.mxu0 %vm530_vm0, %v4882_v58  ;;  %v4578_v47 = vpop.eup %4577 }
 0x1f8   : > { %v2203_v2 = vsub.f32 0.0, %v2187_v59  ;;  %v1734_v23 = vpop.permute.xlu1 %1733  ;;  %v7060_v24 = vadd.f32 %v2432_v7, %v2328_v9  ;;  %v2649_v52 = vsub.f32 0.0, %v2633_v26  ;;  %v2009_v56 = vmax.f32 %v1993_v60, 0.0  ;;  %v4884_v60 = vld [vmem:[%s5039_s24 + $0x60] sm:$0xff] }
 0x1f9   : > { %v8002_v18 = vsub.f32 0.0, %v7042_v62  ;;  %v8000_v38 = vsub.f32 0.0, %v7046_v16  ;;  %v2069_v30 = vmul.f32 1.442695, %v2043_v39  ;;  %v2169_v59 = vmax.f32 %v2153_v0, 0.0 }
 0x1fa   : > { %v2229_v13 = vmul.f32 1.442695, %v2203_v2  ;;  %4185 = vmatmul.mubr.msk.f32.gmra.mrb[26].mxu0 %vm530_vm0, %v4883_v48  ;;  %v7073_v46 = vadd.f32 %v1551_v45, %v6974_v54  ;;  %v1767_v26 = vmul.f32 %v6898_v15, %v1734_v23  ;;  %v2472_v50 = vsub.f32 0.0, %v7060_v24 }
 0x1fb   : > { %v2026_v32 = vand.u32 2147483647, %v8002_v18  ;;  %v2186_v22 = vand.u32 2147483647, %v8000_v38  ;;  %4587 = vpow2.f32 %v2069_v30  ;;  %4187 = vmatprep.mubr.msk.f32.mxu0 %vm530_vm0, %v4884_v60  ;;  %v2792_v2 = vsel %vm2504_vm10, %v2576_v14, %v2776_v44  ;;  %v1742_v60 = vpop.permute.xlu0 %1741  ;;  %v4886_v14 = vld [vmem:[%s7862_s7 + $0x5] ss:$0 sm:$0xff] }
 0x1fc   : > { %4589 = vpow2.f32 %v2229_v13  ;;  %v1783_v7 = vmul.f32 %v1767_v26, %v8265_v43  ;;  %v2488_v58 = vadd.f32 %v2472_v50, %v6901_v6  ;;  %v2673_v45 = vmul.f32 1.442695, %v2649_v52  ;;  %v4887_v26 = vld [vmem:[%s5039_s24 + $0x70] sm:$0xff]  ;;  %v4888_v38 = vld [vmem:[%s5039_s24 + $0x78] sm:$0xff] }
 0x1fd   : > { %v2042_v0 = vsub.f32 0.0, %v2026_v32  ;;  %v2202_v39 = vsub.f32 0.0, %v2186_v22  ;;  %v1395_v13 = vpop.permute.xlu1 %1394  ;;  %v4885_v22 = vld [vmem:[%s5039_s24 + $0x68] sm:$0xff]  ;;  %v7089_v27 = vmul.f32 %v6843_v1, %v7032_v31 }
 0x1fe   : > { %v4580_v36 = vpop.eup %4579  ;;  %4188 = vmatmul.mubr.msk.f32.gmra.mrb[28].mxu0 %vm530_vm0, %v4885_v22  ;;  %v7094_v6 = vadd.f32 %v1783_v7, %v6988_v61  ;;  %v1419_v44 = vmul.f32 %v4886_v14, %v1395_v13  ;;  %v8303_v61 = vld [vmem:[#allocation47_spill] sm:$0xff]  ;;  %v8305_v13 = vld [vmem:[#allocation22_spill] sm:$0xff]  ;;  %v7125_v14 = vmul.f32 %v6843_v1, %v7006_v28 }
 0x1ff   : > { %v4582_v9 = vpop.eup %4581  ;;  %v2407_v54 = vadd.f32 1.0, %v4580_v36  ;;  %v2067_v23 = vmul.f32 1.442695, %v2042_v0  ;;  %v2227_v48 = vmul.f32 1.442695, %v2202_v39  ;;  %4190 = vmatprep.mubr.msk.f32.mxu0 %vm530_vm0, %v4887_v26  ;;  %v7101_v0 = vadd.f32 %v2792_v2, %v2488_v58  ;;  %v1746_v58 = vpop.permute.xlu0 %1745 }
 0x200   : > { %v4584_v30 = vpop.eup %4583  ;;  %v2114_v32 = vmul.f32 0.6931472, %v4582_v9  ;;  %v2718_v39 = vmul.f32 0.6931472, %v4578_v47  ;;  %v3898_v9 = vmul.f32 -1.442695, %v7094_v6  ;;  %v1435_v7 = vmul.f32 %v1419_v44, %v8303_v61 }
 0x201   : > { %v7091_v43 = vpop.eup %4585  ;;  %4591 = vlog2.f32 %v2407_v54  ;;  %v2274_v52 = vmul.f32 0.6931472, %v4584_v30  ;;  %v8304_v54 = vsub.f32 0.0, %v6847_v4  ;;  %v8001_v47 = vsub.f32 0.0, %v7089_v27 }
 0x202   : > { %4593 = vpow2.f32 %v2067_v23  ;;  %v2137_v36 = vadd.f32 %v2114_v32, %v2009_v56  ;;  %4191 = vmatmul.mubr.msk.f32.gmra.mrb[30].mxu0 %vm530_vm0, %v4888_v38  ;;  %v1451_v23 = vadd.f32 %v1435_v7, %v7011_v55  ;;  %v1621_v56 = vpop.permute.xlu1 %1620  ;;  %v1769_v26 = vmul.f32 %v6898_v15, %v1742_v60 }
 0x203   : > { %4595 = vpow2.f32 %v2227_v48  ;;  %v2297_v22 = vadd.f32 %v2274_v52, %v2169_v59  ;;  %v2615_v30 = vmax.f32 %v8304_v54, 0.0  ;;  %v7116_v59 = vld [vmem:[%s7862_s7 + $0x7] ss:$0 sm:$0xff]  ;;  %v7130_v7 = vmul.f32 %v6898_v15, %v1746_v58 }
 0x204   : > { %4597 = vpow2.f32 %v2673_v45  ;;  %v1651_v38 = vmul.f32 %v7116_v59, %v1621_v56  ;;  %v7120_v32 = vadd.f32 %v8305_v13, %v1451_v23  ;;  %v2634_v23 = vand.u32 2147483647, %v8001_v47 }
 0x205   : > { %4599 = vpow2.f32 %v3898_v9  ;;  %v7110_v2 = vsub.f32 %v2137_v36, %v2297_v22  ;;  %v4588_v48 = vpop.eup %4587  ;;  %v2743_v55 = vadd.f32 %v2718_v39, %v2615_v30  ;;  %v2521_v56 = vmax.f32 %v6998_v53, 0.0 }
 0x206   : > { %v4590_v44 = vpop.eup %4589  ;;  %v2091_v52 = vadd.f32 1.0, %v4588_v48  ;;  %v1667_v36 = vmul.f32 %v1651_v38, %v8256_v40  ;;  %v1625_v22 = vpop.permute.xlu1 %1624  ;;  %v2603_v58 = vsub.f32 0.0, %v7125_v14  ;;  %v1785_v13 = vmul.f32 %v1769_v26, %v8303_v61 }
 0x207   : > { %v2345_v45 = vand.u32 2147483647, %v7110_v2  ;;  %v2251_v9 = vadd.f32 1.0, %v4590_v44  ;;  %v1652_v30 = vmul.f32 %v7116_v59, %v1625_v22  ;;  %v2759_v40 = vsub.f32 0.0, %v2743_v55 }
 0x208   : > { %v7135_v39 = vadd.f32 %v1667_v36, %v7049_v19  ;;  %4601 = vlog2.f32 %v2091_v52  ;;  %v2327_v44 = vmax.f32 %v6983_v37, 0.0  ;;  %v2650_v52 = vsub.f32 0.0, %v2634_v23 }
 0x209   : > { %v2361_v54 = vsub.f32 0.0, %v2345_v45  ;;  %4603 = vlog2.f32 %v2251_v9  ;;  %v1668_v45 = vmul.f32 %v1652_v30, %v8204_v49  ;;  %v2537_v12 = vadd.f32 0.5, %v2521_v56 }
 0x20a   : > { %v2775_v61 = vadd.f32 1e-08, %v2759_v40  ;;  %v2635_v26 = vand.u32 2147483647, %v2603_v58  ;;  %v2824_v23 = vadd.f32 1e-08, %v2472_v50 }
 0x20b   : > { %v4592_v60 = vpop.eup %4591  ;;  %v2385_v48 = vmul.f32 1.442695, %v2361_v54  ;;  %v1684_v55 = vadd.f32 %v1668_v45, %v7073_v46  ;;  %v1516_v9 = vpop.permute.xlu1 %1515  ;;  %v2574_v46 = vmul.f32 0.6931472, %v7091_v43  ;;  %v2553_v45 = vadd.f32 1e-08, %v2537_v12 }
 0x20c   : > { %v4594_v38 = vpop.eup %4593  ;;  %v2430_v19 = vmul.f32 0.6931472, %v4592_v60  ;;  %v2651_v24 = vsub.f32 0.0, %v2635_v26  ;;  %v2522_v35 = vmax.f32 %v7089_v27, 0.0  ;;  %vm2506_vm13 = vcmp.ge.f32.partialorder %v7089_v27, 0.0 }
 0x20d   : > { %v4596_v36 = vpop.eup %4595  ;;  %v2090_v47 = vadd.f32 1.0, %v4594_v38  ;;  %4605 = vpow2.f32 %v2385_v48  ;;  %v7147_v60 = vadd.f32 %v1785_v13, %v1684_v55  ;;  %v2675_v38 = vmul.f32 1.442695, %v2650_v52 }
 0x20e   : > { %v4598_v22 = vpop.eup %4597  ;;  %v2250_v54 = vadd.f32 1.0, %v4596_v36  ;;  %v2455_v18 = vadd.f32 %v2430_v19, %v2327_v44  ;;  %v1537_v52 = vmul.f32 %v6869_v10, %v1516_v9  ;;  %v1786_v55 = vmul.f32 %v7130_v7, %v8282_v34  ;;  %v7171_v10 = vld [vmem:[%s7856_s1 + $0x8] sm:$0xff] }
 0x20f   : > { %v4600_v63 = vpop.eup %4599  ;;  %4607 = vlog2.f32 %v2090_v47  ;;  %v2697_v49 = vadd.f32 1.0, %v4598_v22  ;;  %v3900_v47 = vmul.f32 -1.442695, %v7147_v60  ;;  %vm2507_vm14 = vcmp.ge.f32.partialorder %v7125_v14, 0.0 }
 0x210   : > { %v1863_v30 = vadd.f32 1.0, %v4600_v63  ;;  %v2471_v48 = vsub.f32 0.0, %v2455_v18  ;;  %4609 = vlog2.f32 %v2250_v54  ;;  %v2011_v63 = vmax.f32 %v1995_v21, 0.0  ;;  %v1738_v13 = vpop.permute.xlu1 %1737 }
 0x211   : > { %4611 = vlog2.f32 %v2697_v49  ;;  %v2791_v18 = vsel %vm2503_vm11, %v2574_v46, %v2775_v61  ;;  %v1768_v43 = vmul.f32 %v6898_v15, %v1738_v13  ;;  %v8306_v21 = vsub.f32 0.0, %v7020_v3 }
 0x212   : > { %4613 = vrcp.f32 %v1863_v30  ;;  %v2823_v56 = vadd.f32 1e-08, %v2471_v48  ;;  %v2487_v40 = vadd.f32 %v2471_v48, %v6983_v37  ;;  %v4602_v50 = vpop.eup %4601  ;;  %v8307_v61 = vsub.f32 0.0, %v6998_v53  ;;  %v7181_v30 = vld [vmem:[%s7856_s1 + $0x10] sm:$0xff] }
 0x213   : > { %4615 = vpow2.f32 %v3900_v47  ;;  %v4604_v36 = vpop.eup %4603  ;;  %v2118_v37 = vmul.f32 0.6931472, %v4602_v50  ;;  %v2171_v4 = vmax.f32 %v8306_v21, 0.0  ;;  %v1784_v12 = vmul.f32 %v1768_v43, %v6884_v25  ;;  %v7200_v43 = vld [vmem:[%s7856_s1 + $0x18] sm:$0xff] }
 0x214   : > { %v4253_v44 = vpack.c.bf16 %v2824_v23, %v2823_v56  ;;  %v7159_v19 = vadd.f32 %v2791_v18, %v2487_v40  ;;  %4617 = vpow2.f32 %v2675_v38  ;;  %v2278_v22 = vmul.f32 0.6931472, %v4604_v36  ;;  %v8309_v38 = vld [vmem:[#allocation62_spill] sm:$0xff] }
 0x215   : > { %v2139_v9 = vadd.f32 %v2118_v37, %v2011_v63  ;;  %v2617_v49 = vmax.f32 %v8307_v61, 0.0  ;;  %v2677_v3 = vmul.f32 1.442695, %v2651_v24  ;;  %v7176_v26 = vadd.f32 %v1784_v12, %v7135_v39  ;;  %v1629_v25 = vpop.permute.xlu1 %1628 }
 0x216   : > { %4254 = vmatprep.subr.bf16.mxu1 %v4253_v44  ;;  %v2299_v7 = vadd.f32 %v2278_v22, %v2171_v4  ;;  %4619 = vlog2.f32 %v2553_v45  ;;  %v8308_v23 = vsub.f32 0.0, %v7042_v62  ;;  %v1553_v47 = vmul.f32 %v1537_v52, %v8309_v38 }
 0x217   : > { %v4606_v54 = vpop.eup %4605  ;;  %4256 = vmatpush3.bf16.msra.mxu1 %v4253_v44  ;;  %v1653_v56 = vmul.f32 %v7116_v59, %v1629_v25  ;;  %v2538_v40 = vadd.f32 0.5, %v2522_v35  ;;  %v3899_v63 = vmul.f32 -1.442695, %v7176_v26  ;;  %v8310_v24 = vsub.f32 0.0, %v7046_v16  ;;  %v7205_v16 = vld [vmem:[%s7856_s1 + $0x20] sm:$0xff] }
 0x218   : > { %v2409_v34 = vadd.f32 1.0, %v4606_v54  ;;  %v2010_v46 = vmax.f32 %v8308_v23, 0.0  ;;  %v7190_v18 = vsub.f32 %v2139_v9, %v2299_v7  ;;  %v2523_v35 = vmax.f32 %v7125_v14, 0.0 }
 0x219   : > { %v4608_v48 = vpop.eup %4607  ;;  %v2170_v62 = vmax.f32 %v8310_v24, 0.0  ;;  %v1669_v50 = vmul.f32 %v1653_v56, %v8273_v42  ;;  %v1633_v52 = vpop.permute.xlu1 %1632  ;;  %v1569_v9 = vadd.f32 %v1553_v47, %v6855_v33  ;;  %v7232_v33 = vld [vmem:[%s7856_s1 + $0x28] sm:$0xff] }
 0x21a   : > { %v4610_v39 = vpop.eup %4609  ;;  %4122 = vmatmul.mubr.msk.f32.vlgmr.msra.gmra.mrb[0].mxu1 %vm2864_vm7, %v7171_v10  ;;  %v2116_v13 = vmul.f32 0.6931472, %v4608_v48  ;;  %4621 = vlog2.f32 %v2409_v34  ;;  %v2347_v42 = vand.u32 2147483647, %v7190_v18  ;;  %v1654_v12 = vmul.f32 %v7116_v59, %v1633_v52  ;;  %v8312_v48 = vld [vmem:[#allocation31_spill] sm:$0xff] }
 0x21b   : > { %v4612_v45 = vpop.eup %4611  ;;  %4124 = vmatprep.mubr.msk.f32.mxu1 %vm2864_vm7, %v7181_v30  ;;  %v2276_v44 = vmul.f32 0.6931472, %v4610_v39  ;;  %4623 = vpow2.f32 %v2677_v3  ;;  %v1685_v4 = vadd.f32 %v1669_v50, %v7120_v32  ;;  %v2554_v3 = vadd.f32 1e-08, %v2538_v40 }
 0x21c   : > { %v4614_v36 = vpop.eup %4613  ;;  %4625 = vpow2.f32 %v3899_v63  ;;  %v2138_v37 = vadd.f32 %v2116_v13, %v2010_v46  ;;  %v2363_v61 = vsub.f32 0.0, %v2347_v42  ;;  %v2722_v25 = vmul.f32 0.6931472, %v4612_v45 }
 0x21d   : > { %v7210_v21 = vmul.f32 %v4614_v36, %v7094_v6  ;;  %v2298_v22 = vadd.f32 %v2276_v44, %v2170_v62  ;;  %v4616_v54 = vpop.eup %4615  ;;  %v7225_v32 = vadd.f32 %v1786_v55, %v1685_v4  ;;  %v1670_v23 = vmul.f32 %v1654_v12, %v8312_v48  ;;  %v7259_v44 = vld [vmem:[%s7856_s1 + $0x38] sm:$0xff]  ;;  %v8313_v36 = vld [vmem:[#allocation32_spill] sm:$0xff] }
 0x21e   : > { %4125 = vmatmul.mubr.msk.f32.gmra.mrb[2].mxu1 %vm2864_vm7, %v7200_v43  ;;  %v4618_v34 = vpop.eup %4617  ;;  %v1865_v59 = vadd.f32 1.0, %v4616_v54  ;;  %v2389_v46 = vmul.f32 1.442695, %v2363_v61  ;;  %v2745_v55 = vadd.f32 %v2722_v25, %v2617_v49  ;;  %v1750_v40 = vpop.permute.xlu1 %1749  ;;  %v2329_v13 = vmax.f32 %v7110_v2, 0.0 }
 0x21f   : > { %8311 = vst [vmem:[#allocation43_spill] sm:$0xff] %v7210_v21  ;;  %v7219_v7 = vmul.f32 %v6814_v5, %v7210_v21  ;;  %v7223_v6 = vmul.f32 %v6823_v29, %v7210_v21  ;;  %4127 = vmatprep.mubr.msk.f32.mxu1 %vm2864_vm7, %v7205_v16  ;;  %v7238_v5 = vld [vmem:[%s7856_s1 + $0x30] sm:$0xff]  ;;  %v7240_v29 = vsub.f32 %v2138_v37, %v2298_v22  ;;  %v3901_v56 = vmul.f32 -1.442695, %v7225_v32 }
 0x220   : > { %4627 = vrcp.f32 %v1865_v59  ;;  %v4620_v39 = vpop.eup %4619  ;;  %v1771_v63 = vmul.f32 %v6898_v15, %v1750_v40  ;;  %v2698_v24 = vadd.f32 1.0, %v4618_v34  ;;  %v1686_v50 = vadd.f32 %v1670_v23, %v1569_v9 }
 0x221   : > { %v1996_v38 = vsub.f32 0.0, %v7219_v7  ;;  %v2156_v47 = vsub.f32 0.0, %v7223_v6  ;;  %v2346_v45 = vand.u32 2147483647, %v7240_v29  ;;  %4629 = vlog2.f32 %v2554_v3 }
 0x222   : > { %4128 = vmatmul.mubr.msk.f32.gmra.mrb[4].mxu1 %vm2864_vm7, %v7232_v33  ;;  %4631 = vpow2.f32 %v3901_v56  ;;  %v1787_v52 = vmul.f32 %v1771_v63, %v8313_v36  ;;  %v2761_v42 = vsub.f32 0.0, %v2745_v55  ;;  %v2539_v3 = vadd.f32 0.5, %v2523_v35  ;;  %v4890_v55 = vld [vmem:[%s7856_s1] sm:$0xff] }
 0x223   : > { %v2028_v49 = vand.u32 2147483647, %v1996_v38  ;;  %v2188_v62 = vand.u32 2147483647, %v2156_v47  ;;  %4130 = vmatprep.mubr.msk.f32.mxu1 %vm2864_vm7, %v7238_v5  ;;  %v2362_v37 = vsub.f32 0.0, %v2346_v45  ;;  %4633 = vpow2.f32 %v2389_v46 }
 0x224   : > { %v4622_v15 = vpop.eup %4621  ;;  %v7262_v61 = vadd.f32 %v1787_v52, %v1686_v50  ;;  %4635 = vlog2.f32 %v2698_v24  ;;  %v2777_v56 = vadd.f32 1e-08, %v2761_v42  ;;  %v7276_v35 = vmul.f32 %v6843_v1, %v7210_v21 }
 0x225   : > { %v4624_v4 = vpop.eup %4623  ;;  %v2044_v12 = vsub.f32 0.0, %v2028_v49  ;;  %v2204_v22 = vsub.f32 0.0, %v2188_v62  ;;  %v2434_v54 = vmul.f32 0.6931472, %v4622_v15  ;;  %v2387_v25 = vmul.f32 1.442695, %v2362_v37 }
 0x226   : > { %v4626_v9 = vpop.eup %4625  ;;  %4131 = vmatmul.mubr.msk.f32.gmra.mrb[6].mxu1 %vm2864_vm7, %v7259_v44  ;;  %v3902_v46 = vmul.f32 -1.442695, %v7262_v61  ;;  %v2699_v63 = vadd.f32 1.0, %v4624_v4  ;;  %v2555_v45 = vadd.f32 1e-08, %v2539_v3  ;;  %v8005_v52 = vsub.f32 0.0, %v7276_v35 }
 0x227   : > { %v2071_v34 = vmul.f32 1.442695, %v2044_v12  ;;  %v2231_v59 = vmul.f32 1.442695, %v2204_v22  ;;  %v1864_v48 = vadd.f32 1.0, %v4626_v9  ;;  %v7266_v23 = vadd.f32 %v2434_v54, %v2329_v13  ;;  %4149 = vmatprep.mubr.msk.f32.mxu1 %vm2864_vm7, %v4890_v55 }
 0x228   : > { %4637 = vpow2.f32 %v2387_v25  ;;  %v2578_v13 = vmul.f32 0.6931472, %v4620_v39  ;;  %v7291_v37 = vld [vmem:[%s7864_s9] ss:$0 sm:$0xff]  ;;  %v2636_v25 = vand.u32 2147483647, %v8005_v52 }
 0x229   : > { %4639 = vpow2.f32 %v2071_v34  ;;  %v2473_v40 = vsub.f32 0.0, %v7266_v23  ;;  %vm2508_vm15 = vcmp.ge.f32.partialorder %v7276_v35, 0.0 }
 0x22a   : > { %4641 = vpow2.f32 %v2231_v59  ;;  %v4628_v24 = vpop.eup %4627  ;;  %v2793_v50 = vsel %vm2505_vm12, %v2578_v13, %v2777_v56 }
 0x22b   : > { %4643 = vrcp.f32 %v1864_v48  ;;  %v2489_v49 = vadd.f32 %v2473_v40, %v7110_v2  ;;  %v7283_v62 = vmul.f32 %v4628_v24, %v7147_v60  ;;  %v4630_v15 = vpop.eup %4629  ;;  %v7300_v2 = vld [vmem:[%s7865_s10] ss:$0 sm:$0xff]  ;;  %v2825_v7 = vadd.f32 1e-08, %v2473_v40 }
 0x22c   : > { %4645 = vpow2.f32 %v3902_v46  ;;  %v4632_v39 = vpop.eup %4631 }
 0x22d   : > { %8314 = vst [vmem:[#allocation48_spill] sm:$0xff] %v7283_v62  ;;  %v7285_v36 = vadd.f32 %v2793_v50, %v2489_v49  ;;  %4647 = vlog2.f32 %v2699_v63  ;;  %v7295_v53 = vmul.f32 %v7291_v37, %v7283_v62  ;;  %v7304_v60 = vmul.f32 %v7300_v2, %v7283_v62  ;;  %v4634_v42 = vpop.eup %4633 }
 0x22e   : > { %4649 = vlog2.f32 %v2555_v45  ;;  %v1866_v4 = vadd.f32 1.0, %v4632_v39  ;;  %v4636_v12 = vpop.eup %4635  ;;  %v2411_v9 = vadd.f32 1.0, %v4634_v42  ;;  %v7312_v3 = vmul.f32 %v6843_v1, %v7283_v62 }
 0x22f   : > { %v8006_v22 = vsub.f32 0.0, %v7295_v53  ;;  %v8007_v54 = vsub.f32 0.0, %v7304_v60  ;;  %v2724_v56 = vmul.f32 0.6931472, %v4636_v12  ;;  %v8315_v49 = vsub.f32 0.0, %v7089_v27 }
 0x230   : > { %4651 = vrcp.f32 %v1866_v4  ;;  %v2652_v42 = vsub.f32 0.0, %v2636_v25  ;;  %v8008_v4 = vsub.f32 0.0, %v7312_v3  ;;  %v8316_v14 = vsub.f32 0.0, %v7295_v53 }
 0x231   : > { %v2030_v59 = vand.u32 2147483647, %v8006_v22  ;;  %v2190_v48 = vand.u32 2147483647, %v8007_v54  ;;  %4653 = vlog2.f32 %v2411_v9  ;;  %v2618_v50 = vmax.f32 %v8315_v49, 0.0 }
 0x232   : > { %v4638_v34 = vpop.eup %4637  ;;  %vm2510_vm1 = vcmp.ge.f32.partialorder %v7312_v3, 0.0 }
 0x233   : > { %v4640_v55 = vpop.eup %4639  ;;  %v2410_v46 = vadd.f32 1.0, %v4638_v34  ;;  %v2046_v45 = vsub.f32 0.0, %v2030_v59  ;;  %v2206_v24 = vsub.f32 0.0, %v2190_v48  ;;  %v2746_v59 = vadd.f32 %v2724_v56, %v2618_v50 }
 0x234   : > { %v4642_v63 = vpop.eup %4641  ;;  %v2092_v13 = vadd.f32 1.0, %v4640_v55 }
 0x235   : > { %v4644_v1 = vpop.eup %4643  ;;  %v2252_v39 = vadd.f32 1.0, %v4642_v63  ;;  %4655 = vlog2.f32 %v2410_v46  ;;  %v2075_v22 = vmul.f32 1.442695, %v2046_v45  ;;  %v2235_v54 = vmul.f32 1.442695, %v2206_v24 }
 0x236   : > { %v4646_v52 = vpop.eup %4645  ;;  %v7322_v9 = vmul.f32 %v4644_v1, %v7176_v26  ;;  %4657 = vlog2.f32 %v2092_v13  ;;  %v2679_v46 = vmul.f32 1.442695, %v2652_v42  ;;  %v2619_v26 = vmax.f32 %v2603_v58, 0.0 }
 0x237   : > { %v4648_v12 = vpop.eup %4647  ;;  %v1867_v34 = vadd.f32 1.0, %v4646_v52  ;;  %4659 = vlog2.f32 %v2252_v39  ;;  %v2331_v45 = vmax.f32 %v7190_v18, 0.0  ;;  %v7339_v24 = vmul.f32 0.6931472, %v4630_v15 }
 0x238   : > { %v4650_v48 = vpop.eup %4649  ;;  %4661 = vpow2.f32 %v2075_v22  ;;  %v7326_v55 = vmul.f32 %v7291_v37, %v7322_v9  ;;  %v7330_v25 = vmul.f32 %v7300_v2, %v7322_v9  ;;  %v2726_v63 = vmul.f32 0.6931472, %v4648_v12 }
 0x239   : > { %4663 = vpow2.f32 %v2235_v54  ;;  %v2638_v22 = vand.u32 2147483647, %v8008_v4  ;;  %v2762_v49 = vsub.f32 0.0, %v2746_v59  ;;  %v7341_v54 = vmul.f32 0.6931472, %v4650_v48 }
 0x23a   : > { %v8010_v52 = vsub.f32 0.0, %v7326_v55  ;;  %v8009_v56 = vsub.f32 0.0, %v7330_v25  ;;  %4665 = vrcp.f32 %v1867_v34  ;;  %v4652_v13 = vpop.eup %4651  ;;  %v2012_v58 = vmax.f32 %v1996_v38, 0.0 }
 0x23b   : > { %v4654_v50 = vpop.eup %4653  ;;  %v2330_v42 = vmax.f32 %v7240_v29, 0.0  ;;  %v2172_v12 = vmax.f32 %v2156_v47, 0.0  ;;  %v7353_v15 = vmul.f32 %v4652_v13, %v7225_v32  ;;  %4667 = vpow2.f32 %v2679_v46 }
 0x23c   : > { %v2029_v1 = vand.u32 2147483647, %v8010_v52  ;;  %v2189_v39 = vand.u32 2147483647, %v8009_v56  ;;  %v2747_v34 = vadd.f32 %v2726_v63, %v2619_v26  ;;  %v2654_v38 = vsub.f32 0.0, %v2638_v22 }
 0x23d   : > { %v7359_v56 = vmul.f32 %v7291_v37, %v7353_v15  ;;  %v7363_v6 = vmul.f32 %v7300_v2, %v7353_v15  ;;  %v2438_v47 = vmul.f32 0.6931472, %v4654_v50  ;;  %v2778_v32 = vadd.f32 1e-08, %v2762_v49 }
 0x23e   : > { %v2045_v59 = vsub.f32 0.0, %v2029_v1  ;;  %v2205_v48 = vsub.f32 0.0, %v2189_v39  ;;  %v2763_v39 = vsub.f32 0.0, %v2747_v34  ;;  %v2683_v21 = vmul.f32 1.442695, %v2654_v38 }
 0x23f   : > { %v4656_v4 = vpop.eup %4655  ;;  %v8015_v40 = vsub.f32 0.0, %v7359_v56  ;;  %v8016_v22 = vsub.f32 0.0, %v7363_v6  ;;  %v7373_v34 = vadd.f32 %v2438_v47, %v2331_v45 }
 0x240   : > { %v4658_v13 = vpop.eup %4657  ;;  %v2073_v46 = vmul.f32 1.442695, %v2045_v59  ;;  %v2233_v26 = vmul.f32 1.442695, %v2205_v48  ;;  %v2436_v63 = vmul.f32 0.6931472, %v4656_v4 }
 0x241   : > { %v4660_v23 = vpop.eup %4659  ;;  %v2120_v1 = vmul.f32 0.6931472, %v4658_v13  ;;  %v2031_v49 = vand.u32 2147483647, %v8015_v40  ;;  %v2191_v4 = vand.u32 2147483647, %v8016_v22 }
 0x242   : > { %v4662_v52 = vpop.eup %4661  ;;  %4669 = vpow2.f32 %v2073_v46  ;;  %v2458_v62 = vadd.f32 %v2436_v63, %v2330_v42  ;;  %v2280_v28 = vmul.f32 0.6931472, %v4660_v23  ;;  %v2779_v22 = vadd.f32 1e-08, %v2763_v39 }
 0x243   : > { %v4664_v50 = vpop.eup %4663  ;;  %4671 = vpow2.f32 %v2233_v26  ;;  %v2140_v59 = vadd.f32 %v2120_v1, %v2012_v58  ;;  %v2094_v46 = vadd.f32 1.0, %v4662_v52  ;;  %v2047_v42 = vsub.f32 0.0, %v2031_v49 }
 0x244   : > { %v4666_v48 = vpop.eup %4665  ;;  %v2474_v31 = vsub.f32 0.0, %v2458_v62  ;;  %v2300_v13 = vadd.f32 %v2280_v28, %v2172_v12  ;;  %v2207_v63 = vsub.f32 0.0, %v2191_v4  ;;  %v2254_v26 = vadd.f32 1.0, %v4664_v50  ;;  %v4893_v4 = vld [vmem:[%s7866_s11] ss:$0 sm:$0xff] }
 0x245   : > { %v7376_v38 = vmul.f32 %v4666_v48, %v7262_v61  ;;  %4673 = vlog2.f32 %v2094_v46  ;;  %v4668_v58 = vpop.eup %4667  ;;  %v2077_v1 = vmul.f32 1.442695, %v2047_v42  ;;  %v2475_v45 = vsub.f32 0.0, %v7373_v34 }
 0x246   : > { %v2826_v23 = vadd.f32 1e-08, %v2474_v31  ;;  %v7378_v40 = vsub.f32 %v2140_v59, %v2300_v13  ;;  %v2237_v41 = vmul.f32 1.442695, %v2207_v63  ;;  %4675 = vlog2.f32 %v2254_v26 }
 0x247   : > { %v7382_v28 = vmul.f32 %v7291_v37, %v7376_v38  ;;  %v7386_v62 = vmul.f32 %v7300_v2, %v7376_v38  ;;  %4677 = vpow2.f32 %v2077_v1  ;;  %v2794_v37 = vsel %vm2506_vm13, %v7339_v24, %v2778_v32 }
 0x248   : > { %v4257_v52 = vpack.c.bf16 %v2826_v23, %v2825_v7  ;;  %v2348_v61 = vand.u32 2147483647, %v7378_v40  ;;  %4679 = vpow2.f32 %v2237_v41  ;;  %v2490_v2 = vadd.f32 %v2474_v31, %v7240_v29 }
 0x249   : > { %v2000_v12 = vsub.f32 0.0, %v7382_v28  ;;  %v2160_v47 = vsub.f32 0.0, %v7386_v62  ;;  %v2700_v7 = vadd.f32 1.0, %v4668_v58  ;;  %4681 = vpow2.f32 %v2683_v21 }
 0x24a   : > { %4258 = vmatprep.subr.bf16.mxu1 %v4257_v52  ;;  %v2364_v39 = vsub.f32 0.0, %v2348_v61  ;;  %v7404_v27 = vmul.f32 %v4893_v4, %v7322_v9  ;;  %v7406_v32 = vadd.f32 %v2794_v37, %v2490_v2  ;;  %v2491_v31 = vadd.f32 %v2475_v45, %v7190_v18 }
 0x24b   : > { %v2032_v50 = vand.u32 2147483647, %v2000_v12  ;;  %v2192_v49 = vand.u32 2147483647, %v2160_v47  ;;  %4260 = vmatpush3.bf16.msra.mxu1 %v4257_v52  ;;  %v2795_v29 = vsel %vm2507_vm14, %v7341_v54, %v2779_v22  ;;  %4683 = vlog2.f32 %v2700_v7 }
 0x24c   : > { %v4670_v41 = vpop.eup %4669  ;;  %v2391_v24 = vmul.f32 1.442695, %v2364_v39  ;;  %v2524_v42 = vmax.f32 %v7276_v35, 0.0  ;;  %v7415_v63 = vadd.f32 %v2795_v29, %v2491_v31  ;;  %v2605_v18 = vsub.f32 0.0, %v7404_v27 }
 0x24d   : > { %v4672_v21 = vpop.eup %4671  ;;  %v2093_v59 = vadd.f32 1.0, %v4670_v41  ;;  %v2048_v48 = vsub.f32 0.0, %v2032_v50  ;;  %v2208_v13 = vsub.f32 0.0, %v2192_v49  ;;  %v2014_v54 = vmax.f32 %v8316_v14, 0.0 }
 0x24e   : > { %v2253_v46 = vadd.f32 1.0, %v4672_v21  ;;  %4685 = vpow2.f32 %v2391_v24  ;;  %v2540_v52 = vadd.f32 0.5, %v2524_v42  ;;  %v2637_v61 = vand.u32 2147483647, %v2605_v18 }
 0x24f   : > { %v2079_v26 = vmul.f32 1.442695, %v2048_v48  ;;  %v2239_v23 = vmul.f32 1.442695, %v2208_v13  ;;  %4687 = vlog2.f32 %v2093_v59  ;;  %v4674_v58 = vpop.eup %4673  ;;  %v8317_v2 = vsub.f32 0.0, %v7304_v60 }
 0x250   : > { %4689 = vlog2.f32 %v2253_v46  ;;  %v2124_v22 = vmul.f32 0.6931472, %v4674_v58  ;;  %v4676_v1 = vpop.eup %4675  ;;  %v2653_v24 = vsub.f32 0.0, %v2637_v61  ;;  %v7425_v31 = vmul.f32 %v4893_v4, %v7376_v38 }
 0x251   : > { %4691 = vpow2.f32 %v2079_v26  ;;  %v4678_v37 = vpop.eup %4677  ;;  %v2174_v7 = vmax.f32 %v8317_v2, 0.0  ;;  %v2284_v50 = vmul.f32 0.6931472, %v4676_v1  ;;  %v2556_v59 = vadd.f32 1e-08, %v2540_v52 }
 0x252   : > { %4693 = vpow2.f32 %v2239_v23  ;;  %v2142_v39 = vadd.f32 %v2124_v22, %v2014_v54  ;;  %v4680_v49 = vpop.eup %4679  ;;  %v2095_v41 = vadd.f32 1.0, %v4678_v37  ;;  %v2681_v48 = vmul.f32 1.442695, %v2653_v24 }
 0x253   : > { %v4682_v53 = vpop.eup %4681  ;;  %v2302_v29 = vadd.f32 %v2284_v50, %v2174_v7  ;;  %v2255_v21 = vadd.f32 1.0, %v4680_v49  ;;  %v7428_v13 = vmul.f32 %v4893_v4, %v7353_v15  ;;  %v8018_v26 = vsub.f32 0.0, %v7425_v31 }
 0x254   : > { %4695 = vlog2.f32 %v2095_v41  ;;  %v8318_v22 = vsub.f32 0.0, %v7326_v55  ;;  %v8319_v37 = vsub.f32 0.0, %v7330_v25  ;;  %v2702_v24 = vadd.f32 1.0, %v4682_v53 }
 0x255   : > { %v4684_v46 = vpop.eup %4683  ;;  %v7430_v42 = vsub.f32 %v2142_v39, %v2302_v29  ;;  %4697 = vlog2.f32 %v2255_v21  ;;  %v8019_v4 = vsub.f32 0.0, %v7428_v13  ;;  %v2640_v29 = vand.u32 2147483647, %v8018_v26 }
 0x256   : > { %4699 = vpow2.f32 %v2681_v48  ;;  %v2013_v1 = vmax.f32 %v8318_v22, 0.0  ;;  %v2173_v39 = vmax.f32 %v8319_v37, 0.0  ;;  %vm2509_vm2 = vcmp.ge.f32.partialorder %v7404_v27, 0.0 }
 0x257   : > { %v2350_v14 = vand.u32 2147483647, %v7430_v42  ;;  %4701 = vlog2.f32 %v2556_v59  ;;  %v2728_v59 = vmul.f32 0.6931472, %v4684_v46  ;;  %vm2511_vm3 = vcmp.ge.f32.partialorder %v7428_v13, 0.0 }
 0x258   : > { %v4686_v60 = vpop.eup %4685  ;;  %vm2512_vm4 = vcmp.ge.f32.partialorder %v7425_v31, 0.0 }
 0x259   : > { %v4688_v23 = vpop.eup %4687  ;;  %v2412_v58 = vadd.f32 1.0, %v4686_v60  ;;  %v2366_v7 = vsub.f32 0.0, %v2350_v14  ;;  %v2639_v60 = vand.u32 2147483647, %v8019_v4  ;;  %v2526_v14 = vmax.f32 %v7312_v3, 0.0 }
 0x25a   : > { %v4690_v54 = vpop.eup %4689  ;;  %v2122_v52 = vmul.f32 0.6931472, %v4688_v23  ;;  %v8320_v23 = vsub.f32 0.0, %v7276_v35 }
 0x25b   : > { %v4692_v61 = vpop.eup %4691  ;;  %4703 = vlog2.f32 %v2412_v58  ;;  %v2282_v2 = vmul.f32 0.6931472, %v4690_v54  ;;  %v2395_v48 = vmul.f32 1.442695, %v2366_v7  ;;  %v8321_v54 = vsub.f32 0.0, %v7359_v56 }
 0x25c   : > { %v4694_v50 = vpop.eup %4693  ;;  %v2096_v49 = vadd.f32 1.0, %v4692_v61  ;;  %v2141_v41 = vadd.f32 %v2122_v52, %v2013_v1  ;;  %v2620_v58 = vmax.f32 %v8320_v23, 0.0  ;;  %v2656_v1 = vsub.f32 0.0, %v2640_v29 }
 0x25d   : > { %v2256_v55 = vadd.f32 1.0, %v4694_v50  ;;  %v2301_v21 = vadd.f32 %v2282_v2, %v2173_v39  ;;  %v2015_v22 = vmax.f32 %v8321_v54, 0.0  ;;  %v2655_v52 = vsub.f32 0.0, %v2639_v60 }
 0x25e   : > { %4705 = vlog2.f32 %v2096_v49  ;;  %v4696_v53 = vpop.eup %4695  ;;  %v2748_v39 = vadd.f32 %v2728_v59, %v2620_v58  ;;  %v8322_v7 = vsub.f32 0.0, %v7363_v6  ;;  %v2542_v23 = vadd.f32 0.5, %v2526_v14 }
 0x25f   : > { %v7443_v25 = vsub.f32 %v2141_v41, %v2301_v21  ;;  %4707 = vpow2.f32 %v2395_v48  ;;  %v4698_v46 = vpop.eup %4697  ;;  %v2126_v37 = vmul.f32 0.6931472, %v4696_v53  ;;  %v2685_v41 = vmul.f32 1.442695, %v2655_v52 }
 0x260   : > { %4709 = vlog2.f32 %v2256_v55  ;;  %v4700_v2 = vpop.eup %4699  ;;  %v2175_v50 = vmax.f32 %v8322_v7, 0.0  ;;  %v2286_v49 = vmul.f32 0.6931472, %v4698_v46  ;;  %v2687_v55 = vmul.f32 1.442695, %v2656_v1 }
 0x261   : > { %v2349_v61 = vand.u32 2147483647, %v7443_v25  ;;  %4711 = vlog2.f32 %v2702_v24  ;;  %v2143_v48 = vadd.f32 %v2126_v37, %v2015_v22  ;;  %v4702_v56 = vpop.eup %4701  ;;  %v2764_v26 = vsub.f32 0.0, %v2748_v39 }
 0x262   : > { %v2303_v54 = vadd.f32 %v2286_v49, %v2175_v50  ;;  %4713 = vpow2.f32 %v2685_v41  ;;  %v2701_v4 = vadd.f32 1.0, %v4700_v2  ;;  %v2332_v59 = vmax.f32 %v7378_v40, 0.0 }
 0x263   : > { %v2365_v21 = vsub.f32 0.0, %v2349_v61  ;;  %v2558_v6 = vadd.f32 1e-08, %v2542_v23  ;;  %v2525_v1 = vmax.f32 %v7404_v27, 0.0  ;;  %v2016_v46 = vmax.f32 %v2000_v12, 0.0 }
 0x264   : > { %v7454_v58 = vsub.f32 %v2143_v48, %v2303_v54  ;;  %v2780_v37 = vadd.f32 1e-08, %v2764_v26  ;;  %v2584_v49 = vmul.f32 0.6931472, %v4702_v56  ;;  %v2827_v48 = vadd.f32 1e-08, %v2475_v45 }
 0x265   : > { %v4704_v29 = vpop.eup %4703  ;;  %v2393_v60 = vmul.f32 1.442695, %v2365_v21  ;;  %v2176_v21 = vmax.f32 %v2160_v47, 0.0  ;;  %v8325_v27 = vsub.f32 0.0, %v7425_v31 }
 0x266   : > { %v2440_v24 = vmul.f32 0.6931472, %v4704_v29  ;;  %v2351_v14 = vand.u32 2147483647, %v7454_v58  ;;  %v2541_v29 = vadd.f32 0.5, %v2525_v1 }
 0x267   : > { %4715 = vpow2.f32 %v2393_v60 }
 0x268   : > { %v4706_v53 = vpop.eup %4705  ;;  %v2460_v22 = vadd.f32 %v2440_v24, %v2332_v59  ;;  %4717 = vpow2.f32 %v2687_v55  ;;  %v2367_v50 = vsub.f32 0.0, %v2351_v14  ;;  %v8323_v59 = vsub.f32 0.0, %v7312_v3 }
 0x269   : > { %v4708_v52 = vpop.eup %4707  ;;  %v2128_v61 = vmul.f32 0.6931472, %v4706_v53  ;;  %4719 = vlog2.f32 %v2701_v4  ;;  %v2796_v4 = vsel %vm2508_vm15, %v2584_v49, %v2780_v37  ;;  %v2557_v1 = vadd.f32 1e-08, %v2541_v29 }
 0x26a   : > { %v4710_v39 = vpop.eup %4709  ;;  %v2476_v2 = vsub.f32 0.0, %v2460_v22  ;;  %v2414_v7 = vadd.f32 1.0, %v4708_v52  ;;  %v2397_v28 = vmul.f32 1.442695, %v2367_v50  ;;  %v2622_v24 = vmax.f32 %v8323_v59, 0.0 }
 0x26b   : > { %v4712_v41 = vpop.eup %4711  ;;  %v2144_v23 = vadd.f32 %v2128_v61, %v2016_v46  ;;  %v2288_v54 = vmul.f32 0.6931472, %v4710_v39  ;;  %v2527_v52 = vmax.f32 %v7428_v13, 0.0  ;;  %v2334_v49 = vmax.f32 %v7430_v42, 0.0 }
 0x26c   : > { %v2828_v55 = vadd.f32 1e-08, %v2476_v2  ;;  %4721 = vlog2.f32 %v2414_v7  ;;  %v2492_v12 = vadd.f32 %v2476_v2, %v7378_v40  ;;  %v4714_v56 = vpop.eup %4713  ;;  %v2732_v47 = vmul.f32 0.6931472, %v4712_v41 }
 0x26d   : > { %v2304_v26 = vadd.f32 %v2288_v54, %v2176_v21  ;;  %4723 = vpow2.f32 %v2397_v28  ;;  %v2703_v45 = vadd.f32 1.0, %v4714_v56  ;;  %v2543_v50 = vadd.f32 0.5, %v2527_v52 }
 0x26e   : > { %v4261_v60 = vpack.c.bf16 %v2828_v55, %v2827_v48  ;;  %v7468_v62 = vadd.f32 %v2796_v4, %v2492_v12  ;;  %4725 = vlog2.f32 %v2558_v6  ;;  %v2750_v14 = vadd.f32 %v2732_v47, %v2622_v24 }
 0x26f   : > { %v7470_v34 = vsub.f32 %v2144_v23, %v2304_v26  ;;  %4727 = vlog2.f32 %v2703_v45  ;;  %v2621_v48 = vmax.f32 %v2605_v18, 0.0  ;;  %v2528_v26 = vmax.f32 %v7425_v31, 0.0 }
 0x270   : > { %4262 = vmatprep.subr.bf16.mxu1 %v4261_v60  ;;  %v2766_v2 = vsub.f32 0.0, %v2750_v14  ;;  %v2559_v4 = vadd.f32 1e-08, %v2543_v50  ;;  %v8324_v14 = vsub.f32 0.0, %v7428_v13 }
 0x271   : > { %v4716_v40 = vpop.eup %4715  ;;  %4264 = vmatpush3.bf16.msra.mxu1 %v4261_v60  ;;  %v2352_v35 = vand.u32 2147483647, %v7470_v34 }
 0x272   : > { %v4718_v53 = vpop.eup %4717  ;;  %v2413_v22 = vadd.f32 1.0, %v4716_v40  ;;  %v2782_v28 = vadd.f32 1e-08, %v2766_v2  ;;  %v2544_v40 = vadd.f32 0.5, %v2528_v26 }
 0x273   : > { %v4720_v46 = vpop.eup %4719  ;;  %v2368_v61 = vsub.f32 0.0, %v2352_v35  ;;  %v2704_v37 = vadd.f32 1.0, %v4718_v53  ;;  %v2333_v35 = vmax.f32 %v7443_v25, 0.0 }
 0x274   : > { %4729 = vlog2.f32 %v2413_v22  ;;  %v2730_v7 = vmul.f32 0.6931472, %v4720_v46  ;;  %v2560_v2 = vadd.f32 1e-08, %v2544_v40 }
 0x275   : > { %v2399_v6 = vmul.f32 1.442695, %v2368_v61  ;;  %4731 = vlog2.f32 %v2557_v1  ;;  %v2623_v1 = vmax.f32 %v8324_v14, 0.0 }
 0x276   : > { %v4722_v39 = vpop.eup %4721  ;;  %v2749_v12 = vadd.f32 %v2730_v7, %v2621_v48 }
 0x277   : > { %v2444_v41 = vmul.f32 0.6931472, %v4722_v39  ;;  %4733 = vpow2.f32 %v2399_v6  ;;  %v4724_v21 = vpop.eup %4723 }
 0x278   : > { %v4726_v23 = vpop.eup %4725  ;;  %v2415_v55 = vadd.f32 1.0, %v4724_v21  ;;  %4735 = vlog2.f32 %v2704_v37  ;;  %v2765_v24 = vsub.f32 0.0, %v2749_v12 }
 0x279   : > { %v2462_v54 = vadd.f32 %v2444_v41, %v2334_v49  ;;  %v4728_v29 = vpop.eup %4727  ;;  %v2588_v60 = vmul.f32 0.6931472, %v4726_v23  ;;  %v2335_v23 = vmax.f32 %v7454_v58, 0.0 }
 0x27a   : > { %4737 = vlog2.f32 %v2415_v55  ;;  %v2734_v45 = vmul.f32 0.6931472, %v4728_v29  ;;  %v2781_v3 = vadd.f32 1e-08, %v2765_v24 }
 0x27b   : > { %v2478_v56 = vsub.f32 0.0, %v2462_v54  ;;  %v2798_v18 = vsel %vm2510_vm1, %v2588_v60, %v2782_v28  ;;  %4739 = vlog2.f32 %v2559_v4  ;;  %v2624_v60 = vmax.f32 %v8325_v27, 0.0 }
 0x27d   : > { %v2494_v47 = vadd.f32 %v2478_v56, %v7430_v42  ;;  %v2751_v42 = vadd.f32 %v2734_v45, %v2623_v1  ;;  %v2830_v41 = vadd.f32 1e-08, %v2478_v56 }
 0x27e   : > { %v4730_v59 = vpop.eup %4729 }
 0x27f   : > { %v2442_v53 = vmul.f32 0.6931472, %v4730_v59  ;;  %v7483_v22 = vadd.f32 %v2798_v18, %v2494_v47  ;;  %v4732_v52 = vpop.eup %4731  ;;  %v2767_v48 = vsub.f32 0.0, %v2751_v42 }
 0x280   : > { %v2586_v7 = vmul.f32 0.6931472, %v4732_v52 }
 0x281   : > { %v4734_v46 = vpop.eup %4733  ;;  %v2461_v61 = vadd.f32 %v2442_v53, %v2333_v35  ;;  %v2783_v47 = vadd.f32 1e-08, %v2767_v48  ;;  %v2336_v53 = vmax.f32 %v7470_v34, 0.0 }
 0x282   : > { %v2416_v6 = vadd.f32 1.0, %v4734_v46  ;;  %v4736_v37 = vpop.eup %4735  ;;  %v2797_v55 = vsel %vm2509_vm2, %v2586_v7, %v2781_v3 }
 0x283   : > { %v2477_v39 = vsub.f32 0.0, %v2461_v61  ;;  %v2736_v28 = vmul.f32 0.6931472, %v4736_v37 }
 0x284   : > { %4741 = vlog2.f32 %v2416_v6  ;;  %v4738_v50 = vpop.eup %4737 }
 0x285   : > { %v2829_v49 = vadd.f32 1e-08, %v2477_v39  ;;  %v2493_v21 = vadd.f32 %v2477_v39, %v7443_v25  ;;  %v2446_v54 = vmul.f32 0.6931472, %v4738_v50  ;;  %4743 = vlog2.f32 %v2560_v2  ;;  %v4740_v4 = vpop.eup %4739  ;;  %v3571_v50 = vld [vmem:[%s7868_s13 + $0x20] sm:$0xff] }
 0x286   : > { %v2752_v25 = vadd.f32 %v2736_v28, %v2624_v60  ;;  %v2590_v45 = vmul.f32 0.6931472, %v4740_v4 }
 0x287   : > { %v4265_v12 = vpack.c.bf16 %v2830_v41, %v2829_v49  ;;  %v7490_v26 = vadd.f32 %v2797_v55, %v2493_v21  ;;  %v2463_v29 = vadd.f32 %v2446_v54, %v2335_v23  ;;  %v3572_v49 = vld [vmem:[%s7868_s13 + $0x28] sm:$0xff]  ;;  %v3573_v54 = vld [vmem:[%s7868_s13 + $0x30] sm:$0xff]  ;;  %v3574_v55 = vld [vmem:[%s7868_s13 + $0x38] sm:$0xff] }
 0x288   : > { %v2799_v18 = vsel %vm2511_vm3, %v2590_v45, %v2783_v47  ;;  %v2768_v40 = vsub.f32 0.0, %v2752_v25  ;;  %v4289_v23 = vpack.c.bf16 %v3572_v49, %v3571_v50  ;;  %v4293_v28 = vpack.c.bf16 %v3574_v55, %v3573_v54 }
 0x289   : > { %4266 = vmatprep.subr.bf16.mxu1 %v4265_v12  ;;  %v2479_v56 = vsub.f32 0.0, %v2463_v29 }
 0x28a   : > { %4268 = vmatpush3.bf16.msra.mxu1 %v4265_v12  ;;  %v2784_v46 = vadd.f32 1e-08, %v2768_v40 }
 0x28b   : > { %v2495_v59 = vadd.f32 %v2479_v56, %v7454_v58  ;;  %v2831_v6 = vadd.f32 1e-08, %v2479_v56 }
 0x28d   : > { %v7496_v35 = vadd.f32 %v2799_v18, %v2495_v59 }
 0x28e   : > { %v4742_v24 = vpop.eup %4741 }
 0x28f   : > { %v2448_v14 = vmul.f32 0.6931472, %v4742_v24  ;;  %v4744_v1 = vpop.eup %4743 }
 0x290   : > { %v2592_v42 = vmul.f32 0.6931472, %v4744_v1 }
 0x291   : > { %v2464_v52 = vadd.f32 %v2448_v14, %v2336_v53 }
 0x292   : > { %v2800_v13 = vsel %vm2512_vm4, %v2592_v42, %v2784_v46 }
 0x293   : > { %v2480_v61 = vsub.f32 0.0, %v2464_v52 }
 0x295   : > { %v2832_v3 = vadd.f32 1e-08, %v2480_v61  ;;  %v2496_v37 = vadd.f32 %v2480_v61, %v7470_v34  ;;  %v3570_v34 = vld [vmem:[%s7868_s13 + $0x18] sm:$0xff] }
 0x297   : > { %v4269_v58 = vpack.c.bf16 %v2832_v3, %v2831_v6  ;;  %v7501_v39 = vadd.f32 %v2800_v13, %v2496_v37 }
 0x299   : > { %4270 = vmatprep.subr.bf16.mxu1 %v4269_v58 }
 0x29a   : > { %4272 = vmatpush3.bf16.msra.mxu1 %v4269_v58 }
 0x29d   : > { %4150 = vmatmul.mubr.msk.f32.vlgmr.msra.gmra.mrb[8].mxu1 %vm2864_vm7, %v7171_v10 }
 0x29e   : > { %4152 = vmatprep.mubr.msk.f32.mxu1 %vm2864_vm7, %v7181_v30 }
 0x2a1   : > { %4153 = vmatmul.mubr.msk.f32.gmra.mrb[10].mxu1 %vm2864_vm7, %v7200_v43  ;;  %v3567_v43 = vld [vmem:[%s7868_s13] sm:$0xff] }
 0x2a2   : > { %4155 = vmatprep.mubr.msk.f32.mxu1 %vm2864_vm7, %v7205_v16  ;;  %v3568_v16 = vld [vmem:[%s7868_s13 + $0x8] sm:$0xff] }
 0x2a5   : > { %4156 = vmatmul.mubr.msk.f32.gmra.mrb[12].mxu1 %vm2864_vm7, %v7232_v33  ;;  %v3569_v33 = vld [vmem:[%s7868_s13 + $0x10] sm:$0xff] }
 0x2a6   : > { %4158 = vmatprep.mubr.msk.f32.mxu1 %vm2864_vm7, %v7238_v5  ;;  %v4285_v7 = vpack.c.bf16 %v3570_v34, %v3569_v33 }
 0x2a9   : > { %4159 = vmatmul.mubr.msk.f32.gmra.mrb[14].mxu1 %vm2864_vm7, %v7259_v44  ;;  %v4281_v44 = vpack.c.bf16 %v3568_v16, %v3567_v43 }
 0x2ab   : > { %4282 = vmatprep.subr.bf16.mxu0 %v4281_v44  ;;  %4297 = vmatprep.subr.bf16.mxu1 %v4281_v44 }
 0x2ac   : > { %4284 = vmatpush3.bf16.msra.mxu0 %v4281_v44  ;;  %4301 = vmatpush3.bf16.msra.mxu1 %v4281_v44 }
 0x2ad   : > { %4286 = vmatprep.subr.bf16.mxu0 %v4285_v7  ;;  %4298 = vmatprep.subr.bf16.mxu1 %v4285_v7 }
 0x2b0   : > { %4288 = vmatpush3.bf16.msra.mxu0 %v4285_v7  ;;  %4302 = vmatpush3.bf16.msra.mxu1 %v4285_v7 }
 0x2b1   : > { %4290 = vmatprep.subr.bf16.mxu0 %v4289_v23  ;;  %4299 = vmatprep.subr.bf16.mxu1 %v4289_v23 }
 0x2b4   : > { %4292 = vmatpush3.bf16.msra.mxu0 %v4289_v23  ;;  %4303 = vmatpush3.bf16.msra.mxu1 %v4289_v23 }
 0x2b5   : > { %4294 = vmatprep.subr.bf16.mxu0 %v4293_v28  ;;  %4300 = vmatprep.subr.bf16.mxu1 %v4293_v28 }
 0x2b8   : > { %4296 = vmatpush3.bf16.msra.mxu0 %v4293_v28  ;;  %4304 = vmatpush3.bf16.msra.mxu1 %v4293_v28 }
 0x2b9   : > { %v7517_v31 = vpop.f32.mrb[16].mxu0 }
 0x2ba   : > { %v7519_v10 = vpop.f32.mrb[17].mxu0 }
 0x2bd   : > { %v7521_v30 = vpop.f32.mrb[18].mxu0 }
 0x2be   : > { %v7532_v5 = vpop.f32.mrb[19].mxu0 }
 0x2c1   : > { %v7537_v2 = vpop.f32.mrb[20].mxu0 }
 0x2c2   : > { %v7545_v41 = vpop.f32.mrb[21].mxu0 }
 0x2c5   : > { %v7547_v21 = vpop.f32.mrb[22].mxu0 }
 0x2c6   : > { %v7549_v48 = vpop.f32.mrb[23].mxu0 }
 0x2ed   : > { %v4123_v12 = vpop.f32.mrb[0].mxu1 }
 0x2ee   : > { %v2995_v4 = vsub.f32 %v6652_v11, %v4123_v12  ;;  %v2955_v29 = vpop.f32.mrb[1].mxu1 }
 0x2ef   : > { %v2994_v27 = vsub.f32 %v6669_v51, %v2955_v29 }
 0x2f0   : > { %v3003_v40 = vsel %vm2864_vm7, %v2995_v4, -inf }
 0x2f1   : > { %v4126_v60 = vpop.f32.mrb[2].mxu1  ;;  %v3002_v53 = vsel %vm2864_vm7, %v2994_v27, -inf }
 0x2f2   : > { %v2997_v47 = vsub.f32 %v6746_v20, %v4126_v60  ;;  %v2965_v56 = vpop.f32.mrb[3].mxu1 }
 0x2f3   : > { %v2996_v25 = vsub.f32 %v6767_v17, %v2965_v56 }
 0x2f5   : > { %v4129_v45 = vpop.f32.mrb[4].mxu1  ;;  %v3004_v42 = vsel %vm2864_vm7, %v2996_v25, -inf }
 0x2f6   : > { %v2999_v59 = vsub.f32 %v6965_v57, %v4129_v45  ;;  %v2975_v18 = vpop.f32.mrb[5].mxu1 }
 0x2f7   : > { %v2998_v24 = vsub.f32 %v6959_v8, %v2975_v18  ;;  %v3005_v8 = vsel %vm2864_vm7, %v2997_v47, -inf }
 0x2f8   : > { %v3008_v11 = vsel %vm2864_vm7, %v2999_v59, -inf }
 0x2f9   : > { %v3009_v14 = vmax.f32 %v3003_v40, %v3008_v11  ;;  %v3006_v51 = vsel %vm2864_vm7, %v2998_v24, -inf  ;;  %v7567_v1 = vpop.f32.mrb[6].mxu1 }
 0x2fa   : > { %v3007_v20 = vmax.f32 %v3002_v53, %v3006_v51  ;;  %v3001_v17 = vsub.f32 %v7101_v0, %v7567_v1  ;;  %v2985_v52 = vpop.f32.mrb[7].mxu1 }
 0x2fb   : > { %v3000_v57 = vsub.f32 %v7159_v19, %v2985_v52 }
 0x2fc   : > { %v3014_v46 = vmax.f32 %v3007_v20, %v3009_v14  ;;  %v3012_v61 = vsel %vm2864_vm7, %v3001_v17, -inf }
 0x2fd   : > { %v3013_v6 = vmax.f32 %v3005_v8, %v3012_v61  ;;  %v3010_v3 = vsel %vm2864_vm7, %v3000_v57, -inf }
 0x2fe   : > { %v3011_v37 = vmax.f32 %v3004_v42, %v3010_v3 }
 0x300   : > { %v3015_v13 = vmax.f32 %v3011_v37, %v3013_v6  ;;  %v7595_v37 = vld [vmem:[%s7861_s6] ss:$0 sm:$0xff] }
 0x302   : > { %v3016_v58 = vmax.f32 %v3014_v46, %v3015_v13 }
 0x304   : > { %v3017_v43 = vrot.slane %v3016_v58, 4 }
 0x306   : > { %v3018_v16 = vmax.f32 %v3016_v58, %v3017_v43 }
 0x308   : > { %v3019_v33 = vrot.slane %v3018_v16, 2 }
 0x30a   : > { %v3020_v0 = vmax.f32 %v3018_v16, %v3019_v33  ;;  %v7601_v16 = vadd.f32 %v7517_v31, %v7595_v37  ;;  %v7618_v31 = vadd.f32 %v7537_v2, %v7595_v37 }
 0x30c   : > { %v3021_v44 = vrot.slane %v3020_v0, 1  ;;  %v3945_v2 = vmul.f32 -1.442695, %v7618_v31 }
 0x30e   : > { %v7576_v34 = vmax.f32 %v3020_v0, %v3021_v44  ;;  %v7605_v0 = vadd.f32 %v7595_v37, %v7519_v10  ;;  %v7609_v44 = vadd.f32 %v7521_v30, %v7595_v37  ;;  %v7623_v10 = vadd.f32 %v7595_v37, %v7545_v41 }
 0x310   : > { %v3023_v19 = vsub.f32 %v2994_v27, %v7576_v34  ;;  %v3024_v7 = vsub.f32 %v2995_v4, %v7576_v34  ;;  %v3025_v50 = vsub.f32 %v2996_v25, %v7576_v34  ;;  %v3026_v49 = vsub.f32 %v2997_v47, %v7576_v34 }
 0x311   : > { %v3027_v23 = vsub.f32 %v2998_v24, %v7576_v34  ;;  %v3028_v54 = vsub.f32 %v2999_v59, %v7576_v34  ;;  %v3029_v55 = vsub.f32 %v3000_v57, %v7576_v34  ;;  %v3030_v28 = vsub.f32 %v3001_v17, %v7576_v34 }
 0x312   : > { %v3031_v12 = vmul.f32 1.442695, %v3023_v19  ;;  %v3033_v29 = vmul.f32 1.442695, %v3024_v7  ;;  %v3035_v60 = vmul.f32 1.442695, %v3025_v50  ;;  %v7613_v7 = vadd.f32 %v7595_v37, %v7532_v5 }
 0x313   : > { %v3037_v56 = vmul.f32 1.442695, %v3026_v49  ;;  %v3039_v27 = vmul.f32 1.442695, %v3027_v23  ;;  %v3041_v4 = vmul.f32 1.442695, %v3028_v54  ;;  %v7628_v54 = vadd.f32 %v7547_v21, %v7595_v37 }
 0x314   : > { %4745 = vpow2.f32 %v3031_v12  ;;  %v3043_v47 = vmul.f32 1.442695, %v3029_v55  ;;  %v3045_v25 = vmul.f32 1.442695, %v3030_v28  ;;  %v3941_v50 = vmul.f32 -1.442695, %v7601_v16 }
 0x315   : > { %4747 = vpow2.f32 %v3033_v29  ;;  %v3940_v23 = vmul.f32 -1.442695, %v7605_v0  ;;  %v3943_v30 = vmul.f32 -1.442695, %v7609_v44  ;;  %v3942_v55 = vmul.f32 -1.442695, %v7613_v7 }
 0x316   : > { %4749 = vpow2.f32 %v3035_v60  ;;  %v7634_v28 = vadd.f32 %v7595_v37, %v7549_v48  ;;  %v3944_v41 = vmul.f32 -1.442695, %v7623_v10  ;;  %v3947_v29 = vmul.f32 -1.442695, %v7628_v54 }
 0x317   : > { %4751 = vpow2.f32 %v3037_v56 }
 0x318   : > { %4753 = vpow2.f32 %v3039_v27  ;;  %v3946_v21 = vmul.f32 -1.442695, %v7634_v28 }
 0x319   : > { %4755 = vpow2.f32 %v3041_v4 }
 0x31a   : > { %4757 = vpow2.f32 %v3043_v47 }
 0x31b   : > { %4759 = vpow2.f32 %v3045_v25 }
 0x31c   : > { %4761 = vpow2.f32 %v3941_v50  ;;  %v8327_v50 = vld [vmem:[#allocation27_spill] sm:$0xff] }
 0x31d   : > { %4763 = vpow2.f32 %v3940_v23 }
 0x31e   : > { %v4746_v45 = vpop.eup %4745  ;;  %4765 = vpow2.f32 %v3943_v30  ;;  %v8328_v30 = vld [vmem:[#allocation5_spill] sm:$0xff] }
 0x31f   : > { %v4748_v59 = vpop.eup %4747  ;;  %v3047_v18 = vsel %vm2864_vm7, %v4746_v45, 0.0  ;;  %4767 = vpow2.f32 %v3942_v55  ;;  %v8329_v55 = vld [vmem:[#allocation49_spill] sm:$0xff] }
 0x320   : > { %v4750_v24 = vpop.eup %4749  ;;  %v3048_v40 = vsel %vm2864_vm7, %v4748_v59, 0.0  ;;  %4769 = vpow2.f32 %v3945_v2 }
 0x321   : > { %v4752_v11 = vpop.eup %4751  ;;  %v3049_v53 = vadd.f32 %v3048_v40, %v3047_v18  ;;  %v3050_v14 = vsel %vm2864_vm7, %v4750_v24, 0.0  ;;  %4771 = vpow2.f32 %v3944_v41 }
 0x322   : > { %v4754_v51 = vpop.eup %4753  ;;  %v3052_v17 = vsel %vm2864_vm7, %v4752_v11, 0.0  ;;  %4773 = vpow2.f32 %v3947_v29  ;;  %v8331_v29 = vld [vmem:[#allocation44_spill] sm:$0xff] }
 0x323   : > { %v3051_v20 = vadd.f32 %v3050_v14, %v3049_v53  ;;  %v4756_v52 = vpop.eup %4755  ;;  %v3054_v8 = vsel %vm2864_vm7, %v4754_v51, 0.0 }
 0x324   : > { %v4758_v46 = vpop.eup %4757  ;;  %v3056_v42 = vsel %vm2864_vm7, %v4756_v52, 0.0 }
 0x325   : > { %v3053_v57 = vadd.f32 %v3052_v17, %v3051_v20  ;;  %v4760_v6 = vpop.eup %4759  ;;  %v3058_v13 = vsel %vm2864_vm7, %v4758_v46, 0.0 }
 0x326   : > { %v3060_v43 = vsel %vm2864_vm7, %v4760_v6, 0.0  ;;  %v4762_v27 = vpop.eup %4761 }
 0x327   : > { %v3055_v61 = vadd.f32 %v3054_v8, %v3053_v57  ;;  %v4764_v48 = vpop.eup %4763  ;;  %v3488_v45 = vadd.f32 1.0, %v4762_v27  ;;  %v8332_v27 = vld [vmem:[#allocation38_spill] sm:$0xff] }
 0x328   : > { %v4766_v4 = vpop.eup %4765  ;;  %v3487_v18 = vadd.f32 1.0, %v4764_v48 }
 0x329   : > { %v3057_v3 = vadd.f32 %v3056_v42, %v3055_v61  ;;  %v4768_v47 = vpop.eup %4767  ;;  %v3490_v40 = vadd.f32 1.0, %v4766_v4  ;;  %v8333_v4 = vld [vmem:[#allocation15_spill] sm:$0xff] }
 0x32a   : > { %v4770_v25 = vpop.eup %4769  ;;  %v3489_v53 = vadd.f32 1.0, %v4768_v47 }
 0x32b   : > { %v3059_v58 = vadd.f32 %v3058_v13, %v3057_v3  ;;  %v4772_v59 = vpop.eup %4771  ;;  %v3492_v20 = vadd.f32 1.0, %v4770_v25  ;;  %v8334_v25 = vld [vmem:[#allocation8_spill] sm:$0xff] }
 0x32c   : > { %v4774_v24 = vpop.eup %4773  ;;  %v3491_v17 = vadd.f32 1.0, %v4772_v59 }
 0x32d   : > { %v3061_v33 = vadd.f32 %v3060_v43, %v3059_v58  ;;  %v3494_v57 = vadd.f32 1.0, %v4774_v24 }
 0x32f   : > { %v3062_v19 = vrot.slane %v3061_v33, 4 }
 0x331   : > { %v3063_v49 = vadd.f32 %v3062_v19, %v3061_v33  ;;  %v8326_v33 = vld [vmem:[#allocation18_spill] sm:$0xff] }
 0x332   : > { %v3076_v19 = vsub.s32 7, %v8326_v33 }
 0x333   : > { %v3064_v5 = vrot.slane %v3063_v49, 2 }
 0x335   : > { %v3065_v12 = vadd.f32 %v3064_v5, %v3063_v49 }
 0x337   : > { %v3066_v60 = vrot.slane %v3065_v12, 1 }
 0x339   : > { %v3067_v56 = vadd.f32 %v3066_v60, %v3065_v12  ;;  %v8330_v12 = vld [vmem:[#allocation46_spill] sm:$0xff] }
 0x33b   : > { %4775 = vlog2.f32 %v3067_v56 }
 0x33c   : > { %4777 = vpow2.f32 %v3946_v21 }
 0x33d   : > { %4779 = vrcp.f32 %v3488_v45 }
 0x33e   : > { %4781 = vrcp.f32 %v3487_v18 }
 0x33f   : > { %4783 = vrcp.f32 %v3490_v40 }
 0x340   : > { %4785 = vrcp.f32 %v3489_v53 }
 0x341   : > { %4787 = vrcp.f32 %v3492_v20 }
 0x342   : > { %4789 = vrcp.f32 %v3491_v17 }
 0x343   : > { %4791 = vrcp.f32 %v3494_v57 }
 0x345   : > { %v4776_v11 = vpop.eup %4775 }
 0x346   : > { %v4778_v14 = vpop.eup %4777  ;;  %v3069_v51 = vmul.f32 0.6931472, %v4776_v11 }
 0x347   : > { %v3493_v8 = vadd.f32 1.0, %v4778_v14  ;;  %v4780_v42 = vpop.eup %4779 }
 0x348   : > { %v3070_v52 = vadd.f32 %v3069_v51, %v7576_v34  ;;  %v4782_v6 = vpop.eup %4781  ;;  %v7644_v34 = vld [vmem:[%s7867_s12] ss:$0 sm:$0xff]  ;;  %v3536_v56 = vmul.f32 %v4780_v42, %v7601_v16  ;;  %v7673_v51 = vpop.f32.mrb[24].mxu0 }
 0x349   : > { %4793 = vrcp.f32 %v3493_v8  ;;  %v4784_v3 = vpop.eup %4783  ;;  %v2841_v49 = vmul.f32 %v7644_v34, %v8327_v50  ;;  %v2840_v5 = vmul.f32 %v7644_v34, %v8328_v30  ;;  %v2843_v2 = vmul.f32 %v7644_v34, %v8329_v55  ;;  %v7675_v8 = vpop.f32.mrb[25].mxu0 }
 0x34a   : > { %v3071_v46 = vadd.f32 %v7567_v1, %v3070_v52  ;;  %v4786_v13 = vpop.eup %4785  ;;  %v2842_v41 = vmul.f32 %v7644_v34, %v8330_v12  ;;  %v2845_v60 = vmul.f32 %v7644_v34, %v8331_v29  ;;  %v2844_v48 = vmul.f32 %v7644_v34, %v8332_v27 }
 0x34b   : > { %v4788_v58 = vpop.eup %4787  ;;  %v2847_v47 = vmul.f32 %v7644_v34, %v8333_v4  ;;  %v2846_v45 = vmul.f32 %v7644_v34, %v8334_v25  ;;  %v3535_v18 = vmul.f32 %v4782_v6, %v7605_v0  ;;  %v3538_v24 = vmul.f32 %v4784_v3, %v7609_v44 }
 0x34c   : > { %v3072_v61 = vmul.f32 1.442695, %v3071_v46  ;;  %v4790_v43 = vpop.eup %4789  ;;  %v3537_v40 = vmul.f32 %v4786_v13, %v7613_v7  ;;  %v3540_v16 = vmul.f32 %v4788_v58, %v7618_v31  ;;  %v7677_v13 = vpop.f32.mrb[26].mxu0 }
 0x34d   : > { %v4792_v1 = vpop.eup %4791  ;;  %v3539_v11 = vmul.f32 %v4790_v43, %v7623_v10  ;;  %v7681_v58 = vpop.f32.mrb[27].mxu0 }
 0x34e   : > { %4795 = vpow2.f32 %v3072_v61  ;;  %v3542_v53 = vmul.f32 %v4792_v1, %v7628_v54  ;;  %v7685_v43 = vpop.f32.mrb[28].mxu0 }
 0x34f   : > { %v7688_v1 = vpop.f32.mrb[29].mxu0 }
 0x350   : > { %v7690_v50 = vpop.f32.mrb[30].mxu0 }
 0x353   : > { %v4794_v23 = vpop.eup %4793 }
 0x354   : > { %v3541_v14 = vmul.f32 %v4794_v23, %v7634_v28 }
 0x358   : > { %v4796_v21 = vpop.eup %4795 }
 0x359   : > { %v3077_v59 = vrot.slane %v4796_v21, %v3076_v19 }
 0x35b   : > { %v3079_v20 = vadd.f32 %v3077_v59, %v2841_v49  ;;  %v3078_v17 = vadd.f32 %v3077_v59, %v2840_v5  ;;  %v3081_v52 = vadd.f32 %v3077_v59, %v2843_v2  ;;  %v3080_v57 = vadd.f32 %v3077_v59, %v2842_v41  ;;  %v7692_v49 = vpop.f32.mrb[31].mxu0 }
 0x35c   : > { %v3083_v0 = vadd.f32 %v3077_v59, %v2845_v60  ;;  %v3082_v44 = vadd.f32 %v3077_v59, %v2844_v48  ;;  %v3085_v46 = vadd.f32 %v3077_v59, %v2847_v47  ;;  %v3084_v7 = vadd.f32 %v3077_v59, %v2846_v45 }
 0x35d   : > { %v3552_v61 = vmul.f32 %v3536_v56, %v3079_v20  ;;  %v3551_v31 = vmul.f32 %v3535_v18, %v3078_v17  ;;  %v3554_v42 = vmul.f32 %v3538_v24, %v3081_v52  ;;  %v3553_v10 = vmul.f32 %v3537_v40, %v3080_v57 }
 0x35e   : > { %v3556_v6 = vmul.f32 %v3540_v16, %v3083_v0  ;;  %v3555_v54 = vmul.f32 %v3539_v11, %v3082_v44  ;;  %v3558_v3 = vmul.f32 %v3542_v53, %v3085_v46  ;;  %v3557_v28 = vmul.f32 %v3541_v14, %v3084_v7 }
 0x35f   : > { %4209 = vmatprep.mubr.msk.f32.mxu0 %vm2864_vm7, %v3551_v31  ;;  %4212 = vmatprep.mubr.msk.f32.mxu1 %vm2864_vm7, %v3553_v10 }
 0x360   : > { %4210 = vmatmul.mubr.msk.f32.vlgmr.msra.gmra.mrb[32].mxu0 %vm2864_vm7, %v3552_v61  ;;  %4213 = vmatmul.mubr.msk.f32.vlgmr.msra.gmra.mrb[16].mxu1 %vm2864_vm7, %v3554_v42 }
 0x361   : > { %4215 = vmatprep.mubr.msk.f32.mxu1 %vm2864_vm7, %v3555_v54 }
 0x364   : > { %4216 = vmatmul.mubr.msk.f32.gmra.mrb[18].mxu1 %vm2864_vm7, %v3556_v6 }
 0x365   : > { %4218 = vmatprep.mubr.msk.f32.mxu1 %vm2864_vm7, %v3557_v28 }
 0x368   : > { %4219 = vmatmul.mubr.msk.f32.gmra.mrb[20].mxu1 %vm2864_vm7, %v3558_v3 }
 0x370   : > { %v4151_v23 = vpop.f32.mrb[8].mxu1 }
 0x371   : > { %v3192_v30 = vsub.f32 %v7406_v32, %v4151_v23  ;;  %v3152_v5 = vpop.f32.mrb[9].mxu1 }
 0x372   : > { %v3191_v55 = vsub.f32 %v7285_v36, %v3152_v5 }
 0x373   : > { %v3200_v48 = vsel %vm2864_vm7, %v3192_v30, -inf }
 0x374   : > { %v4154_v2 = vpop.f32.mrb[10].mxu1  ;;  %v3199_v32 = vsel %vm2864_vm7, %v3191_v55, -inf }
 0x375   : > { %v3194_v12 = vsub.f32 %v7468_v62, %v4154_v2  ;;  %v3162_v41 = vpop.f32.mrb[11].mxu1 }
 0x376   : > { %v3193_v29 = vsub.f32 %v7415_v63, %v3162_v41 }
 0x378   : > { %v4157_v60 = vpop.f32.mrb[12].mxu1  ;;  %v3201_v24 = vsel %vm2864_vm7, %v3193_v29, -inf }
 0x379   : > { %v3196_v21 = vsub.f32 %v7483_v22, %v4157_v60  ;;  %v3172_v56 = vpop.f32.mrb[13].mxu1 }
 0x37a   : > { %v3195_v27 = vsub.f32 %v7490_v26, %v3172_v56  ;;  %v3202_v26 = vsel %vm2864_vm7, %v3194_v12, -inf }
 0x37b   : > { %v3205_v4 = vsel %vm2864_vm7, %v3196_v21, -inf }
 0x37c   : > { %v3206_v47 = vmax.f32 %v3200_v48, %v3205_v4  ;;  %v3203_v36 = vsel %vm2864_vm7, %v3195_v27, -inf  ;;  %v7707_v25 = vpop.f32.mrb[14].mxu1 }
 0x37d   : > { %v3204_v62 = vmax.f32 %v3199_v32, %v3203_v36  ;;  %v3198_v63 = vsub.f32 %v7501_v39, %v7707_v25  ;;  %v3182_v45 = vpop.f32.mrb[15].mxu1 }
 0x37e   : > { %v3197_v22 = vsub.f32 %v7496_v35, %v3182_v45 }
 0x37f   : > { %v3211_v59 = vmax.f32 %v3204_v62, %v3206_v47  ;;  %v3209_v18 = vsel %vm2864_vm7, %v3198_v63, -inf }
 0x380   : > { %v3210_v40 = vmax.f32 %v3202_v26, %v3209_v18  ;;  %v3207_v16 = vsel %vm2864_vm7, %v3197_v22, -inf }
 0x381   : > { %v3208_v11 = vmax.f32 %v3201_v24, %v3207_v16  ;;  %v7736_v16 = vadd.f32 %v7673_v51, %v7595_v37  ;;  %v7753_v51 = vadd.f32 %v7685_v43, %v7595_v37 }
 0x383   : > { %v3212_v53 = vmax.f32 %v3208_v11, %v3210_v40  ;;  %v3953_v43 = vmul.f32 -1.442695, %v7753_v51 }
 0x385   : > { %v3213_v14 = vmax.f32 %v3211_v59, %v3212_v53  ;;  %v7740_v53 = vadd.f32 %v7595_v37, %v7675_v8  ;;  %v7758_v8 = vadd.f32 %v7595_v37, %v7688_v1 }
 0x387   : > { %v3214_v20 = vrot.slane %v3213_v14, 4  ;;  %v3952_v1 = vmul.f32 -1.442695, %v7758_v8 }
 0x389   : > { %v3215_v17 = vmax.f32 %v3213_v14, %v3214_v20  ;;  %v7744_v14 = vadd.f32 %v7677_v13, %v7595_v37 }
 0x38b   : > { %v3216_v52 = vrot.slane %v3215_v17, 2  ;;  %v3951_v13 = vmul.f32 -1.442695, %v7744_v14 }
 0x38d   : > { %v3217_v39 = vmax.f32 %v3215_v17, %v3216_v52  ;;  %v7748_v17 = vadd.f32 %v7595_v37, %v7681_v58  ;;  %v3949_v52 = vmul.f32 -1.442695, %v7736_v16 }
 0x38f   : > { %v3218_v57 = vrot.slane %v3217_v39, 1 }
 0x391   : > { %v7716_v0 = vmax.f32 %v3217_v39, %v3218_v57  ;;  %v3948_v57 = vmul.f32 -1.442695, %v7740_v53 }
 0x393   : > { %v3220_v35 = vsub.f32 %v3191_v55, %v7716_v0  ;;  %v3221_v44 = vsub.f32 %v3192_v30, %v7716_v0  ;;  %v3222_v46 = vsub.f32 %v3193_v29, %v7716_v0  ;;  %v3223_v7 = vsub.f32 %v3194_v12, %v7716_v0 }
 0x394   : > { %v3224_v61 = vsub.f32 %v3195_v27, %v7716_v0  ;;  %v3225_v31 = vsub.f32 %v3196_v21, %v7716_v0  ;;  %v3226_v42 = vsub.f32 %v3197_v22, %v7716_v0  ;;  %v3227_v10 = vsub.f32 %v3198_v63, %v7716_v0 }
 0x395   : > { %v3228_v6 = vmul.f32 1.442695, %v3220_v35  ;;  %v3230_v54 = vmul.f32 1.442695, %v3221_v44  ;;  %v3232_v3 = vmul.f32 1.442695, %v3222_v46  ;;  %v7763_v35 = vadd.f32 %v7690_v50, %v7595_v37 }
 0x396   : > { %v3234_v28 = vmul.f32 1.442695, %v3223_v7  ;;  %v3236_v23 = vmul.f32 1.442695, %v3224_v61  ;;  %v3238_v30 = vmul.f32 1.442695, %v3225_v31  ;;  %v7769_v46 = vadd.f32 %v7595_v37, %v7692_v49 }
 0x397   : > { %4797 = vpow2.f32 %v3228_v6  ;;  %v3240_v5 = vmul.f32 1.442695, %v3226_v42  ;;  %v3242_v55 = vmul.f32 1.442695, %v3227_v10  ;;  %v3950_v44 = vmul.f32 -1.442695, %v7748_v17 }
 0x398   : > { %4799 = vpow2.f32 %v3230_v54  ;;  %v3955_v61 = vmul.f32 -1.442695, %v7763_v35  ;;  %v3954_v50 = vmul.f32 -1.442695, %v7769_v46 }
 0x399   : > { %4801 = vpow2.f32 %v3232_v3 }
 0x39a   : > { %4803 = vpow2.f32 %v3234_v28 }
 0x39b   : > { %4805 = vpow2.f32 %v3236_v23 }
 0x39c   : > { %4807 = vpow2.f32 %v3238_v30 }
 0x39d   : > { %4809 = vpow2.f32 %v3240_v5 }
 0x39e   : > { %4811 = vpow2.f32 %v3242_v55 }
 0x39f   : > { %4813 = vpow2.f32 %v3949_v52  ;;  %v8339_v52 = vld [vmem:[#allocation48_spill] sm:$0xff] }
 0x3a0   : > { %4815 = vpow2.f32 %v3948_v57 }
 0x3a1   : > { %v4798_v2 = vpop.eup %4797  ;;  %4817 = vpow2.f32 %v3951_v13 }
 0x3a2   : > { %v4800_v12 = vpop.eup %4799  ;;  %v3244_v41 = vsel %vm2864_vm7, %v4798_v2, 0.0  ;;  %4819 = vpow2.f32 %v3950_v44  ;;  %v2855_v44 = vmul.f32 %v7644_v34, %v7376_v38 }
 0x3a3   : > { %v4802_v29 = vpop.eup %4801  ;;  %v3245_v60 = vsel %vm2864_vm7, %v4800_v12, 0.0  ;;  %4821 = vpow2.f32 %v3953_v43  ;;  %v2854_v43 = vmul.f32 %v7644_v34, %v7353_v15 }
 0x3a4   : > { %v4804_v21 = vpop.eup %4803  ;;  %v3246_v56 = vadd.f32 %v3245_v60, %v3244_v41  ;;  %v3247_v27 = vsel %vm2864_vm7, %v4802_v29, 0.0  ;;  %4823 = vpow2.f32 %v3952_v1 }
 0x3a5   : > { %v4806_v48 = vpop.eup %4805  ;;  %v3249_v32 = vsel %vm2864_vm7, %v4804_v21, 0.0  ;;  %4825 = vpow2.f32 %v3955_v61 }
 0x3a6   : > { %v3248_v4 = vadd.f32 %v3247_v27, %v3246_v56  ;;  %v4808_v47 = vpop.eup %4807  ;;  %v3251_v62 = vsel %vm2864_vm7, %v4806_v48, 0.0 }
 0x3a7   : > { %v4810_v63 = vpop.eup %4809  ;;  %v3253_v22 = vsel %vm2864_vm7, %v4808_v47, 0.0 }
 0x3a8   : > { %v3250_v36 = vadd.f32 %v3249_v32, %v3248_v4  ;;  %v4812_v26 = vpop.eup %4811  ;;  %v3255_v18 = vsel %vm2864_vm7, %v4810_v63, 0.0 }
 0x3a9   : > { %v3257_v40 = vsel %vm2864_vm7, %v4812_v26, 0.0  ;;  %v4814_v10 = vpop.eup %4813 }
 0x3aa   : > { %v3252_v45 = vadd.f32 %v3251_v62, %v3250_v36  ;;  %v4816_v37 = vpop.eup %4815  ;;  %v3496_v3 = vadd.f32 1.0, %v4814_v10 }
 0x3ab   : > { %v4818_v49 = vpop.eup %4817  ;;  %v3495_v23 = vadd.f32 1.0, %v4816_v37 }
 0x3ac   : > { %v3254_v59 = vadd.f32 %v3253_v22, %v3252_v45  ;;  %v4820_v6 = vpop.eup %4819  ;;  %v3498_v5 = vadd.f32 1.0, %v4818_v49 }
 0x3ad   : > { %v4822_v54 = vpop.eup %4821  ;;  %v3497_v2 = vadd.f32 1.0, %v4820_v6 }
 0x3ae   : > { %v3256_v24 = vadd.f32 %v3255_v18, %v3254_v59  ;;  %v4824_v28 = vpop.eup %4823  ;;  %v3500_v29 = vadd.f32 1.0, %v4822_v54  ;;  %v8336_v18 = vld [vmem:[#allocation58_spill] sm:$0xff] }
 0x3af   : > { %v4826_v30 = vpop.eup %4825  ;;  %v3499_v60 = vadd.f32 1.0, %v4824_v28 }
 0x3b0   : > { %v3258_v11 = vadd.f32 %v3257_v40, %v3256_v24  ;;  %v3502_v56 = vadd.f32 1.0, %v4826_v30  ;;  %v8337_v24 = vld [vmem:[#allocation43_spill] sm:$0xff] }
 0x3b1   : > { %v2851_v40 = vmul.f32 %v7644_v34, %v8337_v24 }
 0x3b2   : > { %v3259_v20 = vrot.slane %v3258_v11, 4 }
 0x3b4   : > { %v3260_v39 = vadd.f32 %v3259_v20, %v3258_v11  ;;  %v8338_v11 = vld [vmem:[#allocation14_spill] sm:$0xff] }
 0x3b5   : > { %v2850_v20 = vmul.f32 %v7644_v34, %v8338_v11 }
 0x3b6   : > { %v3261_v58 = vrot.slane %v3260_v39, 2 }
 0x3b8   : > { %v3262_v7 = vadd.f32 %v3261_v58, %v3260_v39  ;;  %v2853_v39 = vmul.f32 %v7644_v34, %v8339_v52  ;;  %v2852_v58 = vmul.f32 %v7644_v34, %v7322_v9 }
 0x3ba   : > { %v3263_v31 = vrot.slane %v3262_v7, 1 }
 0x3bc   : > { %v3264_v42 = vadd.f32 %v3263_v31, %v3262_v7 }
 0x3be   : > { %4827 = vlog2.f32 %v3264_v42 }
 0x3bf   : > { %4829 = vpow2.f32 %v3954_v50 }
 0x3c0   : > { %4831 = vrcp.f32 %v3496_v3 }
 0x3c1   : > { %4833 = vrcp.f32 %v3495_v23 }
 0x3c2   : > { %4835 = vrcp.f32 %v3498_v5 }
 0x3c3   : > { %4837 = vrcp.f32 %v3497_v2 }
 0x3c4   : > { %4839 = vrcp.f32 %v3500_v29 }
 0x3c5   : > { %4841 = vrcp.f32 %v3499_v60 }
 0x3c6   : > { %4843 = vrcp.f32 %v3502_v56 }
 0x3c8   : > { %v4828_v55 = vpop.eup %4827 }
 0x3c9   : > { %v4830_v12 = vpop.eup %4829  ;;  %v3266_v41 = vmul.f32 0.6931472, %v4828_v55 }
 0x3ca   : > { %v3501_v27 = vadd.f32 1.0, %v4830_v12  ;;  %v4832_v32 = vpop.eup %4831 }
 0x3cb   : > { %v3267_v21 = vadd.f32 %v3266_v41, %v7716_v0  ;;  %v4834_v47 = vpop.eup %4833  ;;  %v8335_v0 = vld [vmem:[#allocation55_spill] sm:$0xff]  ;;  %v3544_v13 = vmul.f32 %v4832_v32, %v7736_v16 }
 0x3cc   : > { %4845 = vrcp.f32 %v3501_v27  ;;  %v4836_v36 = vpop.eup %4835  ;;  %v2848_v26 = vmul.f32 %v7644_v34, %v8335_v0  ;;  %v3543_v1 = vmul.f32 %v4834_v47, %v7740_v53 }
 0x3cd   : > { %v3268_v48 = vadd.f32 %v7707_v25, %v3267_v21  ;;  %v4838_v62 = vpop.eup %4837  ;;  %v2849_v25 = vmul.f32 %v7644_v34, %v8336_v18  ;;  %v3546_v61 = vmul.f32 %v4836_v36, %v7744_v14 }
 0x3ce   : > { %v4840_v63 = vpop.eup %4839  ;;  %v3545_v31 = vmul.f32 %v4838_v62, %v7748_v17 }
 0x3cf   : > { %v3269_v4 = vmul.f32 1.442695, %v3268_v48  ;;  %v4842_v45 = vpop.eup %4841  ;;  %v3548_v16 = vmul.f32 %v4840_v63, %v7753_v51 }
 0x3d0   : > { %v4844_v22 = vpop.eup %4843  ;;  %v3547_v50 = vmul.f32 %v4842_v45, %v7758_v8 }
 0x3d1   : > { %4847 = vpow2.f32 %v3269_v4  ;;  %v3550_v9 = vmul.f32 %v4844_v22, %v7763_v35  ;;  %v3956_v35 = vld [vmem:[%s7869_s14] ss:$0 sm:$0xff] }
 0x3d6   : > { %v4846_v59 = vpop.eup %4845 }
 0x3d7   : > { %v3549_v38 = vmul.f32 %v4846_v59, %v7769_v46 }
 0x3db   : > { %v4848_v57 = vpop.eup %4847 }
 0x3dc   : > { %v3274_v7 = vrot.slane %v4848_v57, %v3076_v19 }
 0x3de   : > { %v3276_v42 = vadd.f32 %v3274_v7, %v2849_v25  ;;  %v3275_v10 = vadd.f32 %v3274_v7, %v2848_v26  ;;  %v3278_v15 = vadd.f32 %v3274_v7, %v2851_v40  ;;  %v3277_v34 = vadd.f32 %v3274_v7, %v2850_v20 }
 0x3df   : > { %v3280_v33 = vadd.f32 %v3274_v7, %v2853_v39  ;;  %v3279_v19 = vadd.f32 %v3274_v7, %v2852_v58  ;;  %v3282_v37 = vadd.f32 %v3274_v7, %v2855_v44  ;;  %v3281_v53 = vadd.f32 %v3274_v7, %v2854_v43 }
 0x3e0   : > { %v3560_v49 = vmul.f32 %v3544_v13, %v3276_v42  ;;  %v3559_v14 = vmul.f32 %v3543_v1, %v3275_v10  ;;  %v3562_v17 = vmul.f32 %v3546_v61, %v3278_v15  ;;  %v3561_v6 = vmul.f32 %v3545_v31, %v3277_v34 }
 0x3e1   : > { %v3564_v51 = vmul.f32 %v3548_v16, %v3280_v33  ;;  %v3563_v54 = vmul.f32 %v3547_v50, %v3279_v19  ;;  %v3566_v8 = vmul.f32 %v3550_v9, %v3282_v37  ;;  %v3565_v3 = vmul.f32 %v3549_v38, %v3281_v53 }
 0x3e2   : > { %4221 = vmatprep.mubr.msk.f32.mxu1 %vm2864_vm7, %v3559_v14 }
 0x3e3   : > { %4222 = vmatmul.mubr.msk.f32.gmra.mrb[22].mxu1 %vm2864_vm7, %v3560_v49 }
 0x3e4   : > { %4224 = vmatprep.mubr.msk.f32.mxu1 %vm2864_vm7, %v3561_v6 }
 0x3e7   : > { %4225 = vmatmul.mubr.msk.f32.gmra.mrb[24].mxu1 %vm2864_vm7, %v3562_v17 }
 0x3e8   : > { %4227 = vmatprep.mubr.msk.f32.mxu1 %vm2864_vm7, %v3563_v54 }
 0x3eb   : > { %4228 = vmatmul.mubr.msk.f32.gmra.mrb[26].mxu1 %vm2864_vm7, %v3564_v51 }
 0x3ec   : > { %4230 = vmatprep.mubr.msk.f32.mxu1 %vm2864_vm7, %v3565_v3 }
 0x3ef   : > { %4231 = vmatmul.mubr.msk.f32.gmra.mrb[28].mxu1 %vm2864_vm7, %v3566_v8 }
 0x433   : > { %v4211_v46 = vpop.f32.mrb[32].mxu0  ;;  %v4214_v28 = vpop.f32.mrb[16].mxu1 }
 0x434   : > { %v3702_v23 = vadd.f32 %v4211_v46, %v3956_v35  ;;  %v3712_v30 = vadd.f32 %v4214_v28, %v3956_v35  ;;  %v3696_v5 = vpop.f32.mrb[33].mxu0  ;;  %v3706_v55 = vpop.f32.mrb[17].mxu1 }
 0x435   : > { %v3697_v2 = vadd.f32 %v3956_v35, %v3696_v5  ;;  %v3707_v12 = vadd.f32 %v3956_v35, %v3706_v55 }
 0x436   : > { %3776 = vst.msk [vmem:[%s7818_s29 + $0x8] sm:$0xff] %vm530_vm0, %v3702_v23  ;;  %3778 = vst.msk [vmem:[%s7818_s29 + $0x18] sm:$0xff] %vm530_vm0, %v3712_v30 }
 0x437   : > { %3775 = vst.msk [vmem:[%s7818_s29] sm:$0xff] %vm530_vm0, %v3697_v2  ;;  %3777 = vst.msk [vmem:[%s7818_s29 + $0x10] sm:$0xff] %vm530_vm0, %v3707_v12  ;;  %v4217_v41 = vpop.f32.mrb[18].mxu1 }
 0x438   : > { %v3722_v29 = vadd.f32 %v4217_v41, %v3956_v35  ;;  %v3716_v60 = vpop.f32.mrb[19].mxu1 }
 0x439   : > { %v3717_v21 = vadd.f32 %v3956_v35, %v3716_v60 }
 0x43a   : > { %3780 = vst.msk [vmem:[%s7818_s29 + $0x28] sm:$0xff] %vm530_vm0, %v3722_v29 }
 0x43b   : > { %3779 = vst.msk [vmem:[%s7818_s29 + $0x20] sm:$0xff] %vm530_vm0, %v3717_v21  ;;  %v4220_v56 = vpop.f32.mrb[20].mxu1 }
 0x43c   : > { %v3732_v27 = vadd.f32 %v4220_v56, %v3956_v35  ;;  %v3726_v48 = vpop.f32.mrb[21].mxu1 }
 0x43d   : > { %v3727_v4 = vadd.f32 %v3956_v35, %v3726_v48 }
 0x43e   : > { %3782 = vst.msk [vmem:[%s7818_s29 + $0x38] sm:$0xff] %vm530_vm0, %v3732_v27 }
 0x43f   : > { %3781 = vst.msk [vmem:[%s7818_s29 + $0x30] sm:$0xff] %vm530_vm0, %v3727_v4 }
 0x4b6   : > { %v4223_v32 = vpop.f32.mrb[22].mxu1 }
 0x4b7   : > { %v3742_v47 = vadd.f32 %v4223_v32, %v3956_v35  ;;  %v3736_v36 = vpop.f32.mrb[23].mxu1 }
 0x4b8   : > { %v3737_v62 = vadd.f32 %v3956_v35, %v3736_v36 }
 0x4b9   : > { %3784 = vst.msk [vmem:[%s7818_s29 + $0x48] sm:$0xff] %vm530_vm0, %v3742_v47 }
 0x4ba   : > { %3783 = vst.msk [vmem:[%s7818_s29 + $0x40] sm:$0xff] %vm530_vm0, %v3737_v62  ;;  %v4226_v63 = vpop.f32.mrb[24].mxu1 }
 0x4bb   : > { %v3752_v45 = vadd.f32 %v4226_v63, %v3956_v35  ;;  %v3746_v22 = vpop.f32.mrb[25].mxu1 }
 0x4bc   : > { %v3747_v0 = vadd.f32 %v3956_v35, %v3746_v22 }
 0x4bd   : > { %3786 = vst.msk [vmem:[%s7818_s29 + $0x58] sm:$0xff] %vm530_vm0, %v3752_v45 }
 0x4be   : > { %3785 = vst.msk [vmem:[%s7818_s29 + $0x50] sm:$0xff] %vm530_vm0, %v3747_v0  ;;  %v4229_v26 = vpop.f32.mrb[26].mxu1 }
 0x4bf   : > { %v3762_v59 = vadd.f32 %v4229_v26, %v3956_v35  ;;  %v3756_v18 = vpop.f32.mrb[27].mxu1 }
 0x4c0   : > { %v3757_v25 = vadd.f32 %v3956_v35, %v3756_v18 }
 0x4c1   : > { %3788 = vst.msk [vmem:[%s7818_s29 + $0x68] sm:$0xff] %vm530_vm0, %v3762_v59 }
 0x4c2   : > { %3787 = vst.msk [vmem:[%s7818_s29 + $0x60] sm:$0xff] %vm530_vm0, %v3757_v25  ;;  %v4232_v24 = vpop.f32.mrb[28].mxu1 }
 0x4c3   : > { %v3772_v40 = vadd.f32 %v4232_v24, %v3956_v35  ;;  %v3766_v11 = vpop.f32.mrb[29].mxu1 }
 0x4c4   : > { %v3767_v20 = vadd.f32 %v3956_v35, %v3766_v11 }
 0x4c5   : > { %3790 = vst.msk [vmem:[%s7818_s29 + $0x78] sm:$0xff] %vm530_vm0, %v3772_v40 }
 0x4c6   : > { %3789 = vst.msk [vmem:[%s7818_s29 + $0x70] sm:$0xff] %vm530_vm0, %v3767_v20 }
 0x4c7 PF: > { %s25_s18 = sadd.s32 1, %s4900_s18  }
 0x4c8   : > { %p22_p4 = scmp.ge.s32.totalorder %s25_s18, 4  }
 0x4ca   :  { %24 = sbr.rel (!%p22_p4) target bundleno = 1 (0x1), region = 110 }

</bundles_post_ra>
